<compile_context>
chip_gen: v7x
topology: tpu7x:2x2x1
jax: 0.10.0
libtpu: 0.0.40
codegen_flags: <defaults>
</compile_context>

<pallas_src>
import functools

import jax
import jax.numpy as jnp
from jax.experimental import pallas as pl
from jax.experimental.pallas import tpu as pltpu


# ----------------------------- fused forward kernel --------------------------

def _fused_cnn_kernel(*refs, n_conv, P, H, W, KH, KW, cins, couts, oh, ow,
                      pred):
    """One grid step == one batch element: conv stack -> pool -> MLP head.

    refs = [x, (conv_w, conv_b) * n_conv, wh, bh, (wp1, bp1, wp2, bp2 if pred),
            out, pad_scratch * n_conv]
    """
    x_ref = refs[0]
    conv_w = [refs[1 + 2 * i] for i in range(n_conv)]   # (KH, KW, Cin, Cout)
    conv_b = [refs[2 + 2 * i] for i in range(n_conv)]   # (1, Cout)
    pos = 1 + 2 * n_conv
    wh_ref, bh_ref = refs[pos], refs[pos + 1]
    pos += 2
    if pred:
        wp1_ref, bp1_ref, wp2_ref, bp2_ref = refs[pos:pos + 4]
        pos += 4
    o_ref = refs[pos]
    pad_refs = refs[pos + 1:]                            # per-layer padded act

    ph, pw = (KH - 1) // 2, (KW - 1) // 2
    Hout, Wout = H, W                    # 'same' conv, stride 1, odd kernel
    c_last = couts[-1]
    n_out = o_ref.shape[-1]

    # Zero the padded-activation scratches each step so the border is always
    # zero no matter how the parallel grid is split across TensorCores.
    for s in pad_refs:
        s[...] = jnp.zeros_like(s)

    # net_h accumulator with the bias folded in once.
    h_acc = bh_ref[...].astype(jnp.float32)              # (1, h_dims)

    for p in range(P):                                    # patches (static)
        # conv1 input into the padded scratch interior (borders stay zero).
        pad_refs[0][p, ph:ph + H, pw:pw + W, :] = x_ref[p]

        act = None
        for li in range(n_conv):
            cin, cout = cins[li], couts[li]
            acc = jnp.zeros((Hout * Wout, cout), jnp.float32)
            # Shifted-view taps of the VMEM-resident padded activation,
            # accumulated in f32 on the MXU.
            for kh in range(KH):
                for kw in range(KW):
                    tap = pad_refs[li][p, kh:kh + Hout, kw:kw + Wout, :]
                    acc = acc + jnp.dot(
                        tap.reshape(Hout * Wout, cin), conv_w[li][kh, kw],
                        preferred_element_type=jnp.float32)
            acc = acc + conv_b[li][...]
            if li < n_conv - 1:
                # nn.LeakyReLU default negative_slope = 0.01
                acc = jnp.where(acc >= 0.0, acc, 0.01 * acc)
                pad_refs[li + 1][p, ph:ph + Hout, pw:pw + Wout, :] = (
                    acc.reshape(Hout, Wout, cout))
            act = acc                                     # (HW, cout)

        # ---- AdaptiveMaxPool2d fused with flatten + net_h matmul ----
        a3 = act.reshape(Hout, Wout, c_last)
        for i in range(oh):
            h0 = (i * Hout) // oh
            h1 = -((-(i + 1) * Hout) // oh)               # ceil
            for j in range(ow):
                w0 = (j * Wout) // ow
                w1 = -((-(j + 1) * Wout) // ow)
                v = jnp.max(a3[h0:h1, w0:w1, :], axis=(0, 1),
                            keepdims=True).reshape(1, c_last)
                base = ((p * oh + i) * ow + j) * c_last   # pre-permuted rows
                h_acc = h_acc + jnp.dot(
                    v, wh_ref[base:base + c_last, :],
                    preferred_element_type=jnp.float32)

    if pred:
        z = jnp.dot(h_acc, wp1_ref[...], preferred_element_type=jnp.float32)
        z = jnp.maximum(z + bp1_ref[...], 0.0)            # ReLU
        out = jnp.dot(z, wp2_ref[...],
                      preferred_element_type=jnp.float32) + bp2_ref[...]
    else:
        out = h_acc
    o_ref[...] = out.reshape(1, 1, n_out).astype(o_ref.dtype)


def cnn_forward(x5, kparams, *, kernel_size, final_pool_size, pred):
    """x5: (B, P, C, H, W), PyTorch layout.  Returns (B, n_classes|h_dims)."""
    assert x5.ndim == 5
    B, P, C, H, W = x5.shape
    KH, KW = kernel_size
    assert KH % 2 == 1 and KW % 2 == 1, (
        "PyTorch-compatible 'same' padding requires odd kernel sizes")
    oh, ow = final_pool_size
    ph, pw = (KH - 1) // 2, (KW - 1) // 2

    # coalesce_mode == 'sample': fold patches into the batch dim; NCHW -> NHWC.
    x = jnp.transpose(x5, (0, 1, 3, 4, 2)).reshape(B * P, H, W, C)

    conv_ws = [w for (w, _) in kparams["convs"]]
    conv_bs = [b for (_, b) in kparams["convs"]]
    n_conv = len(conv_ws)
    cins = tuple([C] + [w.shape[3] for w in conv_ws[:-1]])
    couts = tuple(w.shape[3] for w in conv_ws)
    wh, bh = kparams["net_h"]
    h_dims = wh.shape[1]
    if pred:
        wp1, bp1 = kparams["net_p1"]
        wp2, bp2 = kparams["net_p2"]
        n_out = wp2.shape[1]
    else:
        n_out = h_dims

    inputs = [x]
    for w, b in zip(conv_ws, conv_bs):
        inputs += [w, b]
    inputs += [wh, bh]
    if pred:
        inputs += [wp1, bp1, wp2, bp2]

    def const_map(ndim):
        return lambda b: (0,) * ndim

    in_specs = [pl.BlockSpec((P, H, W, C), lambda b: (b, 0, 0, 0))]
    for arr in inputs[1:]:
        in_specs.append(pl.BlockSpec(arr.shape, const_map(arr.ndim)))

    kernel = functools.partial(
        _fused_cnn_kernel, n_conv=n_conv, P=P, H=H, W=W, KH=KH, KW=KW,
        cins=cins, couts=couts, oh=oh, ow=ow, pred=pred)

    out = pl.pallas_call(
        kernel,
        out_shape=jax.ShapeDtypeStruct((B, 1, n_out), x5.dtype),
        grid=(B,),
        in_specs=in_specs,
        out_specs=pl.BlockSpec((1, 1, n_out), lambda b: (b, 0, 0)),
        scratch_shapes=[
            pltpu.VMEM((P, H + 2 * ph, W + 2 * pw, cins[i]), jnp.float32)
            for i in range(n_conv)
        ],
        compiler_params=pltpu.CompilerParams(
            dimension_semantics=("parallel",)),
    )(*inputs)
    return out.reshape(B, n_out)


# ----------------------------- parameters ------------------------------------

def init_params(key, *, in_channels, filters, kernel_size, final_pool_size,
                h_dims, n_classes, n_patches):
    """Deterministic synthetic parameters in PyTorch layout
    (Conv2d: (Cout, Cin, KH, KW); Linear: (out, in))."""
    KH, KW = kernel_size
    convs = []
    cin = in_channels
    for f in filters:
        key, kw_ = jax.random.split(key)
        w = jax.random.normal(kw_, (f, cin, KH, KW), jnp.float32)
        w = w * (2.0 / (cin * KH * KW)) ** 0.5
        b = jnp.zeros((f,), jnp.float32)               # INIT.constant_(bias, 0)
        convs.append((w, b))
        cin = f

    flat = filters[-1] * final_pool_size[0] * final_pool_size[1] * n_patches
    key, k1, k2, k3, k4, k5, k6 = jax.random.split(key, 7)

    def lin(kw_, kb_, fin, fout):
        w = jax.random.normal(kw_, (fout, fin), jnp.float32) * (1.0 / fin) ** 0.5
        b = jax.random.normal(kb_, (fout,), jnp.float32) * 0.01
        return w, b

    return dict(convs=convs,
                net_h=lin(k1, k2, flat, h_dims),
                net_p1=lin(k3, k4, h_dims, h_dims),
                net_p2=lin(k5, k6, h_dims, n_classes))


def prepare_params(pt_params, *, final_pool_size, n_patches):
    """One-time host-side conversion from PyTorch layout to kernel layout.

    * conv:  (Cout, Cin, KH, KW) -> (KH, KW, Cin, Cout); bias -> (1, Cout)
    * net_h: rows permuted from PyTorch flatten order (p, c, i, j) to the
             kernel's pooled-feature order (p, i, j, c), so the flatten /
             transpose never happens at run time.
    * other linears: (out, in) -> (in, out); bias -> (1, out)
    """
    oh, ow = final_pool_size
    convs = []
    for w, b in pt_params["convs"]:
        cout = w.shape[0]
        convs.append((jnp.transpose(w, (2, 3, 1, 0)), b.reshape(1, cout)))
    c_last = pt_params["convs"][-1][0].shape[0]

    wh, bh = pt_params["net_h"]
    h_dims = wh.shape[0]
    wh = jnp.transpose(wh)                                    # (flat_pt, h)
    wh = wh.reshape(n_patches, c_last, oh, ow, h_dims)
    wh = jnp.transpose(wh, (0, 2, 3, 1, 4)).reshape(-1, h_dims)

    def lin(w, b):
        return jnp.transpose(w), b.reshape(1, -1)

    return dict(convs=convs,
                net_h=(wh, bh.reshape(1, h_dims)),
                net_p1=lin(*pt_params["net_p1"]),
                net_p2=lin(*pt_params["net_p2"]))


# ----------------------------- demo ------------------------------------------

if __name__ == "__main__":
    config = dict(
        in_channels=4,
        filters=[8, 8],
        kernel_size=(3, 3),
        final_pool_size=(2, 2),
        h_dims=32,
        n_classes=5,
        n_patches=1,
    )
    key = jax.random.PRNGKey(0)
    kp, kx = jax.random.split(key)
    pt_params = init_params(kp, **config)
    params = prepare_params(pt_params,
                            final_pool_size=config["final_pool_size"],
                            n_patches=config["n_patches"])

    B, P = 2, config["n_patches"]
    x = jax.random.normal(
        kx, (B, P, config["in_channels"], 16, 16), jnp.float32)

    fwd = jax.jit(functools.partial(
        cnn_forward,
        kernel_size=config["kernel_size"],
        final_pool_size=config["final_pool_size"],
        pred=True))
    out = jax.block_until_ready(fwd(x, params))
    assert out.shape == (B, config["n_classes"])
    assert bool(jnp.all(jnp.isfinite(out)))
    print("KERNEL_OK")
</pallas_src>

<mosaic_0001>
module attributes {stable_mosaic.version = 11 : i64} {
  func.func @_fused_cnn_kernel(%arg0: i32, %arg1: memref<1x16x16x4xf32, #tpu.memory_space<vmem>>, %arg2: memref<3x3x4x8xf32, #tpu.memory_space<vmem>>, %arg3: memref<1x8xf32, #tpu.memory_space<vmem>>, %arg4: memref<3x3x8x8xf32, #tpu.memory_space<vmem>>, %arg5: memref<1x8xf32, #tpu.memory_space<vmem>>, %arg6: memref<32x32xf32, #tpu.memory_space<vmem>>, %arg7: memref<1x32xf32, #tpu.memory_space<vmem>>, %arg8: memref<32x32xf32, #tpu.memory_space<vmem>>, %arg9: memref<1x32xf32, #tpu.memory_space<vmem>>, %arg10: memref<32x5xf32, #tpu.memory_space<vmem>>, %arg11: memref<1x5xf32, #tpu.memory_space<vmem>>, %arg12: memref<1x1x5xf32, #tpu.memory_space<vmem>>, %arg13: memref<1x18x18x4xf32, #tpu.memory_space<vmem>>, %arg14: memref<1x18x18x8xf32, #tpu.memory_space<vmem>>) attributes {dimension_semantics = [#tpu.dimension_semantics<parallel>], iteration_bounds = array<i64: 2>, scalar_prefetch = 0 : i64, scratch_operands = 2 : i64, tpu.core_type = #tpu.core_type<tc>, window_params = [{transform_indices = @transform_0, window_bounds = array<i64: 1, 16, 16, 4>}, {pipeline_mode = #tpu.pipeline_mode<synchronous>, transform_indices = @transform_1, window_bounds = array<i64: 3, 3, 4, 8>}, {pipeline_mode = #tpu.pipeline_mode<synchronous>, transform_indices = @transform_2, window_bounds = array<i64: 1, 8>}, {pipeline_mode = #tpu.pipeline_mode<synchronous>, transform_indices = @transform_3, window_bounds = array<i64: 3, 3, 8, 8>}, {pipeline_mode = #tpu.pipeline_mode<synchronous>, transform_indices = @transform_4, window_bounds = array<i64: 1, 8>}, {pipeline_mode = #tpu.pipeline_mode<synchronous>, transform_indices = @transform_5, window_bounds = array<i64: 32, 32>}, {pipeline_mode = #tpu.pipeline_mode<synchronous>, transform_indices = @transform_6, window_bounds = array<i64: 1, 32>}, {pipeline_mode = #tpu.pipeline_mode<synchronous>, transform_indices = @transform_7, window_bounds = array<i64: 32, 32>}, {pipeline_mode = #tpu.pipeline_mode<synchronous>, transform_indices = @transform_8, window_bounds = array<i64: 1, 32>}, {pipeline_mode = #tpu.pipeline_mode<synchronous>, transform_indices = @transform_9, window_bounds = array<i64: 32, 5>}, {pipeline_mode = #tpu.pipeline_mode<synchronous>, transform_indices = @transform_10, window_bounds = array<i64: 1, 5>}, {transform_indices = @transform_11, window_bounds = array<i64: 1, 1, 5>}]} {
    %cst = arith.constant 0.000000e+00 : f32
    %0 = vector.broadcast %cst : f32 to vector<1x18x18x4xf32>
    %c0 = arith.constant 0 : index
    %c0_0 = arith.constant 0 : index
    %c0_1 = arith.constant 0 : index
    %c0_2 = arith.constant 0 : index
    %1 = vector.load %arg13[%c0, %c0_0, %c0_1, %c0_2] : memref<1x18x18x4xf32, #tpu.memory_space<vmem>>, vector<1x18x18x4xf32>
    tpu.vector_store %arg13[%c0, %c0_0, %c0_1, %c0_2], %0 {strides = array<i32>} : memref<1x18x18x4xf32, #tpu.memory_space<vmem>>, vector<1x18x18x4xf32>,
    %cst_3 = arith.constant 0.000000e+00 : f32
    %2 = vector.broadcast %cst_3 : f32 to vector<1x18x18x8xf32>
    %c0_4 = arith.constant 0 : index
    %c0_5 = arith.constant 0 : index
    %c0_6 = arith.constant 0 : index
    %c0_7 = arith.constant 0 : index
    %3 = vector.load %arg14[%c0_4, %c0_5, %c0_6, %c0_7] : memref<1x18x18x8xf32, #tpu.memory_space<vmem>>, vector<1x18x18x8xf32>
    tpu.vector_store %arg14[%c0_4, %c0_5, %c0_6, %c0_7], %2 {strides = array<i32>} : memref<1x18x18x8xf32, #tpu.memory_space<vmem>>, vector<1x18x18x8xf32>,
    %c0_8 = arith.constant 0 : index
    %c0_9 = arith.constant 0 : index
    %4 = vector.load %arg7[%c0_8, %c0_9] : memref<1x32xf32, #tpu.memory_space<vmem>>, vector<1x32xf32>
    %c0_10 = arith.constant 0 : index
    %c0_11 = arith.constant 0 : index
    %c0_12 = arith.constant 0 : index
    %c0_13 = arith.constant 0 : index
    %5 = vector.load %arg1[%c0_10, %c0_11, %c0_12, %c0_13] : memref<1x16x16x4xf32, #tpu.memory_space<vmem>>, vector<1x16x16x4xf32>
    %6 = vector.shape_cast %5 : vector<1x16x16x4xf32> to vector<16x16x4xf32>
    %c0_14 = arith.constant 0 : index
    %c1 = arith.constant 1 : index
    %c1_15 = arith.constant 1 : index
    %c0_16 = arith.constant 0 : index
    %7 = vector.load %arg13[%c0_14, %c1, %c1_15, %c0_16] : memref<1x18x18x4xf32, #tpu.memory_space<vmem>>, vector<1x16x16x4xf32>
    %8 = vector.shape_cast %7 : vector<1x16x16x4xf32> to vector<16x16x4xf32>
    %9 = vector.shape_cast %6 : vector<16x16x4xf32> to vector<1x16x16x4xf32>
    tpu.vector_store %arg13[%c0_14, %c1, %c1_15, %c0_16], %9 {strides = array<i32>} : memref<1x18x18x4xf32, #tpu.memory_space<vmem>>, vector<1x16x16x4xf32>,
    %cst_17 = arith.constant 0.000000e+00 : f32
    %10 = vector.broadcast %cst_17 : f32 to vector<256x8xf32>
    %c0_18 = arith.constant 0 : index
    %c0_19 = arith.constant 0 : index
    %c0_20 = arith.constant 0 : index
    %c0_21 = arith.constant 0 : index
    %11 = vector.load %arg13[%c0_18, %c0_19, %c0_20, %c0_21] : memref<1x18x18x4xf32, #tpu.memory_space<vmem>>, vector<1x16x16x4xf32>
    %12 = vector.shape_cast %11 : vector<1x16x16x4xf32> to vector<16x16x4xf32>
    %13 = vector.shape_cast %12 : vector<16x16x4xf32> to vector<256x4xf32>
    %c0_22 = arith.constant 0 : index
    %c0_23 = arith.constant 0 : index
    %c0_24 = arith.constant 0 : index
    %c0_25 = arith.constant 0 : index
    %14 = vector.load %arg2[%c0_22, %c0_23, %c0_24, %c0_25] : memref<3x3x4x8xf32, #tpu.memory_space<vmem>>, vector<1x1x4x8xf32>
    %15 = vector.shape_cast %14 : vector<1x1x4x8xf32> to vector<4x8xf32>
    %cst_26 = arith.constant dense<0.000000e+00> : vector<256x8xf32>
    %16 = tpu.matmul %13, %15, %cst_26 {dimension_numbers = #tpu.dot_dimension_numbers<[1], [0], [0], [1], [0, 0, 1, 1], [], []>} : vector<256x4xf32>, vector<4x8xf32>, vector<256x8xf32> -> vector<256x8xf32>
    %17 = arith.addf %10, %16 : vector<256x8xf32>
    %c0_27 = arith.constant 0 : index
    %c0_28 = arith.constant 0 : index
    %c1_29 = arith.constant 1 : index
    %c0_30 = arith.constant 0 : index
    %18 = vector.load %arg13[%c0_27, %c0_28, %c1_29, %c0_30] : memref<1x18x18x4xf32, #tpu.memory_space<vmem>>, vector<1x16x16x4xf32>
    %19 = vector.shape_cast %18 : vector<1x16x16x4xf32> to vector<16x16x4xf32>
    %20 = vector.shape_cast %19 : vector<16x16x4xf32> to vector<256x4xf32>
    %c0_31 = arith.constant 0 : index
    %c1_32 = arith.constant 1 : index
    %c0_33 = arith.constant 0 : index
    %c0_34 = arith.constant 0 : index
    %21 = vector.load %arg2[%c0_31, %c1_32, %c0_33, %c0_34] : memref<3x3x4x8xf32, #tpu.memory_space<vmem>>, vector<1x1x4x8xf32>
    %22 = vector.shape_cast %21 : vector<1x1x4x8xf32> to vector<4x8xf32>
    %cst_35 = arith.constant dense<0.000000e+00> : vector<256x8xf32>
    %23 = tpu.matmul %20, %22, %cst_35 {dimension_numbers = #tpu.dot_dimension_numbers<[1], [0], [0], [1], [0, 0, 1, 1], [], []>} : vector<256x4xf32>, vector<4x8xf32>, vector<256x8xf32> -> vector<256x8xf32>
    %24 = arith.addf %17, %23 : vector<256x8xf32>
    %c0_36 = arith.constant 0 : index
    %c0_37 = arith.constant 0 : index
    %c2 = arith.constant 2 : index
    %c0_38 = arith.constant 0 : index
    %25 = vector.load %arg13[%c0_36, %c0_37, %c2, %c0_38] : memref<1x18x18x4xf32, #tpu.memory_space<vmem>>, vector<1x16x16x4xf32>
    %26 = vector.shape_cast %25 : vector<1x16x16x4xf32> to vector<16x16x4xf32>
    %27 = vector.shape_cast %26 : vector<16x16x4xf32> to vector<256x4xf32>
    %c0_39 = arith.constant 0 : index
    %c2_40 = arith.constant 2 : index
    %c0_41 = arith.constant 0 : index
    %c0_42 = arith.constant 0 : index
    %28 = vector.load %arg2[%c0_39, %c2_40, %c0_41, %c0_42] : memref<3x3x4x8xf32, #tpu.memory_space<vmem>>, vector<1x1x4x8xf32>
    %29 = vector.shape_cast %28 : vector<1x1x4x8xf32> to vector<4x8xf32>
    %cst_43 = arith.constant dense<0.000000e+00> : vector<256x8xf32>
    %30 = tpu.matmul %27, %29, %cst_43 {dimension_numbers = #tpu.dot_dimension_numbers<[1], [0], [0], [1], [0, 0, 1, 1], [], []>} : vector<256x4xf32>, vector<4x8xf32>, vector<256x8xf32> -> vector<256x8xf32>
    %31 = arith.addf %24, %30 : vector<256x8xf32>
    %c0_44 = arith.constant 0 : index
    %c1_45 = arith.constant 1 : index
    %c0_46 = arith.constant 0 : index
    %c0_47 = arith.constant 0 : index
    %32 = vector.load %arg13[%c0_44, %c1_45, %c0_46, %c0_47] : memref<1x18x18x4xf32, #tpu.memory_space<vmem>>, vector<1x16x16x4xf32>
    %33 = vector.shape_cast %32 : vector<1x16x16x4xf32> to vector<16x16x4xf32>
    %34 = vector.shape_cast %33 : vector<16x16x4xf32> to vector<256x4xf32>
    %c1_48 = arith.constant 1 : index
    %c0_49 = arith.constant 0 : index
    %c0_50 = arith.constant 0 : index
    %c0_51 = arith.constant 0 : index
    %35 = vector.load %arg2[%c1_48, %c0_49, %c0_50, %c0_51] : memref<3x3x4x8xf32, #tpu.memory_space<vmem>>, vector<1x1x4x8xf32>
    %36 = vector.shape_cast %35 : vector<1x1x4x8xf32> to vector<4x8xf32>
    %cst_52 = arith.constant dense<0.000000e+00> : vector<256x8xf32>
    %37 = tpu.matmul %34, %36, %cst_52 {dimension_numbers = #tpu.dot_dimension_numbers<[1], [0], [0], [1], [0, 0, 1, 1], [], []>} : vector<256x4xf32>, vector<4x8xf32>, vector<256x8xf32> -> vector<256x8xf32>
    %38 = arith.addf %31, %37 : vector<256x8xf32>
    %c0_53 = arith.constant 0 : index
    %c1_54 = arith.constant 1 : index
    %c1_55 = arith.constant 1 : index
    %c0_56 = arith.constant 0 : index
    %39 = vector.load %arg13[%c0_53, %c1_54, %c1_55, %c0_56] : memref<1x18x18x4xf32, #tpu.memory_space<vmem>>, vector<1x16x16x4xf32>
    %40 = vector.shape_cast %39 : vector<1x16x16x4xf32> to vector<16x16x4xf32>
    %41 = vector.shape_cast %40 : vector<16x16x4xf32> to vector<256x4xf32>
    %c1_57 = arith.constant 1 : index
    %c1_58 = arith.constant 1 : index
    %c0_59 = arith.constant 0 : index
    %c0_60 = arith.constant 0 : index
    %42 = vector.load %arg2[%c1_57, %c1_58, %c0_59, %c0_60] : memref<3x3x4x8xf32, #tpu.memory_space<vmem>>, vector<1x1x4x8xf32>
    %43 = vector.shape_cast %42 : vector<1x1x4x8xf32> to vector<4x8xf32>
    %cst_61 = arith.constant dense<0.000000e+00> : vector<256x8xf32>
    %44 = tpu.matmul %41, %43, %cst_61 {dimension_numbers = #tpu.dot_dimension_numbers<[1], [0], [0], [1], [0, 0, 1, 1], [], []>} : vector<256x4xf32>, vector<4x8xf32>, vector<256x8xf32> -> vector<256x8xf32>
    %45 = arith.addf %38, %44 : vector<256x8xf32>
    %c0_62 = arith.constant 0 : index
    %c1_63 = arith.constant 1 : index
    %c2_64 = arith.constant 2 : index
    %c0_65 = arith.constant 0 : index
    %46 = vector.load %arg13[%c0_62, %c1_63, %c2_64, %c0_65] : memref<1x18x18x4xf32, #tpu.memory_space<vmem>>, vector<1x16x16x4xf32>
    %47 = vector.shape_cast %46 : vector<1x16x16x4xf32> to vector<16x16x4xf32>
    %48 = vector.shape_cast %47 : vector<16x16x4xf32> to vector<256x4xf32>
    %c1_66 = arith.constant 1 : index
    %c2_67 = arith.constant 2 : index
    %c0_68 = arith.constant 0 : index
    %c0_69 = arith.constant 0 : index
    %49 = vector.load %arg2[%c1_66, %c2_67, %c0_68, %c0_69] : memref<3x3x4x8xf32, #tpu.memory_space<vmem>>, vector<1x1x4x8xf32>
    %50 = vector.shape_cast %49 : vector<1x1x4x8xf32> to vector<4x8xf32>
    %cst_70 = arith.constant dense<0.000000e+00> : vector<256x8xf32>
    %51 = tpu.matmul %48, %50, %cst_70 {dimension_numbers = #tpu.dot_dimension_numbers<[1], [0], [0], [1], [0, 0, 1, 1], [], []>} : vector<256x4xf32>, vector<4x8xf32>, vector<256x8xf32> -> vector<256x8xf32>
    %52 = arith.addf %45, %51 : vector<256x8xf32>
    %c0_71 = arith.constant 0 : index
    %c2_72 = arith.constant 2 : index
    %c0_73 = arith.constant 0 : index
    %c0_74 = arith.constant 0 : index
    %53 = vector.load %arg13[%c0_71, %c2_72, %c0_73, %c0_74] : memref<1x18x18x4xf32, #tpu.memory_space<vmem>>, vector<1x16x16x4xf32>
    %54 = vector.shape_cast %53 : vector<1x16x16x4xf32> to vector<16x16x4xf32>
    %55 = vector.shape_cast %54 : vector<16x16x4xf32> to vector<256x4xf32>
    %c2_75 = arith.constant 2 : index
    %c0_76 = arith.constant 0 : index
    %c0_77 = arith.constant 0 : index
    %c0_78 = arith.constant 0 : index
    %56 = vector.load %arg2[%c2_75, %c0_76, %c0_77, %c0_78] : memref<3x3x4x8xf32, #tpu.memory_space<vmem>>, vector<1x1x4x8xf32>
    %57 = vector.shape_cast %56 : vector<1x1x4x8xf32> to vector<4x8xf32>
    %cst_79 = arith.constant dense<0.000000e+00> : vector<256x8xf32>
    %58 = tpu.matmul %55, %57, %cst_79 {dimension_numbers = #tpu.dot_dimension_numbers<[1], [0], [0], [1], [0, 0, 1, 1], [], []>} : vector<256x4xf32>, vector<4x8xf32>, vector<256x8xf32> -> vector<256x8xf32>
    %59 = arith.addf %52, %58 : vector<256x8xf32>
    %c0_80 = arith.constant 0 : index
    %c2_81 = arith.constant 2 : index
    %c1_82 = arith.constant 1 : index
    %c0_83 = arith.constant 0 : index
    %60 = vector.load %arg13[%c0_80, %c2_81, %c1_82, %c0_83] : memref<1x18x18x4xf32, #tpu.memory_space<vmem>>, vector<1x16x16x4xf32>
    %61 = vector.shape_cast %60 : vector<1x16x16x4xf32> to vector<16x16x4xf32>
    %62 = vector.shape_cast %61 : vector<16x16x4xf32> to vector<256x4xf32>
    %c2_84 = arith.constant 2 : index
    %c1_85 = arith.constant 1 : index
    %c0_86 = arith.constant 0 : index
    %c0_87 = arith.constant 0 : index
    %63 = vector.load %arg2[%c2_84, %c1_85, %c0_86, %c0_87] : memref<3x3x4x8xf32, #tpu.memory_space<vmem>>, vector<1x1x4x8xf32>
    %64 = vector.shape_cast %63 : vector<1x1x4x8xf32> to vector<4x8xf32>
    %cst_88 = arith.constant dense<0.000000e+00> : vector<256x8xf32>
    %65 = tpu.matmul %62, %64, %cst_88 {dimension_numbers = #tpu.dot_dimension_numbers<[1], [0], [0], [1], [0, 0, 1, 1], [], []>} : vector<256x4xf32>, vector<4x8xf32>, vector<256x8xf32> -> vector<256x8xf32>
    %66 = arith.addf %59, %65 : vector<256x8xf32>
    %c0_89 = arith.constant 0 : index
    %c2_90 = arith.constant 2 : index
    %c2_91 = arith.constant 2 : index
    %c0_92 = arith.constant 0 : index
    %67 = vector.load %arg13[%c0_89, %c2_90, %c2_91, %c0_92] : memref<1x18x18x4xf32, #tpu.memory_space<vmem>>, vector<1x16x16x4xf32>
    %68 = vector.shape_cast %67 : vector<1x16x16x4xf32> to vector<16x16x4xf32>
    %69 = vector.shape_cast %68 : vector<16x16x4xf32> to vector<256x4xf32>
    %c2_93 = arith.constant 2 : index
    %c2_94 = arith.constant 2 : index
    %c0_95 = arith.constant 0 : index
    %c0_96 = arith.constant 0 : index
    %70 = vector.load %arg2[%c2_93, %c2_94, %c0_95, %c0_96] : memref<3x3x4x8xf32, #tpu.memory_space<vmem>>, vector<1x1x4x8xf32>
    %71 = vector.shape_cast %70 : vector<1x1x4x8xf32> to vector<4x8xf32>
    %cst_97 = arith.constant dense<0.000000e+00> : vector<256x8xf32>
    %72 = tpu.matmul %69, %71, %cst_97 {dimension_numbers = #tpu.dot_dimension_numbers<[1], [0], [0], [1], [0, 0, 1, 1], [], []>} : vector<256x4xf32>, vector<4x8xf32>, vector<256x8xf32> -> vector<256x8xf32>
    %73 = arith.addf %66, %72 : vector<256x8xf32>
    %c0_98 = arith.constant 0 : index
    %c0_99 = arith.constant 0 : index
    %74 = vector.load %arg3[%c0_98, %c0_99] : memref<1x8xf32, #tpu.memory_space<vmem>>, vector<1x8xf32>
    %75 = vector.broadcast %74 : vector<1x8xf32> to vector<256x8xf32>
    %76 = arith.addf %73, %75 : vector<256x8xf32>
    %cst_100 = arith.constant 0.000000e+00 : f32
    %77 = vector.broadcast %cst_100 : f32 to vector<256x8xf32>
    %78 = arith.cmpf oge, %76, %77 : vector<256x8xf32>
    %cst_101 = arith.constant 0.00999999977 : f32
    %79 = vector.broadcast %cst_101 : f32 to vector<256x8xf32>
    %80 = arith.mulf %79, %76 : vector<256x8xf32>
    %81 = arith.select %78, %76, %80 : vector<256x8xi1>, vector<256x8xf32>
    %82 = vector.shape_cast %81 : vector<256x8xf32> to vector<16x16x8xf32>
    %c0_102 = arith.constant 0 : index
    %c1_103 = arith.constant 1 : index
    %c1_104 = arith.constant 1 : index
    %c0_105 = arith.constant 0 : index
    %83 = vector.load %arg14[%c0_102, %c1_103, %c1_104, %c0_105] : memref<1x18x18x8xf32, #tpu.memory_space<vmem>>, vector<1x16x16x8xf32>
    %84 = vector.shape_cast %83 : vector<1x16x16x8xf32> to vector<16x16x8xf32>
    %85 = vector.shape_cast %82 : vector<16x16x8xf32> to vector<1x16x16x8xf32>
    tpu.vector_store %arg14[%c0_102, %c1_103, %c1_104, %c0_105], %85 {strides = array<i32>} : memref<1x18x18x8xf32, #tpu.memory_space<vmem>>, vector<1x16x16x8xf32>,
    %cst_106 = arith.constant 0.000000e+00 : f32
    %86 = vector.broadcast %cst_106 : f32 to vector<256x8xf32>
    %c0_107 = arith.constant 0 : index
    %c0_108 = arith.constant 0 : index
    %c0_109 = arith.constant 0 : index
    %c0_110 = arith.constant 0 : index
    %87 = vector.load %arg14[%c0_107, %c0_108, %c0_109, %c0_110] : memref<1x18x18x8xf32, #tpu.memory_space<vmem>>, vector<1x16x16x8xf32>
    %88 = vector.shape_cast %87 : vector<1x16x16x8xf32> to vector<16x16x8xf32>
    %89 = vector.shape_cast %88 : vector<16x16x8xf32> to vector<256x8xf32>
    %c0_111 = arith.constant 0 : index
    %c0_112 = arith.constant 0 : index
    %c0_113 = arith.constant 0 : index
    %c0_114 = arith.constant 0 : index
    %90 = vector.load %arg4[%c0_111, %c0_112, %c0_113, %c0_114] : memref<3x3x8x8xf32, #tpu.memory_space<vmem>>, vector<1x1x8x8xf32>
    %91 = vector.shape_cast %90 : vector<1x1x8x8xf32> to vector<8x8xf32>
    %cst_115 = arith.constant dense<0.000000e+00> : vector<256x8xf32>
    %92 = tpu.matmul %89, %91, %cst_115 {dimension_numbers = #tpu.dot_dimension_numbers<[1], [0], [0], [1], [0, 0, 1, 1], [], []>} : vector<256x8xf32>, vector<8x8xf32>, vector<256x8xf32> -> vector<256x8xf32>
    %93 = arith.addf %86, %92 : vector<256x8xf32>
    %c0_116 = arith.constant 0 : index
    %c0_117 = arith.constant 0 : index
    %c1_118 = arith.constant 1 : index
    %c0_119 = arith.constant 0 : index
    %94 = vector.load %arg14[%c0_116, %c0_117, %c1_118, %c0_119] : memref<1x18x18x8xf32, #tpu.memory_space<vmem>>, vector<1x16x16x8xf32>
    %95 = vector.shape_cast %94 : vector<1x16x16x8xf32> to vector<16x16x8xf32>
    %96 = vector.shape_cast %95 : vector<16x16x8xf32> to vector<256x8xf32>
    %c0_120 = arith.constant 0 : index
    %c1_121 = arith.constant 1 : index
    %c0_122 = arith.constant 0 : index
    %c0_123 = arith.constant 0 : index
    %97 = vector.load %arg4[%c0_120, %c1_121, %c0_122, %c0_123] : memref<3x3x8x8xf32, #tpu.memory_space<vmem>>, vector<1x1x8x8xf32>
    %98 = vector.shape_cast %97 : vector<1x1x8x8xf32> to vector<8x8xf32>
    %cst_124 = arith.constant dense<0.000000e+00> : vector<256x8xf32>
    %99 = tpu.matmul %96, %98, %cst_124 {dimension_numbers = #tpu.dot_dimension_numbers<[1], [0], [0], [1], [0, 0, 1, 1], [], []>} : vector<256x8xf32>, vector<8x8xf32>, vector<256x8xf32> -> vector<256x8xf32>
    %100 = arith.addf %93, %99 : vector<256x8xf32>
    %c0_125 = arith.constant 0 : index
    %c0_126 = arith.constant 0 : index
    %c2_127 = arith.constant 2 : index
    %c0_128 = arith.constant 0 : index
    %101 = vector.load %arg14[%c0_125, %c0_126, %c2_127, %c0_128] : memref<1x18x18x8xf32, #tpu.memory_space<vmem>>, vector<1x16x16x8xf32>
    %102 = vector.shape_cast %101 : vector<1x16x16x8xf32> to vector<16x16x8xf32>
    %103 = vector.shape_cast %102 : vector<16x16x8xf32> to vector<256x8xf32>
    %c0_129 = arith.constant 0 : index
    %c2_130 = arith.constant 2 : index
    %c0_131 = arith.constant 0 : index
    %c0_132 = arith.constant 0 : index
    %104 = vector.load %arg4[%c0_129, %c2_130, %c0_131, %c0_132] : memref<3x3x8x8xf32, #tpu.memory_space<vmem>>, vector<1x1x8x8xf32>
    %105 = vector.shape_cast %104 : vector<1x1x8x8xf32> to vector<8x8xf32>
    %cst_133 = arith.constant dense<0.000000e+00> : vector<256x8xf32>
    %106 = tpu.matmul %103, %105, %cst_133 {dimension_numbers = #tpu.dot_dimension_numbers<[1], [0], [0], [1], [0, 0, 1, 1], [], []>} : vector<256x8xf32>, vector<8x8xf32>, vector<256x8xf32> -> vector<256x8xf32>
    %107 = arith.addf %100, %106 : vector<256x8xf32>
    %c0_134 = arith.constant 0 : index
    %c1_135 = arith.constant 1 : index
    %c0_136 = arith.constant 0 : index
    %c0_137 = arith.constant 0 : index
    %108 = vector.load %arg14[%c0_134, %c1_135, %c0_136, %c0_137] : memref<1x18x18x8xf32, #tpu.memory_space<vmem>>, vector<1x16x16x8xf32>
    %109 = vector.shape_cast %108 : vector<1x16x16x8xf32> to vector<16x16x8xf32>
    %110 = vector.shape_cast %109 : vector<16x16x8xf32> to vector<256x8xf32>
    %c1_138 = arith.constant 1 : index
    %c0_139 = arith.constant 0 : index
    %c0_140 = arith.constant 0 : index
    %c0_141 = arith.constant 0 : index
    %111 = vector.load %arg4[%c1_138, %c0_139, %c0_140, %c0_141] : memref<3x3x8x8xf32, #tpu.memory_space<vmem>>, vector<1x1x8x8xf32>
    %112 = vector.shape_cast %111 : vector<1x1x8x8xf32> to vector<8x8xf32>
    %cst_142 = arith.constant dense<0.000000e+00> : vector<256x8xf32>
    %113 = tpu.matmul %110, %112, %cst_142 {dimension_numbers = #tpu.dot_dimension_numbers<[1], [0], [0], [1], [0, 0, 1, 1], [], []>} : vector<256x8xf32>, vector<8x8xf32>, vector<256x8xf32> -> vector<256x8xf32>
    %114 = arith.addf %107, %113 : vector<256x8xf32>
    %c0_143 = arith.constant 0 : index
    %c1_144 = arith.constant 1 : index
    %c1_145 = arith.constant 1 : index
    %c0_146 = arith.constant 0 : index
    %115 = vector.load %arg14[%c0_143, %c1_144, %c1_145, %c0_146] : memref<1x18x18x8xf32, #tpu.memory_space<vmem>>, vector<1x16x16x8xf32>
    %116 = vector.shape_cast %115 : vector<1x16x16x8xf32> to vector<16x16x8xf32>
    %117 = vector.shape_cast %116 : vector<16x16x8xf32> to vector<256x8xf32>
    %c1_147 = arith.constant 1 : index
    %c1_148 = arith.constant 1 : index
    %c0_149 = arith.constant 0 : index
    %c0_150 = arith.constant 0 : index
    %118 = vector.load %arg4[%c1_147, %c1_148, %c0_149, %c0_150] : memref<3x3x8x8xf32, #tpu.memory_space<vmem>>, vector<1x1x8x8xf32>
    %119 = vector.shape_cast %118 : vector<1x1x8x8xf32> to vector<8x8xf32>
    %cst_151 = arith.constant dense<0.000000e+00> : vector<256x8xf32>
    %120 = tpu.matmul %117, %119, %cst_151 {dimension_numbers = #tpu.dot_dimension_numbers<[1], [0], [0], [1], [0, 0, 1, 1], [], []>} : vector<256x8xf32>, vector<8x8xf32>, vector<256x8xf32> -> vector<256x8xf32>
    %121 = arith.addf %114, %120 : vector<256x8xf32>
    %c0_152 = arith.constant 0 : index
    %c1_153 = arith.constant 1 : index
    %c2_154 = arith.constant 2 : index
    %c0_155 = arith.constant 0 : index
    %122 = vector.load %arg14[%c0_152, %c1_153, %c2_154, %c0_155] : memref<1x18x18x8xf32, #tpu.memory_space<vmem>>, vector<1x16x16x8xf32>
    %123 = vector.shape_cast %122 : vector<1x16x16x8xf32> to vector<16x16x8xf32>
    %124 = vector.shape_cast %123 : vector<16x16x8xf32> to vector<256x8xf32>
    %c1_156 = arith.constant 1 : index
    %c2_157 = arith.constant 2 : index
    %c0_158 = arith.constant 0 : index
    %c0_159 = arith.constant 0 : index
    %125 = vector.load %arg4[%c1_156, %c2_157, %c0_158, %c0_159] : memref<3x3x8x8xf32, #tpu.memory_space<vmem>>, vector<1x1x8x8xf32>
    %126 = vector.shape_cast %125 : vector<1x1x8x8xf32> to vector<8x8xf32>
    %cst_160 = arith.constant dense<0.000000e+00> : vector<256x8xf32>
    %127 = tpu.matmul %124, %126, %cst_160 {dimension_numbers = #tpu.dot_dimension_numbers<[1], [0], [0], [1], [0, 0, 1, 1], [], []>} : vector<256x8xf32>, vector<8x8xf32>, vector<256x8xf32> -> vector<256x8xf32>
    %128 = arith.addf %121, %127 : vector<256x8xf32>
    %c0_161 = arith.constant 0 : index
    %c2_162 = arith.constant 2 : index
    %c0_163 = arith.constant 0 : index
    %c0_164 = arith.constant 0 : index
    %129 = vector.load %arg14[%c0_161, %c2_162, %c0_163, %c0_164] : memref<1x18x18x8xf32, #tpu.memory_space<vmem>>, vector<1x16x16x8xf32>
    %130 = vector.shape_cast %129 : vector<1x16x16x8xf32> to vector<16x16x8xf32>
    %131 = vector.shape_cast %130 : vector<16x16x8xf32> to vector<256x8xf32>
    %c2_165 = arith.constant 2 : index
    %c0_166 = arith.constant 0 : index
    %c0_167 = arith.constant 0 : index
    %c0_168 = arith.constant 0 : index
    %132 = vector.load %arg4[%c2_165, %c0_166, %c0_167, %c0_168] : memref<3x3x8x8xf32, #tpu.memory_space<vmem>>, vector<1x1x8x8xf32>
    %133 = vector.shape_cast %132 : vector<1x1x8x8xf32> to vector<8x8xf32>
    %cst_169 = arith.constant dense<0.000000e+00> : vector<256x8xf32>
    %134 = tpu.matmul %131, %133, %cst_169 {dimension_numbers = #tpu.dot_dimension_numbers<[1], [0], [0], [1], [0, 0, 1, 1], [], []>} : vector<256x8xf32>, vector<8x8xf32>, vector<256x8xf32> -> vector<256x8xf32>
    %135 = arith.addf %128, %134 : vector<256x8xf32>
    %c0_170 = arith.constant 0 : index
    %c2_171 = arith.constant 2 : index
    %c1_172 = arith.constant 1 : index
    %c0_173 = arith.constant 0 : index
    %136 = vector.load %arg14[%c0_170, %c2_171, %c1_172, %c0_173] : memref<1x18x18x8xf32, #tpu.memory_space<vmem>>, vector<1x16x16x8xf32>
    %137 = vector.shape_cast %136 : vector<1x16x16x8xf32> to vector<16x16x8xf32>
    %138 = vector.shape_cast %137 : vector<16x16x8xf32> to vector<256x8xf32>
    %c2_174 = arith.constant 2 : index
    %c1_175 = arith.constant 1 : index
    %c0_176 = arith.constant 0 : index
    %c0_177 = arith.constant 0 : index
    %139 = vector.load %arg4[%c2_174, %c1_175, %c0_176, %c0_177] : memref<3x3x8x8xf32, #tpu.memory_space<vmem>>, vector<1x1x8x8xf32>
    %140 = vector.shape_cast %139 : vector<1x1x8x8xf32> to vector<8x8xf32>
    %cst_178 = arith.constant dense<0.000000e+00> : vector<256x8xf32>
    %141 = tpu.matmul %138, %140, %cst_178 {dimension_numbers = #tpu.dot_dimension_numbers<[1], [0], [0], [1], [0, 0, 1, 1], [], []>} : vector<256x8xf32>, vector<8x8xf32>, vector<256x8xf32> -> vector<256x8xf32>
    %142 = arith.addf %135, %141 : vector<256x8xf32>
    %c0_179 = arith.constant 0 : index
    %c2_180 = arith.constant 2 : index
    %c2_181 = arith.constant 2 : index
    %c0_182 = arith.constant 0 : index
    %143 = vector.load %arg14[%c0_179, %c2_180, %c2_181, %c0_182] : memref<1x18x18x8xf32, #tpu.memory_space<vmem>>, vector<1x16x16x8xf32>
    %144 = vector.shape_cast %143 : vector<1x16x16x8xf32> to vector<16x16x8xf32>
    %145 = vector.shape_cast %144 : vector<16x16x8xf32> to vector<256x8xf32>
    %c2_183 = arith.constant 2 : index
    %c2_184 = arith.constant 2 : index
    %c0_185 = arith.constant 0 : index
    %c0_186 = arith.constant 0 : index
    %146 = vector.load %arg4[%c2_183, %c2_184, %c0_185, %c0_186] : memref<3x3x8x8xf32, #tpu.memory_space<vmem>>, vector<1x1x8x8xf32>
    %147 = vector.shape_cast %146 : vector<1x1x8x8xf32> to vector<8x8xf32>
    %cst_187 = arith.constant dense<0.000000e+00> : vector<256x8xf32>
    %148 = tpu.matmul %145, %147, %cst_187 {dimension_numbers = #tpu.dot_dimension_numbers<[1], [0], [0], [1], [0, 0, 1, 1], [], []>} : vector<256x8xf32>, vector<8x8xf32>, vector<256x8xf32> -> vector<256x8xf32>
    %149 = arith.addf %142, %148 : vector<256x8xf32>
    %c0_188 = arith.constant 0 : index
    %c0_189 = arith.constant 0 : index
    %150 = vector.load %arg5[%c0_188, %c0_189] : memref<1x8xf32, #tpu.memory_space<vmem>>, vector<1x8xf32>
    %151 = vector.broadcast %150 : vector<1x8xf32> to vector<256x8xf32>
    %152 = arith.addf %149, %151 : vector<256x8xf32>
    %153 = vector.shape_cast %152 : vector<256x8xf32> to vector<16x16x8xf32>
    %154 = vector.extract_strided_slice %153 {offsets = [0, 0, 0], sizes = [8, 8, 8], strides = [1, 1, 1]} : vector<16x16x8xf32> to vector<8x8x8xf32>
    %cst_190 = arith.constant dense<0xFF800000> : vector<8xf32>
    %155 = vector.multi_reduction <maximumf>, %154, %cst_190 [0, 1] : vector<8x8x8xf32> to vector<8xf32>
    %156 = vector.shape_cast %155 : vector<8xf32> to vector<1x1x8xf32>
    %157 = vector.shape_cast %156 : vector<1x1x8xf32> to vector<1x8xf32>
    %c0_191 = arith.constant 0 : index
    %c0_192 = arith.constant 0 : index
    %158 = vector.load %arg6[%c0_191, %c0_192] : memref<32x32xf32, #tpu.memory_space<vmem>>, vector<8x32xf32>
    %cst_193 = arith.constant dense<0.000000e+00> : vector<1x32xf32>
    %159 = tpu.matmul %157, %158, %cst_193 {dimension_numbers = #tpu.dot_dimension_numbers<[1], [0], [0], [1], [0, 0, 1, 1], [], []>} : vector<1x8xf32>, vector<8x32xf32>, vector<1x32xf32> -> vector<1x32xf32>
    %160 = arith.addf %4, %159 : vector<1x32xf32>
    %161 = vector.extract_strided_slice %153 {offsets = [0, 8, 0], sizes = [8, 8, 8], strides = [1, 1, 1]} : vector<16x16x8xf32> to vector<8x8x8xf32>
    %cst_194 = arith.constant dense<0xFF800000> : vector<8xf32>
    %162 = vector.multi_reduction <maximumf>, %161, %cst_194 [0, 1] : vector<8x8x8xf32> to vector<8xf32>
    %163 = vector.shape_cast %162 : vector<8xf32> to vector<1x1x8xf32>
    %164 = vector.shape_cast %163 : vector<1x1x8xf32> to vector<1x8xf32>
    %c8 = arith.constant 8 : index
    %c0_195 = arith.constant 0 : index
    %165 = vector.load %arg6[%c8, %c0_195] : memref<32x32xf32, #tpu.memory_space<vmem>>, vector<8x32xf32>
    %cst_196 = arith.constant dense<0.000000e+00> : vector<1x32xf32>
    %166 = tpu.matmul %164, %165, %cst_196 {dimension_numbers = #tpu.dot_dimension_numbers<[1], [0], [0], [1], [0, 0, 1, 1], [], []>} : vector<1x8xf32>, vector<8x32xf32>, vector<1x32xf32> -> vector<1x32xf32>
    %167 = arith.addf %160, %166 : vector<1x32xf32>
    %168 = vector.extract_strided_slice %153 {offsets = [8, 0, 0], sizes = [8, 8, 8], strides = [1, 1, 1]} : vector<16x16x8xf32> to vector<8x8x8xf32>
    %cst_197 = arith.constant dense<0xFF800000> : vector<8xf32>
    %169 = vector.multi_reduction <maximumf>, %168, %cst_197 [0, 1] : vector<8x8x8xf32> to vector<8xf32>
    %170 = vector.shape_cast %169 : vector<8xf32> to vector<1x1x8xf32>
    %171 = vector.shape_cast %170 : vector<1x1x8xf32> to vector<1x8xf32>
    %c16 = arith.constant 16 : index
    %c0_198 = arith.constant 0 : index
    %172 = vector.load %arg6[%c16, %c0_198] : memref<32x32xf32, #tpu.memory_space<vmem>>, vector<8x32xf32>
    %cst_199 = arith.constant dense<0.000000e+00> : vector<1x32xf32>
    %173 = tpu.matmul %171, %172, %cst_199 {dimension_numbers = #tpu.dot_dimension_numbers<[1], [0], [0], [1], [0, 0, 1, 1], [], []>} : vector<1x8xf32>, vector<8x32xf32>, vector<1x32xf32> -> vector<1x32xf32>
    %174 = arith.addf %167, %173 : vector<1x32xf32>
    %175 = vector.extract_strided_slice %153 {offsets = [8, 8, 0], sizes = [8, 8, 8], strides = [1, 1, 1]} : vector<16x16x8xf32> to vector<8x8x8xf32>
    %cst_200 = arith.constant dense<0xFF800000> : vector<8xf32>
    %176 = vector.multi_reduction <maximumf>, %175, %cst_200 [0, 1] : vector<8x8x8xf32> to vector<8xf32>
    %177 = vector.shape_cast %176 : vector<8xf32> to vector<1x1x8xf32>
    %178 = vector.shape_cast %177 : vector<1x1x8xf32> to vector<1x8xf32>
    %c24 = arith.constant 24 : index
    %c0_201 = arith.constant 0 : index
    %179 = vector.load %arg6[%c24, %c0_201] : memref<32x32xf32, #tpu.memory_space<vmem>>, vector<8x32xf32>
    %cst_202 = arith.constant dense<0.000000e+00> : vector<1x32xf32>
    %180 = tpu.matmul %178, %179, %cst_202 {dimension_numbers = #tpu.dot_dimension_numbers<[1], [0], [0], [1], [0, 0, 1, 1], [], []>} : vector<1x8xf32>, vector<8x32xf32>, vector<1x32xf32> -> vector<1x32xf32>
    %181 = arith.addf %174, %180 : vector<1x32xf32>
    %c0_203 = arith.constant 0 : index
    %c0_204 = arith.constant 0 : index
    %182 = vector.load %arg8[%c0_203, %c0_204] : memref<32x32xf32, #tpu.memory_space<vmem>>, vector<32x32xf32>
    %cst_205 = arith.constant dense<0.000000e+00> : vector<1x32xf32>
    %183 = tpu.matmul %181, %182, %cst_205 {dimension_numbers = #tpu.dot_dimension_numbers<[1], [0], [0], [1], [0, 0, 1, 1], [], []>} : vector<1x32xf32>, vector<32x32xf32>, vector<1x32xf32> -> vector<1x32xf32>
    %c0_206 = arith.constant 0 : index
    %c0_207 = arith.constant 0 : index
    %184 = vector.load %arg9[%c0_206, %c0_207] : memref<1x32xf32, #tpu.memory_space<vmem>>, vector<1x32xf32>
    %185 = arith.addf %183, %184 : vector<1x32xf32>
    %cst_208 = arith.constant 0.000000e+00 : f32
    %186 = vector.broadcast %cst_208 : f32 to vector<1x32xf32>
    %187 = arith.maximumf %185, %186 : vector<1x32xf32>
    %c0_209 = arith.constant 0 : index
    %c0_210 = arith.constant 0 : index
    %188 = vector.load %arg10[%c0_209, %c0_210] : memref<32x5xf32, #tpu.memory_space<vmem>>, vector<32x5xf32>
    %cst_211 = arith.constant dense<0.000000e+00> : vector<1x5xf32>
    %189 = tpu.matmul %187, %188, %cst_211 {dimension_numbers = #tpu.dot_dimension_numbers<[1], [0], [0], [1], [0, 0, 1, 1], [], []>} : vector<1x32xf32>, vector<32x5xf32>, vector<1x5xf32> -> vector<1x5xf32>
    %c0_212 = arith.constant 0 : index
    %c0_213 = arith.constant 0 : index
    %190 = vector.load %arg11[%c0_212, %c0_213] : memref<1x5xf32, #tpu.memory_space<vmem>>, vector<1x5xf32>
    %191 = arith.addf %189, %190 : vector<1x5xf32>
    %192 = vector.shape_cast %191 : vector<1x5xf32> to vector<1x1x5xf32>
    %c0_214 = arith.constant 0 : index
    %c0_215 = arith.constant 0 : index
    %c0_216 = arith.constant 0 : index
    %193 = vector.load %arg12[%c0_214, %c0_215, %c0_216] : memref<1x1x5xf32, #tpu.memory_space<vmem>>, vector<1x1x5xf32>
    tpu.vector_store %arg12[%c0_214, %c0_215, %c0_216], %192 {strides = array<i32>} : memref<1x1x5xf32, #tpu.memory_space<vmem>>, vector<1x1x5xf32>,
    return
  }
  func.func @transform_0(%arg0: i32) -> (i32, i32, i32, i32) {
    %c0_i32 = arith.constant 0 : i32
    %c0_i32_0 = arith.constant 0 : i32
    %c0_i32_1 = arith.constant 0 : i32
    %c0_i32_2 = arith.constant 0 : i32
    return %arg0, %c0_i32, %c0_i32_0, %c0_i32_1 : i32, i32, i32, i32
  }
  func.func @transform_1(%arg0: i32) -> (i32, i32, i32, i32) {
    %c0_i32 = arith.constant 0 : i32
    %c0_i32_0 = arith.constant 0 : i32
    %c0_i32_1 = arith.constant 0 : i32
    %c0_i32_2 = arith.constant 0 : i32
    %c0_i32_3 = arith.constant 0 : i32
    return %c0_i32, %c0_i32_0, %c0_i32_1, %c0_i32_2 : i32, i32, i32, i32
  }
  func.func @transform_2(%arg0: i32) -> (i32, i32) {
    %c0_i32 = arith.constant 0 : i32
    %c0_i32_0 = arith.constant 0 : i32
    %c0_i32_1 = arith.constant 0 : i32
    return %c0_i32, %c0_i32_0 : i32, i32
  }
  func.func @transform_3(%arg0: i32) -> (i32, i32, i32, i32) {
    %c0_i32 = arith.constant 0 : i32
    %c0_i32_0 = arith.constant 0 : i32
    %c0_i32_1 = arith.constant 0 : i32
    %c0_i32_2 = arith.constant 0 : i32
    %c0_i32_3 = arith.constant 0 : i32
    return %c0_i32, %c0_i32_0, %c0_i32_1, %c0_i32_2 : i32, i32, i32, i32
  }
  func.func @transform_4(%arg0: i32) -> (i32, i32) {
    %c0_i32 = arith.constant 0 : i32
    %c0_i32_0 = arith.constant 0 : i32
    %c0_i32_1 = arith.constant 0 : i32
    return %c0_i32, %c0_i32_0 : i32, i32
  }
  func.func @transform_5(%arg0: i32) -> (i32, i32) {
    %c0_i32 = arith.constant 0 : i32
    %c0_i32_0 = arith.constant 0 : i32
    %c0_i32_1 = arith.constant 0 : i32
    return %c0_i32, %c0_i32_0 : i32, i32
  }
  func.func @transform_6(%arg0: i32) -> (i32, i32) {
    %c0_i32 = arith.constant 0 : i32
    %c0_i32_0 = arith.constant 0 : i32
    %c0_i32_1 = arith.constant 0 : i32
    return %c0_i32, %c0_i32_0 : i32, i32
  }
  func.func @transform_7(%arg0: i32) -> (i32, i32) {
    %c0_i32 = arith.constant 0 : i32
    %c0_i32_0 = arith.constant 0 : i32
    %c0_i32_1 = arith.constant 0 : i32
    return %c0_i32, %c0_i32_0 : i32, i32
  }
  func.func @transform_8(%arg0: i32) -> (i32, i32) {
    %c0_i32 = arith.constant 0 : i32
    %c0_i32_0 = arith.constant 0 : i32
    %c0_i32_1 = arith.constant 0 : i32
    return %c0_i32, %c0_i32_0 : i32, i32
  }
  func.func @transform_9(%arg0: i32) -> (i32, i32) {
    %c0_i32 = arith.constant 0 : i32
    %c0_i32_0 = arith.constant 0 : i32
    %c0_i32_1 = arith.constant 0 : i32
    return %c0_i32, %c0_i32_0 : i32, i32
  }
  func.func @transform_10(%arg0: i32) -> (i32, i32) {
    %c0_i32 = arith.constant 0 : i32
    %c0_i32_0 = arith.constant 0 : i32
    %c0_i32_1 = arith.constant 0 : i32
    return %c0_i32, %c0_i32_0 : i32, i32
  }
  func.func @transform_11(%arg0: i32) -> (i32, i32, i32) {
    %c0_i32 = arith.constant 0 : i32
    %c0_i32_0 = arith.constant 0 : i32
    %c0_i32_1 = arith.constant 0 : i32
    return %arg0, %c0_i32, %c0_i32_0 : i32, i32, i32
  }
}

</mosaic_0001>

<bundles_post_ra>
// kernel: cnn_forward.1
= control target key start
LH: loop header
LB: loop body
LE: loop exit
PB: predicated region body
PF: predicated region fallthrough
CT: control target
= control target key end

     0   :  { %s13306_s0 = inlined_call_operand.vmem [shape: f32[2,16,16,4], index: 0, kind: input, shape index: {}]   ;;  %s13307_s1 = inlined_call_operand.vmem [shape: f32[3,3,4,8], index: 1, kind: input, shape index: {}]   ;;  %s13308_s2 = inlined_call_operand.vmem [shape: f32[1,8], index: 2, kind: input, shape index: {}]   ;;  %s13309_s3 = inlined_call_operand.vmem [shape: f32[3,3,8,8], index: 3, kind: input, shape index: {}]   ;;  %s13310_s4 = inlined_call_operand.vmem [shape: f32[1,8], index: 4, kind: input, shape index: {}]   ;;  %s13311_s5 = inlined_call_operand.vmem [shape: f32[32,32], index: 5, kind: input, shape index: {}]   ;;  %s13312_s6 = inlined_call_operand.vmem [shape: f32[1,32], index: 6, kind: input, shape index: {}]   ;;  %s13313_s7 = inlined_call_operand.vmem [shape: f32[32,32], index: 7, kind: input, shape index: {}]   ;;  %s13314_s8 = inlined_call_operand.vmem [shape: f32[1,32], index: 8, kind: input, shape index: {}]   ;;  %s13315_s9 = inlined_call_operand.vmem [shape: f32[32,5], index: 9, kind: input, shape index: {}]   ;;  %s13316_s10 = inlined_call_operand.vmem [shape: f32[1,5], index: 10, kind: input, shape index: {}]   ;;  %s13317_s11 = inlined_call_operand.hbm [shape: f32[2,1,5], index: 11, kind: output, shape index: {}]  }
   0x1   :  { %13434 = sst [smem:[#allocation39_spill]] %s13306_s0 }
   0x2   :  { %16 = vsyncpa [#allocation5], 0 }
   0x3   :  { %18 = vsyncpa [#allocation5 + $0x1], 0  ;;  %s11121_s17 = smov 0   ;;  %s11123_s18 = smov 0  }
   0x4   :  { %s11125_s19 = smov 0   ;;  %s11127_s20 = smov 0  }
   0x5 LB: > { %s11142_s21 = sadd.s32 4294967295, %s11055_s20   ;;  %s8247_s22 = sadd.s32 4294967294, %s11055_s20   ;;  %s11055_s20 = sphi %s11127_s20, %s13598_s20   ;;  %s11051_s19 = sphi %s11125_s19, %s13597_s19   ;;  %s11047_s18 = sphi %s11123_s18, %s13596_s18   ;;  %s11043_s17 = sphi %s11121_s17, %s13595_s17  }
   0x6   : > { %s11146_s23 = sadd.s32 1, %s11055_s20   ;;  %s267_s24 = sadd.s32 1, %s11051_s19 }
   0x7   : > { %s264_s25 = ssub.s32 %s11055_s20, %s11146_s23  ;;  %p277_p0 = scmp.ne.s32.totalorder %s11051_s19, %s11047_s18 }
   0x8   : > { %p265_p1 = scmp.eq.s32.totalorder %s264_s25, 0  ;;  %p278_p2 = scmp.eq.s32.totalorder %s11142_s21, 1 }
   0x9   : > { %p283_p3 = scmp.ne.s32.totalorder %s11047_s18, %s11043_s17  ;;  %p284_p4 = scmp.eq.s32.totalorder %s8247_s22, 1 }
   0xa   : > { %s11157_s26 = scalar_select %p265_p1, %s11051_s19, %s267_s24  }
   0xb   : > { %p11159_p5 = por %p278_p2, %p277_p0  ;;  %p11163_p6 = por %p284_p4, %p283_p3 }
   0xc   : > { %p8250_p7 = scmp.ge.s32.totalorder %s11055_s20, 1  ;;  %p340_p8 = scmp.lt.s32.totalorder %s11055_s20, 3 }
   0xe   : > { %p341_p9 = pnand %p8250_p7, %p340_p8 }
  0x10   : > { %344 = sbr.rel (%p341_p9) target bundleno = 2263 (0x8d7), region = 64 }
  0x17   : > { %v8253_v0 = vld [vmem:[%s13307_s1 + $0x4] sm:$0xf]  ;;  %vm725_vm0 = vcmask 1043456   ;;  %vm384_vm1 = vcmask 31744   ;;  %vm387_vm2 = vcmask 25600   ;;  %v13318_v1 = vmov 0.0  }
  0x18   : > { %9478 = vmatprep.subr.msk.mxu0 %vm725_vm0, %v8253_v0  ;;  %385 = vst.msk [vmem:[#allocation2] sm:$0xff] %vm384_vm1, %v13318_v1  ;;  %386 = vst.msk [vmem:[#allocation2 + $0x8] sm:$0xff] %vm384_vm1, %v13318_v1  ;;  %v594_v2 = vld [vmem:[%s13307_s1] sm:$0xf]  ;;  %p379_p10 = scmp.lt.s32.totalorder %s11142_s21, 1  ;;  %s13437_s0 = sld [smem:[#allocation39_spill]] }
  0x19   : > { %389 = vst.msk [vmem:[#allocation2 + $0x18] sm:$0xff] %vm384_vm1, %v13318_v1  ;;  %390 = vst.msk [vmem:[#allocation2 + $0x20] sm:$0xff] %vm384_vm1, %v13318_v1  ;;  %9479 = vmatpush3.msk.msra.mxu0 %vm725_vm0, %v8253_v0  ;;  %v11299_v6 = vld [vmem:[%s13307_s1 + $0x8] sm:$0xf]  ;;  %vm440_vm3 = vcmask 64512   ;;  %vm443_vm4 = vcmask 58368  }
  0x1a   : > { %392 = vst.msk [vmem:[#allocation2 + $0x30] sm:$0xff] %vm384_vm1, %v13318_v1  ;;  %393 = vst.msk [vmem:[#allocation2 + $0x38] sm:$0xff] %vm384_vm1, %v13318_v1  ;;  %9528 = vmatprep.subr.msk.mxu0 %vm725_vm0, %v594_v2  ;;  %s380_s14 = scalar_select %p379_p10, %s11142_s21, 1 }
  0x1b   : > { %395 = vst.msk [vmem:[#allocation2 + $0x48] sm:$0xff] %vm384_vm1, %v13318_v1  ;;  %396 = vst.msk [vmem:[#allocation2 + $0x50] sm:$0xff] %vm384_vm1, %v13318_v1  ;;  %s377_s13 = sand.u32 1, %s11047_s18   ;;  %s8862_s16 = sshll.u32 %s11142_s21, 4 }
  0x1c   : > { %398 = vst.msk [vmem:[#allocation2 + $0x60] sm:$0xff] %vm384_vm1, %v13318_v1  ;;  %399 = vst.msk [vmem:[#allocation2 + $0x68] sm:$0xff] %vm384_vm1, %v13318_v1  ;;  %s8865_s15 = sshll.u32 %s380_s14, 8  ;;  %s378_s22 = scalar_lea.vmem [#allocation4], %s377_s13 }
  0x1d   : > { %401 = vst.msk [vmem:[#allocation2 + $0x78] sm:$0xff] %vm384_vm1, %v13318_v1  ;;  %402 = vst.msk [vmem:[#allocation2 + $0x80] sm:$0xff] %vm384_vm1, %v13318_v1  ;;  %s13264_s30 = scalar_lea.hbm %s13317_s11, %s8862_s16  ;;  %s8180_s12 = scalar_lea.sflag [#allocation5], %s377_s13 }
  0x1e   : > { %404 = vst.msk [vmem:[#allocation2 + $0x90] sm:$0xff] %vm384_vm1, %v13318_v1  ;;  %405 = vst.msk [vmem:[#allocation2 + $0x98] sm:$0xff] %vm384_vm1, %v13318_v1  ;;  %s11291_s24 = scalar_lea.vmem %s13437_s0, %s8865_s15  ;;  %s11060_s21 = smov [#allocation4]  }
  0x1f   : > { %407 = vst.msk [vmem:[#allocation2 + $0xa8] sm:$0xff] %vm384_vm1, %v13318_v1  ;;  %408 = vst.msk [vmem:[#allocation2 + $0xb0] sm:$0xff] %vm384_vm1, %v13318_v1  ;;  %v497_v3 = vld [vmem:[%s11291_s24] sm:$0xff]  ;;  %v498_v4 = vld [vmem:[%s11291_s24 + $0x8] sm:$0xff]  ;;  %s10997_s15 = sshll.u32 %s11060_s21, 4  ;;  %s10998_s15 = int_to_ptr.vmem [resolvable:$false] %s10997_s15 }
  0x20   : > { %410 = vst.msk [vmem:[#allocation2 + $0xc0] sm:$0xff] %vm384_vm1, %v13318_v1  ;;  %411 = vst.msk [vmem:[#allocation2 + $0xc8] sm:$0xff] %vm384_vm1, %v13318_v1  ;;  %v499_v5 = vld [vmem:[%s11291_s24 + $0x10] sm:$0xff]  ;;  %v595_v7 = vld [vmem:[#allocation2 + $0x1] sm:$0xff]  ;;  %s10999_s0 = scalar_lea.vmem %s10998_s15, 32 }
  0x21   : > { %413 = vst.msk [vmem:[#allocation2 + $0xd8] sm:$0xff] %vm384_vm1, %v13318_v1  ;;  %414 = vst.msk [vmem:[#allocation2 + $0xe0] sm:$0xff] %vm384_vm1, %v13318_v1  ;;  %v500_v9 = vld [vmem:[%s11291_s24 + $0x18] sm:$0xff]  ;;  %9480 = vmatprep.mubr.msk.f32.mxu0 %vm384_vm1, %v595_v7  ;;  %v501_v10 = vld [vmem:[%s11291_s24 + $0x20] sm:$0xff] }
  0x22   : > { %416 = vst.msk [vmem:[#allocation2 + $0xf0] sm:$0xff] %vm384_vm1, %v13318_v1  ;;  %417 = vst.msk [vmem:[#allocation2 + $0xf8] sm:$0xff] %vm384_vm1, %v13318_v1  ;;  %v502_v11 = vld [vmem:[%s11291_s24 + $0x28] sm:$0xff]  ;;  %v503_v12 = vld [vmem:[%s11291_s24 + $0x30] sm:$0xff] }
  0x23   : > { %419 = vst.msk [vmem:[#allocation2 + $0x108] sm:$0xff] %vm384_vm1, %v13318_v1  ;;  %420 = vst.msk [vmem:[#allocation2 + $0x110] sm:$0xff] %vm384_vm1, %v13318_v1  ;;  %v504_v13 = vld [vmem:[%s11291_s24 + $0x38] sm:$0xff]  ;;  %v505_v14 = vld [vmem:[%s11291_s24 + $0x40] sm:$0xff] }
  0x24   : > { %422 = vst.msk [vmem:[#allocation2 + $0x120] sm:$0xff] %vm384_vm1, %v13318_v1  ;;  %423 = vst.msk [vmem:[#allocation2 + $0x128] sm:$0xff] %vm384_vm1, %v13318_v1  ;;  %v506_v15 = vld [vmem:[%s11291_s24 + $0x48] sm:$0xff]  ;;  %v507_v16 = vld [vmem:[%s11291_s24 + $0x50] sm:$0xff] }
  0x25   : > { %425 = vst.msk [vmem:[#allocation2 + $0x138] sm:$0xff] %vm384_vm1, %v13318_v1  ;;  %426 = vst.msk [vmem:[#allocation2 + $0x140] sm:$0xff] %vm384_vm1, %v13318_v1  ;;  %v508_v17 = vld [vmem:[%s11291_s24 + $0x58] sm:$0xff]  ;;  %v509_v18 = vld [vmem:[%s11291_s24 + $0x60] sm:$0xff] }
  0x26   : > { %428 = vst.msk [vmem:[#allocation2 + $0x150] sm:$0xff] %vm384_vm1, %v13318_v1  ;;  %429 = vst.msk [vmem:[#allocation2 + $0x158] sm:$0xff] %vm384_vm1, %v13318_v1  ;;  %v510_v19 = vld [vmem:[%s11291_s24 + $0x68] sm:$0xff]  ;;  %v511_v20 = vld [vmem:[%s11291_s24 + $0x70] sm:$0xff] }
  0x27   : > { %431 = vst.msk [vmem:[#allocation2 + $0x168] sm:$0xff] %vm384_vm1, %v13318_v1  ;;  %432 = vst.msk [vmem:[#allocation2 + $0x170] sm:$0xff] %vm384_vm1, %v13318_v1  ;;  %v512_v21 = vld [vmem:[%s11291_s24 + $0x78] sm:$0xff]  ;;  %v513_v22 = vld [vmem:[%s11291_s24 + $0x80] sm:$0xff] }
  0x28   : > { %434 = vst.msk [vmem:[#allocation2 + $0x180] sm:$0xff] %vm384_vm1, %v13318_v1  ;;  %435 = vst.msk [vmem:[#allocation2 + $0x188] sm:$0xff] %vm384_vm1, %v13318_v1  ;;  %v514_v23 = vld [vmem:[%s11291_s24 + $0x88] sm:$0xff]  ;;  %v515_v24 = vld [vmem:[%s11291_s24 + $0x90] sm:$0xff] }
  0x29   : > { %437 = vst.msk [vmem:[#allocation2 + $0x198] sm:$0xff] %vm384_vm1, %v13318_v1  ;;  %438 = vst.msk [vmem:[#allocation2 + $0x1a0] sm:$0xff] %vm384_vm1, %v13318_v1  ;;  %v516_v25 = vld [vmem:[%s11291_s24 + $0x98] sm:$0xff]  ;;  %v517_v26 = vld [vmem:[%s11291_s24 + $0xa0] sm:$0xff] }
  0x2a   : > { %388 = vst.msk [vmem:[#allocation2 + $0x10] sm:$0x3] %vm387_vm2, %v13318_v1  ;;  %391 = vst.msk [vmem:[#allocation2 + $0x28] sm:$0x3] %vm387_vm2, %v13318_v1  ;;  %v518_v27 = vld [vmem:[%s11291_s24 + $0xa8] sm:$0xff]  ;;  %v519_v31 = vld [vmem:[%s11291_s24 + $0xb0] sm:$0xff] }
  0x2b   : > { %394 = vst.msk [vmem:[#allocation2 + $0x40] sm:$0x3] %vm387_vm2, %v13318_v1  ;;  %397 = vst.msk [vmem:[#allocation2 + $0x58] sm:$0x3] %vm387_vm2, %v13318_v1  ;;  %v520_v32 = vld [vmem:[%s11291_s24 + $0xb8] sm:$0xff]  ;;  %v521_v37 = vld [vmem:[%s11291_s24 + $0xc0] sm:$0xff] }
  0x2c   : > { %400 = vst.msk [vmem:[#allocation2 + $0x70] sm:$0x3] %vm387_vm2, %v13318_v1  ;;  %403 = vst.msk [vmem:[#allocation2 + $0x88] sm:$0x3] %vm387_vm2, %v13318_v1  ;;  %v522_v38 = vld [vmem:[%s11291_s24 + $0xc8] sm:$0xff]  ;;  %v523_v39 = vld [vmem:[%s11291_s24 + $0xd0] sm:$0xff] }
  0x2d   : > { %406 = vst.msk [vmem:[#allocation2 + $0xa0] sm:$0x3] %vm387_vm2, %v13318_v1  ;;  %409 = vst.msk [vmem:[#allocation2 + $0xb8] sm:$0x3] %vm387_vm2, %v13318_v1  ;;  %v524_v40 = vld [vmem:[%s11291_s24 + $0xd8] sm:$0xff]  ;;  %v525_v41 = vld [vmem:[%s11291_s24 + $0xe0] sm:$0xff] }
  0x2e   : > { %412 = vst.msk [vmem:[#allocation2 + $0xd0] sm:$0x3] %vm387_vm2, %v13318_v1  ;;  %415 = vst.msk [vmem:[#allocation2 + $0xe8] sm:$0x3] %vm387_vm2, %v13318_v1  ;;  %v526_v42 = vld [vmem:[%s11291_s24 + $0xe8] sm:$0xff] }
  0x2f   : > { %418 = vst.msk [vmem:[#allocation2 + $0x100] sm:$0x3] %vm387_vm2, %v13318_v1  ;;  %421 = vst.msk [vmem:[#allocation2 + $0x118] sm:$0x3] %vm387_vm2, %v13318_v1  ;;  %v11489_v7 = vld [vmem:[%s13307_s1 + $0xc] sm:$0xf] }
  0x30   : > { %424 = vst.msk [vmem:[#allocation2 + $0x130] sm:$0x3] %vm387_vm2, %v13318_v1  ;;  %427 = vst.msk [vmem:[#allocation2 + $0x148] sm:$0x3] %vm387_vm2, %v13318_v1 }
  0x31   : > { %430 = vst.msk [vmem:[#allocation2 + $0x160] sm:$0x3] %vm387_vm2, %v13318_v1  ;;  %433 = vst.msk [vmem:[#allocation2 + $0x178] sm:$0x3] %vm387_vm2, %v13318_v1  ;;  %v596_v8 = vld [vmem:[#allocation2 + $0x9] sm:$0xff] }
  0x32   : > { %436 = vst.msk [vmem:[#allocation2 + $0x190] sm:$0x3] %vm387_vm2, %v13318_v1  ;;  %439 = vst.msk [vmem:[#allocation2 + $0x1a8] sm:$0x3] %vm387_vm2, %v13318_v1  ;;  %9481 = vmatmul.mubr.msk.f32.vlgmr.msra.gmra.mrb[0].mxu0 %vm384_vm1, %v596_v8 }
  0x33   : > { %530 = vst.msk [vmem:[#allocation2 + $0x19] sm:$0xff] %vm384_vm1, %v497_v3  ;;  %531 = vst.msk [vmem:[#allocation2 + $0x21] sm:$0xff] %vm384_vm1, %v498_v4  ;;  %9529 = vmatpush3.msk.msra.mxu0 %vm725_vm0, %v594_v2  ;;  %v562_v3 = vld [vmem:[#allocation2] sm:$0xff]  ;;  %v563_v4 = vld [vmem:[#allocation2 + $0x8] sm:$0xff] }
  0x34   : > { %532 = vst.msk [vmem:[#allocation2 + $0x31] sm:$0xff] %vm384_vm1, %v499_v5  ;;  %533 = vst.msk [vmem:[#allocation2 + $0x39] sm:$0xff] %vm384_vm1, %v500_v9  ;;  %9578 = vmatprep.subr.msk.mxu0 %vm725_vm0, %v11299_v6 }
  0x35   : > { %534 = vst.msk [vmem:[#allocation2 + $0x49] sm:$0xff] %vm384_vm1, %v501_v10  ;;  %535 = vst.msk [vmem:[#allocation2 + $0x51] sm:$0xff] %vm384_vm1, %v502_v11 }
  0x36   : > { %536 = vst.msk [vmem:[#allocation2 + $0x61] sm:$0xff] %vm384_vm1, %v503_v12  ;;  %537 = vst.msk [vmem:[#allocation2 + $0x69] sm:$0xff] %vm384_vm1, %v504_v13 }
  0x37   : > { %538 = vst.msk [vmem:[#allocation2 + $0x79] sm:$0xff] %vm384_vm1, %v505_v14  ;;  %539 = vst.msk [vmem:[#allocation2 + $0x81] sm:$0xff] %vm384_vm1, %v506_v15 }
  0x38   : > { %540 = vst.msk [vmem:[#allocation2 + $0x91] sm:$0xff] %vm384_vm1, %v507_v16  ;;  %541 = vst.msk [vmem:[#allocation2 + $0x99] sm:$0xff] %vm384_vm1, %v508_v17 }
  0x39   : > { %542 = vst.msk [vmem:[#allocation2 + $0xa9] sm:$0xff] %vm384_vm1, %v509_v18  ;;  %543 = vst.msk [vmem:[#allocation2 + $0xb1] sm:$0xff] %vm384_vm1, %v510_v19 }
  0x3a   : > { %544 = vst.msk [vmem:[#allocation2 + $0xc1] sm:$0xff] %vm384_vm1, %v511_v20  ;;  %545 = vst.msk [vmem:[#allocation2 + $0xc9] sm:$0xff] %vm384_vm1, %v512_v21  ;;  %v11344_v28 = vld [vmem:[#allocation2 + $0x19] sm:$0xff]  ;;  %v11346_v29 = vld [vmem:[#allocation2 + $0x21] sm:$0xff] }
  0x3b   : > { %546 = vst.msk [vmem:[#allocation2 + $0xd9] sm:$0xff] %vm384_vm1, %v513_v22  ;;  %547 = vst.msk [vmem:[#allocation2 + $0xe1] sm:$0xff] %vm384_vm1, %v514_v23  ;;  %v11348_v30 = vld [vmem:[#allocation2 + $0x31] sm:$0xff]  ;;  %9483 = vmatprep.mubr.msk.f32.mxu0 %vm384_vm1, %v11344_v28  ;;  %v11363_v33 = vld [vmem:[#allocation2 + $0x39] sm:$0xff] }
  0x3c   : > { %548 = vst.msk [vmem:[#allocation2 + $0xf1] sm:$0xff] %vm384_vm1, %v515_v24  ;;  %549 = vst.msk [vmem:[#allocation2 + $0xf9] sm:$0xff] %vm384_vm1, %v516_v25  ;;  %9484 = vmatmul.mubr.msk.f32.gmra.mrb[2].mxu0 %vm384_vm1, %v11346_v29  ;;  %v11365_v34 = vld [vmem:[#allocation2 + $0x49] sm:$0xff]  ;;  %v11371_v35 = vld [vmem:[#allocation2 + $0x51] sm:$0xff] }
  0x3d   : > { %550 = vst.msk [vmem:[#allocation2 + $0x109] sm:$0xff] %vm384_vm1, %v517_v26  ;;  %551 = vst.msk [vmem:[#allocation2 + $0x111] sm:$0xff] %vm384_vm1, %v518_v27  ;;  %9486 = vmatprep.mubr.msk.f32.mxu0 %vm384_vm1, %v11348_v30  ;;  %v11373_v36 = vld [vmem:[#allocation2 + $0x61] sm:$0xff]  ;;  %v11389_v43 = vld [vmem:[#allocation2 + $0x69] sm:$0xff] }
  0x3e   : > { %552 = vst.msk [vmem:[#allocation2 + $0x121] sm:$0xff] %vm384_vm1, %v519_v31  ;;  %553 = vst.msk [vmem:[#allocation2 + $0x129] sm:$0xff] %vm384_vm1, %v520_v32  ;;  %v11393_v44 = vld [vmem:[#allocation2 + $0x79] sm:$0xff]  ;;  %v11399_v45 = vld [vmem:[#allocation2 + $0x81] sm:$0xff] }
  0x3f   : > { %554 = vst.msk [vmem:[#allocation2 + $0x139] sm:$0xff] %vm384_vm1, %v521_v37  ;;  %555 = vst.msk [vmem:[#allocation2 + $0x141] sm:$0xff] %vm384_vm1, %v522_v38  ;;  %v11401_v46 = vld [vmem:[#allocation2 + $0x91] sm:$0xff]  ;;  %v11407_v47 = vld [vmem:[#allocation2 + $0x99] sm:$0xff] }
  0x40   : > { %9487 = vmatmul.mubr.msk.f32.gmra.mrb[4].mxu0 %vm384_vm1, %v11363_v33  ;;  %556 = vst.msk [vmem:[#allocation2 + $0x151] sm:$0xff] %vm384_vm1, %v523_v39  ;;  %557 = vst.msk [vmem:[#allocation2 + $0x159] sm:$0xff] %vm384_vm1, %v524_v40  ;;  %v11409_v48 = vld [vmem:[#allocation2 + $0xa9] sm:$0xff]  ;;  %v11415_v49 = vld [vmem:[#allocation2 + $0xb1] sm:$0xff] }
  0x41   : > { %9489 = vmatprep.mubr.msk.f32.mxu0 %vm384_vm1, %v11365_v34  ;;  %558 = vst.msk [vmem:[#allocation2 + $0x169] sm:$0xff] %vm384_vm1, %v525_v41  ;;  %559 = vst.msk [vmem:[#allocation2 + $0x171] sm:$0xff] %vm384_vm1, %v526_v42  ;;  %v11417_v50 = vld [vmem:[#allocation2 + $0xc1] sm:$0xff]  ;;  %v11423_v51 = vld [vmem:[#allocation2 + $0xc9] sm:$0xff] }
  0x42   : > { %v11425_v52 = vld [vmem:[#allocation2 + $0xd9] sm:$0xff]  ;;  %v11431_v53 = vld [vmem:[#allocation2 + $0xe1] sm:$0xff]  ;;  %v11498_v9 = vld [vmem:[#allocation2 + $0x30] sm:$0xff] }
  0x43   : > { %v11433_v54 = vld [vmem:[#allocation2 + $0xf1] sm:$0xff]  ;;  %v11439_v55 = vld [vmem:[#allocation2 + $0xf9] sm:$0xff]  ;;  %v11508_v11 = vld [vmem:[#allocation2 + $0x48] sm:$0xff] }
  0x44   : > { %9490 = vmatmul.mubr.msk.f32.gmra.mrb[6].mxu0 %vm384_vm1, %v11371_v35  ;;  %v11441_v56 = vld [vmem:[#allocation2 + $0x109] sm:$0xff]  ;;  %v11447_v57 = vld [vmem:[#allocation2 + $0x111] sm:$0xff]  ;;  %v11496_v8 = vld [vmem:[#allocation2 + $0x20] sm:$0xff] }
  0x45   : > { %9492 = vmatprep.mubr.msk.f32.mxu0 %vm384_vm1, %v11373_v36  ;;  %v11449_v58 = vld [vmem:[#allocation2 + $0x121] sm:$0xff]  ;;  %v11455_v59 = vld [vmem:[#allocation2 + $0x129] sm:$0xff]  ;;  %v11484_v5 = vld [vmem:[#allocation2 + $0x18] sm:$0xff] }
  0x46   : > { %v11457_v60 = vld [vmem:[#allocation2 + $0x139] sm:$0xff]  ;;  %v11463_v61 = vld [vmem:[#allocation2 + $0x141] sm:$0xff]  ;;  %v11532_v16 = vld [vmem:[#allocation2 + $0x90] sm:$0xff] }
  0x47   : > { %v11465_v62 = vld [vmem:[#allocation2 + $0x151] sm:$0xff]  ;;  %v11471_v63 = vld [vmem:[#allocation2 + $0x159] sm:$0xff]  ;;  %v11522_v13 = vld [vmem:[#allocation2 + $0x68] sm:$0xff] }
  0x48   : > { %9493 = vmatmul.mubr.msk.f32.gmra.mrb[8].mxu0 %vm384_vm1, %v11389_v43  ;;  %13438 = vst [vmem:[#allocation7_spill] sm:$0xff] %v11465_v62  ;;  %13439 = vst [vmem:[#allocation8_spill] sm:$0xff] %v11471_v63  ;;  %v11473_v0 = vld [vmem:[#allocation2 + $0x169] sm:$0xff]  ;;  %v11479_v2 = vld [vmem:[#allocation2 + $0x171] sm:$0xff] }
  0x49   : > { %9495 = vmatprep.mubr.msk.f32.mxu0 %vm384_vm1, %v11393_v44  ;;  %13440 = vst [vmem:[#allocation9_spill] sm:$0xff] %v11473_v0  ;;  %13441 = vst [vmem:[#allocation10_spill] sm:$0xff] %v11479_v2  ;;  %v11506_v10 = vld [vmem:[#allocation2 + $0x38] sm:$0xff]  ;;  %v11516_v12 = vld [vmem:[#allocation2 + $0x60] sm:$0xff] }
  0x4a   : > { %v11524_v14 = vld [vmem:[#allocation2 + $0x78] sm:$0xff]  ;;  %v11530_v15 = vld [vmem:[#allocation2 + $0x80] sm:$0xff]  ;;  %v11540_v18 = vld [vmem:[#allocation2 + $0xa8] sm:$0xff] }
  0x4b   : > { %v11538_v17 = vld [vmem:[#allocation2 + $0x98] sm:$0xff]  ;;  %v11546_v19 = vld [vmem:[#allocation2 + $0xb0] sm:$0xff]  ;;  %v11548_v20 = vld [vmem:[#allocation2 + $0xc0] sm:$0xff] }
  0x4c   : > { %9496 = vmatmul.mubr.msk.f32.gmra.mrb[10].mxu0 %vm384_vm1, %v11399_v45  ;;  %v11554_v21 = vld [vmem:[#allocation2 + $0xc8] sm:$0xff]  ;;  %v11556_v22 = vld [vmem:[#allocation2 + $0xd8] sm:$0xff]  ;;  %v11562_v23 = vld [vmem:[#allocation2 + $0xe0] sm:$0xff] }
  0x4d   : > { %9498 = vmatprep.mubr.msk.f32.mxu0 %vm384_vm1, %v11401_v46  ;;  %v11564_v24 = vld [vmem:[#allocation2 + $0xf0] sm:$0xff]  ;;  %v11570_v25 = vld [vmem:[#allocation2 + $0xf8] sm:$0xff]  ;;  %v11572_v26 = vld [vmem:[#allocation2 + $0x108] sm:$0xff] }
  0x4e   : > { %v11578_v27 = vld [vmem:[#allocation2 + $0x110] sm:$0xff]  ;;  %v11580_v31 = vld [vmem:[#allocation2 + $0x120] sm:$0xff]  ;;  %v11586_v32 = vld [vmem:[#allocation2 + $0x128] sm:$0xff] }
  0x4f   : > { %v11588_v37 = vld [vmem:[#allocation2 + $0x138] sm:$0xff]  ;;  %v11594_v38 = vld [vmem:[#allocation2 + $0x140] sm:$0xff]  ;;  %v11596_v39 = vld [vmem:[#allocation2 + $0x150] sm:$0xff] }
  0x50   : > { %9499 = vmatmul.mubr.msk.f32.gmra.mrb[12].mxu0 %vm384_vm1, %v11407_v47  ;;  %v527_v40 = vld [vmem:[%s11291_s24 + $0xf0] sm:$0xff]  ;;  %v528_v41 = vld [vmem:[%s11291_s24 + $0xf8] sm:$0xff]  ;;  %s8192_s24 = sshll.u32 %s378_s22, 4  ;;  %s13266_s24 = int_to_ptr.vmem [resolvable:$true] %s8192_s24 }
  0x51   : > { %9501 = vmatprep.mubr.msk.f32.mxu0 %vm384_vm1, %v11409_v48  ;;  %560 = vst.msk [vmem:[#allocation2 + $0x181] sm:$0xff] %vm384_vm1, %v527_v40  ;;  %561 = vst.msk [vmem:[#allocation2 + $0x189] sm:$0xff] %vm384_vm1, %v528_v41  ;;  %v11606_v42 = vld [vmem:[#allocation2 + $0x158] sm:$0xff]  ;;  %v1278_v40 = vld [vmem:[#allocation2 + $0x2] sm:$0xff]  ;;  %s10993_s14 = scalar_lea.vmem %s13266_s24, 16  ;;  %p11000_p0 = scmp.lt.s32.totalorder %s13266_s24, %s10998_s15 }
  0x52   : > { %v1279_v41 = vld [vmem:[#allocation2 + $0xa] sm:$0xff]  ;;  %v11619_v1 = vld [vmem:[#allocation2 + $0x1a] sm:$0xff]  ;;  %p10994_p11 = scmp.ne.s32.totalorder %s13266_s24, %s10993_s14  ;;  %p11001_p1 = scmp.lt.s32.totalorder %s10999_s0, %s10993_s14 }
  0x53   : > { %13442 = vst [vmem:[#allocation11_spill] sm:$0xff] %v11619_v1 }
  0x54   : > { %9502 = vmatmul.mubr.msk.f32.gmra.mrb[14].mxu0 %vm384_vm1, %v11415_v49  ;;  %p10995_p12 = pnand %p10994_p11, %p11159_p5  ;;  %p11002_p2 = por %p11001_p1, %p11000_p0 }
  0x55   : > { %9504 = vmatprep.mubr.msk.f32.mxu0 %vm384_vm1, %v11417_v50 }
  0x56   : > { %p10996_p13 = pneg %p10995_p12 }
  0x58   : > { %9505 = vmatmul.mubr.msk.f32.gmra.mrb[16].mxu0 %vm384_vm1, %v11423_v51  ;;  %p11003_p3 = pnand %p11002_p2, %p10996_p13 }
  0x59   : > { %9507 = vmatprep.mubr.msk.f32.mxu0 %vm384_vm1, %v11425_v52 }
  0x5c   : > { %9508 = vmatmul.mubr.msk.f32.gmra.mrb[18].mxu0 %vm384_vm1, %v11431_v53 }
  0x5d   : > { %9510 = vmatprep.mubr.msk.f32.mxu0 %vm384_vm1, %v11433_v54 }
  0x60   : > { %9511 = vmatmul.mubr.msk.f32.gmra.mrb[20].mxu0 %vm384_vm1, %v11439_v55 }
  0x61   : > { %9513 = vmatprep.mubr.msk.f32.mxu0 %vm384_vm1, %v11441_v56 }
  0x64   : > { %9514 = vmatmul.mubr.msk.f32.gmra.mrb[22].mxu0 %vm384_vm1, %v11447_v57 }
  0x65   : > { %9516 = vmatprep.mubr.msk.f32.mxu0 %vm384_vm1, %v11449_v58 }
  0x68   : > { %9517 = vmatmul.mubr.msk.f32.gmra.mrb[24].mxu0 %vm384_vm1, %v11455_v59 }
  0x69   : > { %9519 = vmatprep.mubr.msk.f32.mxu0 %vm384_vm1, %v11457_v60 }
  0x6c   : > { %9520 = vmatmul.mubr.msk.f32.gmra.mrb[26].mxu0 %vm384_vm1, %v11463_v61 }
  0x6d   : > { %9522 = vmatprep.mubr.msk.f32.mxu0 %vm384_vm1, %v11465_v62 }
  0x70   : > { %9523 = vmatmul.mubr.msk.f32.gmra.mrb[28].mxu0 %vm384_vm1, %v11471_v63  ;;  %v11633_v63 = vld [vmem:[#allocation2 + $0x32] sm:$0xff] }
  0x71   : > { %9525 = vmatprep.mubr.msk.f32.mxu0 %vm384_vm1, %v11473_v0  ;;  %v11631_v0 = vld [vmem:[#allocation2 + $0x22] sm:$0xff]  ;;  %13444 = vst [vmem:[#allocation13_spill] sm:$0xff] %v11633_v63 }
  0x72   : > { %13443 = vst [vmem:[#allocation12_spill] sm:$0xff] %v11631_v0 }
  0x74   : > { %9526 = vmatmul.mubr.msk.f32.gmra.mrb[30].mxu0 %vm384_vm1, %v11479_v2  ;;  %v11624_v2 = vld [vmem:[%s13307_s1 + $0x10] sm:$0xf] }
  0x75   : > { %9530 = vmatprep.mubr.msk.f32.mxu0 %vm384_vm1, %v562_v3  ;;  %v11608_v3 = vld [vmem:[#allocation2 + $0x168] sm:$0xff] }
  0x78   : > { %9531 = vmatmul.mubr.msk.f32.vlgmr.msra.gmra.mrb[0].mxu0 %vm384_vm1, %v563_v4  ;;  %v11614_v4 = vld [vmem:[#allocation2 + $0x170] sm:$0xff] }
  0x79   : > { %9579 = vmatpush3.msk.msra.mxu0 %vm725_vm0, %v11299_v6  ;;  %9533 = vmatprep.mubr.msk.f32.mxu0 %vm384_vm1, %v11484_v5  ;;  %v11514_v6 = vld [vmem:[#allocation2 + $0x50] sm:$0xff] }
  0x7a   : > { %9628 = vmatprep.subr.msk.mxu0 %vm725_vm0, %v11489_v7 }
  0x7c   : > { %9534 = vmatmul.mubr.msk.f32.gmra.mrb[2].mxu0 %vm384_vm1, %v11496_v8 }
  0x7d   : > { %9536 = vmatprep.mubr.msk.f32.mxu0 %vm384_vm1, %v11498_v9 }
  0x80   : > { %9537 = vmatmul.mubr.msk.f32.gmra.mrb[4].mxu0 %vm384_vm1, %v11506_v10 }
  0x81   : > { %9539 = vmatprep.mubr.msk.f32.mxu0 %vm384_vm1, %v11508_v11 }
  0x84   : > { %9540 = vmatmul.mubr.msk.f32.gmra.mrb[6].mxu0 %vm384_vm1, %v11514_v6 }
  0x85   : > { %9542 = vmatprep.mubr.msk.f32.mxu0 %vm384_vm1, %v11516_v12 }
  0x88   : > { %9543 = vmatmul.mubr.msk.f32.gmra.mrb[8].mxu0 %vm384_vm1, %v11522_v13 }
  0x89   : > { %9545 = vmatprep.mubr.msk.f32.mxu0 %vm384_vm1, %v11524_v14 }
  0x8c   : > { %9546 = vmatmul.mubr.msk.f32.gmra.mrb[10].mxu0 %vm384_vm1, %v11530_v15 }
  0x8d   : > { %9548 = vmatprep.mubr.msk.f32.mxu0 %vm384_vm1, %v11532_v16 }
  0x90   : > { %9549 = vmatmul.mubr.msk.f32.gmra.mrb[12].mxu0 %vm384_vm1, %v11538_v17 }
  0x91   : > { %9551 = vmatprep.mubr.msk.f32.mxu0 %vm384_vm1, %v11540_v18 }
  0x94   : > { %9552 = vmatmul.mubr.msk.f32.gmra.mrb[14].mxu0 %vm384_vm1, %v11546_v19 }
  0x95   : > { %9554 = vmatprep.mubr.msk.f32.mxu0 %vm384_vm1, %v11548_v20 }
  0x98   : > { %9555 = vmatmul.mubr.msk.f32.gmra.mrb[16].mxu0 %vm384_vm1, %v11554_v21 }
  0x99   : > { %9557 = vmatprep.mubr.msk.f32.mxu0 %vm384_vm1, %v11556_v22 }
  0x9c   : > { %9558 = vmatmul.mubr.msk.f32.gmra.mrb[18].mxu0 %vm384_vm1, %v11562_v23 }
  0x9d   : > { %9560 = vmatprep.mubr.msk.f32.mxu0 %vm384_vm1, %v11564_v24 }
  0xa0   : > { %9561 = vmatmul.mubr.msk.f32.gmra.mrb[20].mxu0 %vm384_vm1, %v11570_v25 }
  0xa1   : > { %9563 = vmatprep.mubr.msk.f32.mxu0 %vm384_vm1, %v11572_v26 }
  0xa4   : > { %9564 = vmatmul.mubr.msk.f32.gmra.mrb[22].mxu0 %vm384_vm1, %v11578_v27 }
  0xa5   : > { %9566 = vmatprep.mubr.msk.f32.mxu0 %vm384_vm1, %v11580_v31 }
  0xa8   : > { %9567 = vmatmul.mubr.msk.f32.gmra.mrb[24].mxu0 %vm384_vm1, %v11586_v32 }
  0xa9   : > { %9569 = vmatprep.mubr.msk.f32.mxu0 %vm384_vm1, %v11588_v37 }
  0xac   : > { %9570 = vmatmul.mubr.msk.f32.gmra.mrb[26].mxu0 %vm384_vm1, %v11594_v38 }
  0xad   : > { %9572 = vmatprep.mubr.msk.f32.mxu0 %vm384_vm1, %v11596_v39 }
  0xb0   : > { %9573 = vmatmul.mubr.msk.f32.gmra.mrb[28].mxu0 %vm384_vm1, %v11606_v42 }
  0xb1   : > { %9575 = vmatprep.mubr.msk.f32.mxu0 %vm384_vm1, %v11608_v3 }
  0xb4   : > { %9576 = vmatmul.mubr.msk.f32.gmra.mrb[30].mxu0 %vm384_vm1, %v11614_v4 }
  0xb5   : > { %9580 = vmatprep.mubr.msk.f32.mxu0 %vm384_vm1, %v1278_v40  ;;  %v11641_v40 = vld [vmem:[#allocation2 + $0x3a] sm:$0xff] }
  0xb6   : > { %13445 = vst [vmem:[#allocation14_spill] sm:$0xff] %v11641_v40 }
  0xb8   : > { %9581 = vmatmul.mubr.msk.f32.vlgmr.msra.gmra.mrb[0].mxu0 %vm384_vm1, %v1279_v41  ;;  %v11643_v41 = vld [vmem:[#allocation2 + $0x4a] sm:$0xff] }
  0xb9   : > { %9629 = vmatpush3.msk.msra.mxu0 %vm725_vm0, %v11489_v7  ;;  %9583 = vmatprep.mubr.msk.f32.mxu0 %vm384_vm1, %v11619_v1  ;;  %13446 = vst [vmem:[#allocation15_spill] sm:$0xff] %v11643_v41  ;;  %v11649_v7 = vld [vmem:[#allocation2 + $0x52] sm:$0xff]  ;;  %v11651_v1 = vld [vmem:[#allocation2 + $0x62] sm:$0xff] }
  0xba   : > { %9678 = vmatprep.subr.msk.mxu0 %vm725_vm0, %v11624_v2  ;;  %13447 = vst [vmem:[#allocation16_spill] sm:$0xff] %v11649_v7  ;;  %13448 = vst [vmem:[#allocation17_spill] sm:$0xff] %v11651_v1 }
  0xbc   : > { %9584 = vmatmul.mubr.msk.f32.gmra.mrb[2].mxu0 %vm384_vm1, %v11631_v0  ;;  %v11659_v0 = vld [vmem:[#allocation2 + $0x7a] sm:$0xff] }
  0xbd   : > { %9586 = vmatprep.mubr.msk.f32.mxu0 %vm384_vm1, %v11633_v63  ;;  %v11657_v63 = vld [vmem:[#allocation2 + $0x6a] sm:$0xff]  ;;  %13450 = vst [vmem:[#allocation19_spill] sm:$0xff] %v11659_v0 }
  0xbe   : > { %13449 = vst [vmem:[#allocation18_spill] sm:$0xff] %v11657_v63 }
  0xc0   : > { %9587 = vmatmul.mubr.msk.f32.gmra.mrb[4].mxu0 %vm384_vm1, %v11641_v40  ;;  %v11667_v40 = vld [vmem:[#allocation2 + $0x92] sm:$0xff] }
  0xc1   : > { %9589 = vmatprep.mubr.msk.f32.mxu0 %vm384_vm1, %v11643_v41  ;;  %v11665_v41 = vld [vmem:[#allocation2 + $0x82] sm:$0xff]  ;;  %13452 = vst [vmem:[#allocation21_spill] sm:$0xff] %v11667_v40 }
  0xc2   : > { %13451 = vst [vmem:[#allocation20_spill] sm:$0xff] %v11665_v41 }
  0xc4   : > { %9590 = vmatmul.mubr.msk.f32.gmra.mrb[6].mxu0 %vm384_vm1, %v11649_v7  ;;  %v11675_v7 = vld [vmem:[#allocation2 + $0xaa] sm:$0xff] }
  0xc5   : > { %9592 = vmatprep.mubr.msk.f32.mxu0 %vm384_vm1, %v11651_v1  ;;  %v11673_v1 = vld [vmem:[#allocation2 + $0x9a] sm:$0xff]  ;;  %13454 = vst [vmem:[#allocation23_spill] sm:$0xff] %v11675_v7 }
  0xc6   : > { %13453 = vst [vmem:[#allocation22_spill] sm:$0xff] %v11673_v1 }
  0xc8   : > { %9593 = vmatmul.mubr.msk.f32.gmra.mrb[8].mxu0 %vm384_vm1, %v11657_v63  ;;  %v11683_v63 = vld [vmem:[#allocation2 + $0xc2] sm:$0xff] }
  0xc9   : > { %9595 = vmatprep.mubr.msk.f32.mxu0 %vm384_vm1, %v11659_v0  ;;  %v11681_v0 = vld [vmem:[#allocation2 + $0xb2] sm:$0xff]  ;;  %13456 = vst [vmem:[#allocation25_spill] sm:$0xff] %v11683_v63 }
  0xca   : > { %13455 = vst [vmem:[#allocation24_spill] sm:$0xff] %v11681_v0 }
  0xcc   : > { %9596 = vmatmul.mubr.msk.f32.gmra.mrb[10].mxu0 %vm384_vm1, %v11665_v41  ;;  %v11691_v41 = vld [vmem:[#allocation2 + $0xda] sm:$0xff] }
  0xcd   : > { %9598 = vmatprep.mubr.msk.f32.mxu0 %vm384_vm1, %v11667_v40  ;;  %v11689_v40 = vld [vmem:[#allocation2 + $0xca] sm:$0xff]  ;;  %13458 = vst [vmem:[#allocation27_spill] sm:$0xff] %v11691_v41 }
  0xce   : > { %13457 = vst [vmem:[#allocation26_spill] sm:$0xff] %v11689_v40 }
  0xd0   : > { %9599 = vmatmul.mubr.msk.f32.gmra.mrb[12].mxu0 %vm384_vm1, %v11673_v1  ;;  %v11699_v1 = vld [vmem:[#allocation2 + $0xf2] sm:$0xff] }
  0xd1   : > { %9601 = vmatprep.mubr.msk.f32.mxu0 %vm384_vm1, %v11675_v7  ;;  %v11697_v7 = vld [vmem:[#allocation2 + $0xe2] sm:$0xff]  ;;  %13460 = vst [vmem:[#allocation29_spill] sm:$0xff] %v11699_v1 }
  0xd2   : > { %13459 = vst [vmem:[#allocation28_spill] sm:$0xff] %v11697_v7 }
  0xd4   : > { %9602 = vmatmul.mubr.msk.f32.gmra.mrb[14].mxu0 %vm384_vm1, %v11681_v0  ;;  %v11707_v0 = vld [vmem:[#allocation2 + $0x10a] sm:$0xff] }
  0xd5   : > { %9604 = vmatprep.mubr.msk.f32.mxu0 %vm384_vm1, %v11683_v63  ;;  %v11705_v63 = vld [vmem:[#allocation2 + $0xfa] sm:$0xff]  ;;  %13462 = vst [vmem:[#allocation31_spill] sm:$0xff] %v11707_v0 }
  0xd6   : > { %13461 = vst [vmem:[#allocation30_spill] sm:$0xff] %v11705_v63 }
  0xd8   : > { %9605 = vmatmul.mubr.msk.f32.gmra.mrb[16].mxu0 %vm384_vm1, %v11689_v40  ;;  %v11715_v40 = vld [vmem:[#allocation2 + $0x122] sm:$0xff] }
  0xd9   : > { %9607 = vmatprep.mubr.msk.f32.mxu0 %vm384_vm1, %v11691_v41  ;;  %v11713_v41 = vld [vmem:[#allocation2 + $0x112] sm:$0xff]  ;;  %13464 = vst [vmem:[#allocation33_spill] sm:$0xff] %v11715_v40 }
  0xda   : > { %13463 = vst [vmem:[#allocation32_spill] sm:$0xff] %v11713_v41 }
  0xdc   : > { %9608 = vmatmul.mubr.msk.f32.gmra.mrb[18].mxu0 %vm384_vm1, %v11697_v7  ;;  %v11723_v7 = vld [vmem:[#allocation2 + $0x13a] sm:$0xff] }
  0xdd   : > { %9610 = vmatprep.mubr.msk.f32.mxu0 %vm384_vm1, %v11699_v1  ;;  %v11721_v1 = vld [vmem:[#allocation2 + $0x12a] sm:$0xff]  ;;  %13465 = vst [vmem:[#allocation34_spill] sm:$0xff] %v11723_v7 }
  0xe0   : > { %9611 = vmatmul.mubr.msk.f32.gmra.mrb[20].mxu0 %vm384_vm1, %v11705_v63  ;;  %v11731_v63 = vld [vmem:[#allocation2 + $0x152] sm:$0xff] }
  0xe1   : > { %9613 = vmatprep.mubr.msk.f32.mxu0 %vm384_vm1, %v11707_v0  ;;  %v11729_v0 = vld [vmem:[#allocation2 + $0x142] sm:$0xff]  ;;  %13466 = vst [vmem:[#allocation35_spill] sm:$0xff] %v11731_v63 }
  0xe4   : > { %9614 = vmatmul.mubr.msk.f32.gmra.mrb[22].mxu0 %vm384_vm1, %v11713_v41  ;;  %v11739_v41 = vld [vmem:[#allocation2 + $0x16a] sm:$0xff] }
  0xe5   : > { %9616 = vmatprep.mubr.msk.f32.mxu0 %vm384_vm1, %v11715_v40  ;;  %v11737_v40 = vld [vmem:[#allocation2 + $0x15a] sm:$0xff]  ;;  %13467 = vst [vmem:[#allocation36_spill] sm:$0xff] %v11739_v41 }
  0xe8   : > { %9617 = vmatmul.mubr.msk.f32.gmra.mrb[24].mxu0 %vm384_vm1, %v11721_v1 }
  0xe9   : > { %9619 = vmatprep.mubr.msk.f32.mxu0 %vm384_vm1, %v11723_v7  ;;  %v11745_v7 = vld [vmem:[#allocation2 + $0x172] sm:$0xff] }
  0xec   : > { %9620 = vmatmul.mubr.msk.f32.gmra.mrb[26].mxu0 %vm384_vm1, %v11729_v0 }
  0xed   : > { %9622 = vmatprep.mubr.msk.f32.mxu0 %vm384_vm1, %v11731_v63  ;;  %v8422_v63 = vld [vmem:[%s13307_s1 + $0x14] sm:$0xf] }
  0xf0   : > { %9623 = vmatmul.mubr.msk.f32.gmra.mrb[28].mxu0 %vm384_vm1, %v11737_v40 }
  0xf1   : > { %9625 = vmatprep.mubr.msk.f32.mxu0 %vm384_vm1, %v11739_v41 }
  0xf4   : > { %9626 = vmatmul.mubr.msk.f32.gmra.mrb[30].mxu0 %vm384_vm1, %v11745_v7 }
  0xf5   : > { %9630 = vmatprep.mubr.msk.f32.mxu0 %vm384_vm1, %v11484_v5  ;;  %v11819_v5 = vld [vmem:[#allocation2 + $0x188] sm:$0xff] }
  0xf8   : > { %9631 = vmatmul.mubr.msk.f32.vlgmr.msra.gmra.mrb[0].mxu0 %vm384_vm1, %v11496_v8  ;;  %v8456_v8 = vld [vmem:[%s13307_s1 + $0x18] sm:$0xf] }
  0xf9   : > { %9679 = vmatpush3.msk.msra.mxu0 %vm725_vm0, %v11624_v2  ;;  %9633 = vmatprep.mubr.msk.f32.mxu0 %vm384_vm1, %v11498_v9  ;;  %v11813_v2 = vld [vmem:[#allocation2 + $0x180] sm:$0xff] }
  0xfa   : > { %9728 = vmatprep.subr.msk.mxu0 %vm725_vm0, %v8422_v63 }
  0xfc   : > { %9634 = vmatmul.mubr.msk.f32.gmra.mrb[2].mxu0 %vm384_vm1, %v11506_v10 }
  0xfd   : > { %9636 = vmatprep.mubr.msk.f32.mxu0 %vm384_vm1, %v11508_v11 }
 0x100   : > { %9637 = vmatmul.mubr.msk.f32.gmra.mrb[4].mxu0 %vm384_vm1, %v11514_v6 }
 0x101   : > { %9639 = vmatprep.mubr.msk.f32.mxu0 %vm384_vm1, %v11516_v12 }
 0x104   : > { %9640 = vmatmul.mubr.msk.f32.gmra.mrb[6].mxu0 %vm384_vm1, %v11522_v13 }
 0x105   : > { %9642 = vmatprep.mubr.msk.f32.mxu0 %vm384_vm1, %v11524_v14 }
 0x108   : > { %9643 = vmatmul.mubr.msk.f32.gmra.mrb[8].mxu0 %vm384_vm1, %v11530_v15 }
 0x109   : > { %9645 = vmatprep.mubr.msk.f32.mxu0 %vm384_vm1, %v11532_v16 }
 0x10c   : > { %9646 = vmatmul.mubr.msk.f32.gmra.mrb[10].mxu0 %vm384_vm1, %v11538_v17 }
 0x10d   : > { %9648 = vmatprep.mubr.msk.f32.mxu0 %vm384_vm1, %v11540_v18 }
 0x110   : > { %9649 = vmatmul.mubr.msk.f32.gmra.mrb[12].mxu0 %vm384_vm1, %v11546_v19 }
 0x111   : > { %9651 = vmatprep.mubr.msk.f32.mxu0 %vm384_vm1, %v11548_v20 }
 0x114   : > { %9652 = vmatmul.mubr.msk.f32.gmra.mrb[14].mxu0 %vm384_vm1, %v11554_v21 }
 0x115   : > { %9654 = vmatprep.mubr.msk.f32.mxu0 %vm384_vm1, %v11556_v22 }
 0x118   : > { %9655 = vmatmul.mubr.msk.f32.gmra.mrb[16].mxu0 %vm384_vm1, %v11562_v23 }
 0x119   : > { %9657 = vmatprep.mubr.msk.f32.mxu0 %vm384_vm1, %v11564_v24 }
 0x11c   : > { %9658 = vmatmul.mubr.msk.f32.gmra.mrb[18].mxu0 %vm384_vm1, %v11570_v25 }
 0x11d   : > { %9660 = vmatprep.mubr.msk.f32.mxu0 %vm384_vm1, %v11572_v26 }
 0x120   : > { %9661 = vmatmul.mubr.msk.f32.gmra.mrb[20].mxu0 %vm384_vm1, %v11578_v27 }
 0x121   : > { %9663 = vmatprep.mubr.msk.f32.mxu0 %vm384_vm1, %v11580_v31 }
 0x124   : > { %9664 = vmatmul.mubr.msk.f32.gmra.mrb[22].mxu0 %vm384_vm1, %v11586_v32 }
 0x125   : > { %9666 = vmatprep.mubr.msk.f32.mxu0 %vm384_vm1, %v11588_v37 }
 0x128   : > { %9667 = vmatmul.mubr.msk.f32.gmra.mrb[24].mxu0 %vm384_vm1, %v11594_v38 }
 0x129   : > { %9669 = vmatprep.mubr.msk.f32.mxu0 %vm384_vm1, %v11596_v39 }
 0x12c   : > { %9670 = vmatmul.mubr.msk.f32.gmra.mrb[26].mxu0 %vm384_vm1, %v11606_v42 }
 0x12d   : > { %9672 = vmatprep.mubr.msk.f32.mxu0 %vm384_vm1, %v11608_v3 }
 0x130   : > { %9673 = vmatmul.mubr.msk.f32.gmra.mrb[28].mxu0 %vm384_vm1, %v11614_v4 }
 0x131   : > { %9675 = vmatprep.mubr.msk.f32.mxu0 %vm384_vm1, %v11813_v2 }
 0x134   : > { %9676 = vmatmul.mubr.msk.f32.gmra.mrb[30].mxu0 %vm384_vm1, %v11819_v5 }
 0x135   : > { %9680 = vmatprep.mubr.msk.f32.mxu0 %vm384_vm1, %v11344_v28  ;;  %v13468_v28 = vld [vmem:[#allocation8_spill] sm:$0xff] }
 0x138   : > { %9681 = vmatmul.mubr.msk.f32.vlgmr.msra.gmra.mrb[0].mxu0 %vm384_vm1, %v11346_v29  ;;  %v13469_v29 = vld [vmem:[#allocation9_spill] sm:$0xff] }
 0x139   : > { %9729 = vmatpush3.msk.msra.mxu0 %vm725_vm0, %v8422_v63  ;;  %9683 = vmatprep.mubr.msk.f32.mxu0 %vm384_vm1, %v11348_v30  ;;  %v11886_v30 = vld [vmem:[#allocation2 + $0x181] sm:$0xff]  ;;  %v8490_v63 = vld [vmem:[%s13307_s1 + $0x1c] sm:$0xf] }
 0x13a   : > { %9778 = vmatprep.subr.msk.mxu0 %vm725_vm0, %v8456_v8  ;;  %13470 = vst [vmem:[#allocation37_spill] sm:$0xff] %v11886_v30 }
 0x13c   : > { %9684 = vmatmul.mubr.msk.f32.gmra.mrb[2].mxu0 %vm384_vm1, %v11363_v33  ;;  %v13471_v33 = vld [vmem:[#allocation10_spill] sm:$0xff] }
 0x13d   : > { %9686 = vmatprep.mubr.msk.f32.mxu0 %vm384_vm1, %v11365_v34  ;;  %v11892_v34 = vld [vmem:[#allocation2 + $0x189] sm:$0xff] }
 0x13e   : > { %13472 = vst [vmem:[#allocation38_spill] sm:$0xff] %v11892_v34 }
 0x140   : > { %9687 = vmatmul.mubr.msk.f32.gmra.mrb[4].mxu0 %vm384_vm1, %v11371_v35  ;;  %v13473_v35 = vld [vmem:[#allocation11_spill] sm:$0xff] }
 0x141   : > { %9689 = vmatprep.mubr.msk.f32.mxu0 %vm384_vm1, %v11373_v36 }
 0x144   : > { %9690 = vmatmul.mubr.msk.f32.gmra.mrb[6].mxu0 %vm384_vm1, %v11389_v43 }
 0x145   : > { %9692 = vmatprep.mubr.msk.f32.mxu0 %vm384_vm1, %v11393_v44 }
 0x148   : > { %9693 = vmatmul.mubr.msk.f32.gmra.mrb[8].mxu0 %vm384_vm1, %v11399_v45 }
 0x149   : > { %9695 = vmatprep.mubr.msk.f32.mxu0 %vm384_vm1, %v11401_v46 }
 0x14c   : > { %9696 = vmatmul.mubr.msk.f32.gmra.mrb[10].mxu0 %vm384_vm1, %v11407_v47 }
 0x14d   : > { %9698 = vmatprep.mubr.msk.f32.mxu0 %vm384_vm1, %v11409_v48 }
 0x150   : > { %9699 = vmatmul.mubr.msk.f32.gmra.mrb[12].mxu0 %vm384_vm1, %v11415_v49 }
 0x151   : > { %9701 = vmatprep.mubr.msk.f32.mxu0 %vm384_vm1, %v11417_v50 }
 0x154   : > { %9702 = vmatmul.mubr.msk.f32.gmra.mrb[14].mxu0 %vm384_vm1, %v11423_v51 }
 0x155   : > { %9704 = vmatprep.mubr.msk.f32.mxu0 %vm384_vm1, %v11425_v52 }
 0x158   : > { %9705 = vmatmul.mubr.msk.f32.gmra.mrb[16].mxu0 %vm384_vm1, %v11431_v53 }
 0x159   : > { %9707 = vmatprep.mubr.msk.f32.mxu0 %vm384_vm1, %v11433_v54 }
 0x15c   : > { %9708 = vmatmul.mubr.msk.f32.gmra.mrb[18].mxu0 %vm384_vm1, %v11439_v55 }
 0x15d   : > { %9710 = vmatprep.mubr.msk.f32.mxu0 %vm384_vm1, %v11441_v56 }
 0x160   : > { %9711 = vmatmul.mubr.msk.f32.gmra.mrb[20].mxu0 %vm384_vm1, %v11447_v57 }
 0x161   : > { %9713 = vmatprep.mubr.msk.f32.mxu0 %vm384_vm1, %v11449_v58 }
 0x164   : > { %9714 = vmatmul.mubr.msk.f32.gmra.mrb[22].mxu0 %vm384_vm1, %v11455_v59 }
 0x165   : > { %9716 = vmatprep.mubr.msk.f32.mxu0 %vm384_vm1, %v11457_v60 }
 0x168   : > { %9717 = vmatmul.mubr.msk.f32.gmra.mrb[24].mxu0 %vm384_vm1, %v11463_v61 }
 0x169   : > { %9719 = vmatprep.mubr.msk.f32.mxu0 %vm384_vm1, %v11465_v62  ;;  %v13483_v62 = vld [vmem:[#allocation21_spill] sm:$0xff] }
 0x16c   : > { %9720 = vmatmul.mubr.msk.f32.gmra.mrb[26].mxu0 %vm384_vm1, %v13468_v28  ;;  %v13479_v28 = vld [vmem:[#allocation17_spill] sm:$0xff] }
 0x16d   : > { %9722 = vmatprep.mubr.msk.f32.mxu0 %vm384_vm1, %v13469_v29  ;;  %v13474_v29 = vld [vmem:[#allocation12_spill] sm:$0xff] }
 0x170   : > { %9723 = vmatmul.mubr.msk.f32.gmra.mrb[28].mxu0 %vm384_vm1, %v13471_v33  ;;  %v13475_v33 = vld [vmem:[#allocation13_spill] sm:$0xff] }
 0x171   : > { %9725 = vmatprep.mubr.msk.f32.mxu0 %vm384_vm1, %v11886_v30  ;;  %v13476_v30 = vld [vmem:[#allocation14_spill] sm:$0xff] }
 0x174   : > { %9726 = vmatmul.mubr.msk.f32.gmra.mrb[30].mxu0 %vm384_vm1, %v11892_v34  ;;  %v13477_v34 = vld [vmem:[#allocation15_spill] sm:$0xff] }
 0x175   : > { %9730 = vmatprep.mubr.msk.f32.mxu0 %vm384_vm1, %v13473_v35  ;;  %v13478_v35 = vld [vmem:[#allocation16_spill] sm:$0xff] }
 0x178   : > { %9731 = vmatmul.mubr.msk.f32.vlgmr.msra.gmra.mrb[0].mxu0 %vm384_vm1, %v13474_v29  ;;  %v13480_v29 = vld [vmem:[#allocation18_spill] sm:$0xff] }
 0x179   : > { %9779 = vmatpush3.msk.msra.mxu0 %vm725_vm0, %v8456_v8  ;;  %9733 = vmatprep.mubr.msk.f32.mxu0 %vm384_vm1, %v13475_v33  ;;  %v13481_v8 = vld [vmem:[#allocation19_spill] sm:$0xff]  ;;  %v13482_v33 = vld [vmem:[#allocation20_spill] sm:$0xff] }
 0x17a   : > { %9828 = vmatprep.subr.msk.mxu0 %vm725_vm0, %v8490_v63 }
 0x17c   : > { %9734 = vmatmul.mubr.msk.f32.gmra.mrb[2].mxu0 %vm384_vm1, %v13476_v30  ;;  %v13484_v30 = vld [vmem:[#allocation22_spill] sm:$0xff] }
 0x17d   : > { %9736 = vmatprep.mubr.msk.f32.mxu0 %vm384_vm1, %v13477_v34  ;;  %v13485_v34 = vld [vmem:[#allocation23_spill] sm:$0xff] }
 0x180   : > { %9737 = vmatmul.mubr.msk.f32.gmra.mrb[4].mxu0 %vm384_vm1, %v13478_v35  ;;  %v13486_v35 = vld [vmem:[#allocation24_spill] sm:$0xff] }
 0x181   : > { %9739 = vmatprep.mubr.msk.f32.mxu0 %vm384_vm1, %v13479_v28  ;;  %v13487_v28 = vld [vmem:[#allocation25_spill] sm:$0xff] }
 0x184   : > { %9740 = vmatmul.mubr.msk.f32.gmra.mrb[6].mxu0 %vm384_vm1, %v13480_v29  ;;  %v13488_v29 = vld [vmem:[#allocation26_spill] sm:$0xff] }
 0x185   : > { %9742 = vmatprep.mubr.msk.f32.mxu0 %vm384_vm1, %v13481_v8  ;;  %v13489_v8 = vld [vmem:[#allocation27_spill] sm:$0xff] }
 0x188   : > { %9743 = vmatmul.mubr.msk.f32.gmra.mrb[8].mxu0 %vm384_vm1, %v13482_v33  ;;  %v13490_v33 = vld [vmem:[#allocation28_spill] sm:$0xff] }
 0x189   : > { %9745 = vmatprep.mubr.msk.f32.mxu0 %vm384_vm1, %v13483_v62  ;;  %v13491_v62 = vld [vmem:[#allocation29_spill] sm:$0xff] }
 0x18c   : > { %9746 = vmatmul.mubr.msk.f32.gmra.mrb[10].mxu0 %vm384_vm1, %v13484_v30  ;;  %v13492_v30 = vld [vmem:[#allocation30_spill] sm:$0xff] }
 0x18d   : > { %9748 = vmatprep.mubr.msk.f32.mxu0 %vm384_vm1, %v13485_v34  ;;  %v13493_v34 = vld [vmem:[#allocation31_spill] sm:$0xff] }
 0x190   : > { %9749 = vmatmul.mubr.msk.f32.gmra.mrb[12].mxu0 %vm384_vm1, %v13486_v35  ;;  %v13494_v35 = vld [vmem:[#allocation32_spill] sm:$0xff] }
 0x191   : > { %9751 = vmatprep.mubr.msk.f32.mxu0 %vm384_vm1, %v13487_v28  ;;  %v13495_v28 = vld [vmem:[#allocation33_spill] sm:$0xff] }
 0x194   : > { %9752 = vmatmul.mubr.msk.f32.gmra.mrb[14].mxu0 %vm384_vm1, %v13488_v29 }
 0x195   : > { %9754 = vmatprep.mubr.msk.f32.mxu0 %vm384_vm1, %v13489_v8  ;;  %v13496_v8 = vld [vmem:[#allocation34_spill] sm:$0xff] }
 0x198   : > { %9755 = vmatmul.mubr.msk.f32.gmra.mrb[16].mxu0 %vm384_vm1, %v13490_v33 }
 0x199   : > { %9757 = vmatprep.mubr.msk.f32.mxu0 %vm384_vm1, %v13491_v62  ;;  %v13497_v62 = vld [vmem:[#allocation35_spill] sm:$0xff] }
 0x19c   : > { %9758 = vmatmul.mubr.msk.f32.gmra.mrb[18].mxu0 %vm384_vm1, %v13492_v30 }
 0x19d   : > { %9760 = vmatprep.mubr.msk.f32.mxu0 %vm384_vm1, %v13493_v34 }
 0x1a0   : > { %9761 = vmatmul.mubr.msk.f32.gmra.mrb[20].mxu0 %vm384_vm1, %v13494_v35  ;;  %v11959_v35 = vld [vmem:[#allocation2 + $0x182] sm:$0xff] }
 0x1a1   : > { %9763 = vmatprep.mubr.msk.f32.mxu0 %vm384_vm1, %v13495_v28 }
 0x1a4   : > { %9764 = vmatmul.mubr.msk.f32.gmra.mrb[22].mxu0 %vm384_vm1, %v11721_v1 }
 0x1a5   : > { %9766 = vmatprep.mubr.msk.f32.mxu0 %vm384_vm1, %v13496_v8  ;;  %v11965_v8 = vld [vmem:[#allocation2 + $0x18a] sm:$0xff] }
 0x1a8   : > { %9767 = vmatmul.mubr.msk.f32.gmra.mrb[24].mxu0 %vm384_vm1, %v11729_v0 }
 0x1a9   : > { %9769 = vmatprep.mubr.msk.f32.mxu0 %vm384_vm1, %v13497_v62 }
 0x1ac   : > { %9770 = vmatmul.mubr.msk.f32.gmra.mrb[26].mxu0 %vm384_vm1, %v11737_v40 }
 0x1ad   : > { %9772 = vmatprep.mubr.msk.f32.mxu0 %vm384_vm1, %v11739_v41  ;;  %v11974_v41 = vld [vmem:[%s13307_s1 + $0x20] sm:$0xf] }
 0x1b0   : > { %9773 = vmatmul.mubr.msk.f32.gmra.mrb[28].mxu0 %vm384_vm1, %v11745_v7 }
 0x1b1   : > { %9775 = vmatprep.mubr.msk.f32.mxu0 %vm384_vm1, %v11959_v35 }
 0x1b4   : > { %9776 = vmatmul.mubr.msk.f32.gmra.mrb[30].mxu0 %vm384_vm1, %v11965_v8 }
 0x1b5   : > { %9780 = vmatprep.mubr.msk.f32.mxu0 %vm384_vm1, %v11498_v9  ;;  %v2869_v9 = vld [vmem:[#allocation2 + $0x198] sm:$0xff] }
 0x1b8   : > { %9781 = vmatmul.mubr.msk.f32.vlgmr.msra.gmra.mrb[0].mxu0 %vm384_vm1, %v11506_v10  ;;  %v2870_v10 = vld [vmem:[#allocation2 + $0x1a0] sm:$0xff] }
 0x1b9   : > { %9829 = vmatpush3.msk.msra.mxu0 %vm725_vm0, %v8490_v63  ;;  %9783 = vmatprep.mubr.msk.f32.mxu0 %vm384_vm1, %v11508_v11  ;;  %v3229_v11 = vld [vmem:[#allocation2 + $0x31] sm:$0xff] }
 0x1ba   : > { %9878 = vmatprep.subr.msk.mxu0 %vm725_vm0, %v11974_v41 }
 0x1bc   : > { %9784 = vmatmul.mubr.msk.f32.gmra.mrb[2].mxu0 %vm384_vm1, %v11514_v6  ;;  %v3230_v6 = vld [vmem:[#allocation2 + $0x39] sm:$0xff] }
 0x1bd   : > { %9786 = vmatprep.mubr.msk.f32.mxu0 %vm384_vm1, %v11516_v12  ;;  %v13498_v12 = vmov 0.0  }
 0x1be   : > { %446 = vst.msk [vmem:[#allocation3 + $0x20] sm:$0xff] %vm440_vm3, %v13498_v12  ;;  %441 = vst.msk [vmem:[#allocation3] sm:$0xff] %vm440_vm3, %v13498_v12 }
 0x1bf   : > { %447 = vst.msk [vmem:[#allocation3 + $0x28] sm:$0x3] %vm443_vm4, %v13498_v12  ;;  %444 = vst.msk [vmem:[#allocation3 + $0x10] sm:$0x3] %vm443_vm4, %v13498_v12 }
 0x1c0   : > { %9787 = vmatmul.mubr.msk.f32.gmra.mrb[4].mxu0 %vm384_vm1, %v11522_v13  ;;  %442 = vst.msk [vmem:[#allocation3 + $0x8] sm:$0xff] %vm440_vm3, %v13498_v12  ;;  %445 = vst.msk [vmem:[#allocation3 + $0x18] sm:$0xff] %vm440_vm3, %v13498_v12  ;;  %v3231_v13 = vld [vmem:[#allocation2 + $0x49] sm:$0xff] }
 0x1c1   : > { %9789 = vmatprep.mubr.msk.f32.mxu0 %vm384_vm1, %v11524_v14  ;;  %448 = vst.msk [vmem:[#allocation3 + $0x30] sm:$0xff] %vm440_vm3, %v13498_v12  ;;  %449 = vst.msk [vmem:[#allocation3 + $0x38] sm:$0xff] %vm440_vm3, %v13498_v12  ;;  %v3232_v14 = vld [vmem:[#allocation2 + $0x51] sm:$0xff] }
 0x1c2   : > { %450 = vst.msk [vmem:[#allocation3 + $0x40] sm:$0x3] %vm443_vm4, %v13498_v12  ;;  %453 = vst.msk [vmem:[#allocation3 + $0x58] sm:$0x3] %vm443_vm4, %v13498_v12 }
 0x1c3   : > { %451 = vst.msk [vmem:[#allocation3 + $0x48] sm:$0xff] %vm440_vm3, %v13498_v12  ;;  %452 = vst.msk [vmem:[#allocation3 + $0x50] sm:$0xff] %vm440_vm3, %v13498_v12 }
 0x1c4   : > { %9790 = vmatmul.mubr.msk.f32.gmra.mrb[6].mxu0 %vm384_vm1, %v11530_v15  ;;  %454 = vst.msk [vmem:[#allocation3 + $0x60] sm:$0xff] %vm440_vm3, %v13498_v12  ;;  %455 = vst.msk [vmem:[#allocation3 + $0x68] sm:$0xff] %vm440_vm3, %v13498_v12  ;;  %v13517_v15 = vld [vmem:[#allocation25_spill] sm:$0xff] }
 0x1c5   : > { %9792 = vmatprep.mubr.msk.f32.mxu0 %vm384_vm1, %v11532_v16  ;;  %456 = vst.msk [vmem:[#allocation3 + $0x70] sm:$0x3] %vm443_vm4, %v13498_v12  ;;  %459 = vst.msk [vmem:[#allocation3 + $0x88] sm:$0x3] %vm443_vm4, %v13498_v12  ;;  %v13518_v16 = vld [vmem:[#allocation27_spill] sm:$0xff] }
 0x1c6   : > { %457 = vst.msk [vmem:[#allocation3 + $0x78] sm:$0xff] %vm440_vm3, %v13498_v12  ;;  %458 = vst.msk [vmem:[#allocation3 + $0x80] sm:$0xff] %vm440_vm3, %v13498_v12 }
 0x1c7   : > { %460 = vst.msk [vmem:[#allocation3 + $0x90] sm:$0xff] %vm440_vm3, %v13498_v12  ;;  %461 = vst.msk [vmem:[#allocation3 + $0x98] sm:$0xff] %vm440_vm3, %v13498_v12 }
 0x1c8   : > { %9793 = vmatmul.mubr.msk.f32.gmra.mrb[8].mxu0 %vm384_vm1, %v11538_v17  ;;  %462 = vst.msk [vmem:[#allocation3 + $0xa0] sm:$0x3] %vm443_vm4, %v13498_v12  ;;  %465 = vst.msk [vmem:[#allocation3 + $0xb8] sm:$0x3] %vm443_vm4, %v13498_v12  ;;  %v13519_v17 = vld [vmem:[#allocation29_spill] sm:$0xff] }
 0x1c9   : > { %9795 = vmatprep.mubr.msk.f32.mxu0 %vm384_vm1, %v11540_v18  ;;  %463 = vst.msk [vmem:[#allocation3 + $0xa8] sm:$0xff] %vm440_vm3, %v13498_v12  ;;  %464 = vst.msk [vmem:[#allocation3 + $0xb0] sm:$0xff] %vm440_vm3, %v13498_v12  ;;  %v13520_v18 = vld [vmem:[#allocation32_spill] sm:$0xff] }
 0x1ca   : > { %466 = vst.msk [vmem:[#allocation3 + $0xc0] sm:$0xff] %vm440_vm3, %v13498_v12  ;;  %467 = vst.msk [vmem:[#allocation3 + $0xc8] sm:$0xff] %vm440_vm3, %v13498_v12 }
 0x1cb   : > { %468 = vst.msk [vmem:[#allocation3 + $0xd0] sm:$0x3] %vm443_vm4, %v13498_v12  ;;  %471 = vst.msk [vmem:[#allocation3 + $0xe8] sm:$0x3] %vm443_vm4, %v13498_v12 }
 0x1cc   : > { %9796 = vmatmul.mubr.msk.f32.gmra.mrb[10].mxu0 %vm384_vm1, %v11546_v19  ;;  %469 = vst.msk [vmem:[#allocation3 + $0xd8] sm:$0xff] %vm440_vm3, %v13498_v12  ;;  %470 = vst.msk [vmem:[#allocation3 + $0xe0] sm:$0xff] %vm440_vm3, %v13498_v12  ;;  %v13521_v19 = vld [vmem:[#allocation34_spill] sm:$0xff] }
 0x1cd   : > { %9798 = vmatprep.mubr.msk.f32.mxu0 %vm384_vm1, %v11548_v20  ;;  %472 = vst.msk [vmem:[#allocation3 + $0xf0] sm:$0xff] %vm440_vm3, %v13498_v12  ;;  %473 = vst.msk [vmem:[#allocation3 + $0xf8] sm:$0xff] %vm440_vm3, %v13498_v12  ;;  %v13522_v20 = vld [vmem:[#allocation36_spill] sm:$0xff] }
 0x1ce   : > { %474 = vst.msk [vmem:[#allocation3 + $0x100] sm:$0x3] %vm443_vm4, %v13498_v12  ;;  %477 = vst.msk [vmem:[#allocation3 + $0x118] sm:$0x3] %vm443_vm4, %v13498_v12 }
 0x1cf   : > { %475 = vst.msk [vmem:[#allocation3 + $0x108] sm:$0xff] %vm440_vm3, %v13498_v12  ;;  %476 = vst.msk [vmem:[#allocation3 + $0x110] sm:$0xff] %vm440_vm3, %v13498_v12 }
 0x1d0   : > { %9799 = vmatmul.mubr.msk.f32.gmra.mrb[12].mxu0 %vm384_vm1, %v11554_v21  ;;  %478 = vst.msk [vmem:[#allocation3 + $0x120] sm:$0xff] %vm440_vm3, %v13498_v12  ;;  %479 = vst.msk [vmem:[#allocation3 + $0x128] sm:$0xff] %vm440_vm3, %v13498_v12  ;;  %v4210_v21 = vld [vmem:[#allocation3 + $0x1] sm:$0xff] }
 0x1d1   : > { %9801 = vmatprep.mubr.msk.f32.mxu0 %vm384_vm1, %v11556_v22  ;;  %480 = vst.msk [vmem:[#allocation3 + $0x130] sm:$0x3] %vm443_vm4, %v13498_v12  ;;  %483 = vst.msk [vmem:[#allocation3 + $0x148] sm:$0x3] %vm443_vm4, %v13498_v12  ;;  %9930 = vmatprep.mubr.msk.f32.mxu1 %vm440_vm3, %v4210_v21  ;;  %v4211_v22 = vld [vmem:[#allocation3 + $0x9] sm:$0xff] }
 0x1d2   : > { %481 = vst.msk [vmem:[#allocation3 + $0x138] sm:$0xff] %vm440_vm3, %v13498_v12  ;;  %482 = vst.msk [vmem:[#allocation3 + $0x140] sm:$0xff] %vm440_vm3, %v13498_v12 }
 0x1d3   : > { %484 = vst.msk [vmem:[#allocation3 + $0x150] sm:$0xff] %vm440_vm3, %v13498_v12  ;;  %485 = vst.msk [vmem:[#allocation3 + $0x158] sm:$0xff] %vm440_vm3, %v13498_v12 }
 0x1d4   : > { %9802 = vmatmul.mubr.msk.f32.gmra.mrb[14].mxu0 %vm384_vm1, %v11562_v23  ;;  %486 = vst.msk [vmem:[#allocation3 + $0x160] sm:$0x3] %vm443_vm4, %v13498_v12  ;;  %489 = vst.msk [vmem:[#allocation3 + $0x178] sm:$0x3] %vm443_vm4, %v13498_v12  ;;  %v4209_v23 = vld [vmem:[%s13309_s3] sm:$0xff] }
 0x1d5   : > { %9804 = vmatprep.mubr.msk.f32.mxu0 %vm384_vm1, %v11564_v24  ;;  %487 = vst.msk [vmem:[#allocation3 + $0x168] sm:$0xff] %vm440_vm3, %v13498_v12  ;;  %488 = vst.msk [vmem:[#allocation3 + $0x170] sm:$0xff] %vm440_vm3, %v13498_v12  ;;  %v12281_v24 = vld [vmem:[%s13309_s3 + $0x10] sm:$0xff] }
 0x1d6   : > { %490 = vst.msk [vmem:[#allocation3 + $0x180] sm:$0xff] %vm440_vm3, %v13498_v12  ;;  %491 = vst.msk [vmem:[#allocation3 + $0x188] sm:$0xff] %vm440_vm3, %v13498_v12 }
 0x1d7   : > { %492 = vst.msk [vmem:[#allocation3 + $0x190] sm:$0x3] %vm443_vm4, %v13498_v12  ;;  %495 = vst.msk [vmem:[#allocation3 + $0x1a8] sm:$0x3] %vm443_vm4, %v13498_v12 }
 0x1d8   : > { %9805 = vmatmul.mubr.msk.f32.gmra.mrb[16].mxu0 %vm384_vm1, %v11570_v25  ;;  %493 = vst.msk [vmem:[#allocation3 + $0x198] sm:$0xff] %vm440_vm3, %v13498_v12  ;;  %494 = vst.msk [vmem:[#allocation3 + $0x1a0] sm:$0xff] %vm440_vm3, %v13498_v12  ;;  %v12287_v25 = vld [vmem:[%s13308_s2] ss:$0 sm:$0xff] }
 0x1d9   : > { %9807 = vmatprep.mubr.msk.f32.mxu0 %vm384_vm1, %v11572_v26 }
 0x1dc   : > { %9808 = vmatmul.mubr.msk.f32.gmra.mrb[18].mxu0 %vm384_vm1, %v11578_v27 }
 0x1dd   : > { %9810 = vmatprep.mubr.msk.f32.mxu0 %vm384_vm1, %v11580_v31 }
 0x1e0   : > { %9811 = vmatmul.mubr.msk.f32.gmra.mrb[20].mxu0 %vm384_vm1, %v11586_v32 }
 0x1e1   : > { %9813 = vmatprep.mubr.msk.f32.mxu0 %vm384_vm1, %v11588_v37 }
 0x1e4   : > { %9814 = vmatmul.mubr.msk.f32.gmra.mrb[22].mxu0 %vm384_vm1, %v11594_v38 }
 0x1e5   : > { %9816 = vmatprep.mubr.msk.f32.mxu0 %vm384_vm1, %v11596_v39 }
 0x1e8   : > { %9817 = vmatmul.mubr.msk.f32.gmra.mrb[24].mxu0 %vm384_vm1, %v11606_v42 }
 0x1e9   : > { %9819 = vmatprep.mubr.msk.f32.mxu0 %vm384_vm1, %v11608_v3 }
 0x1ec   : > { %9820 = vmatmul.mubr.msk.f32.gmra.mrb[26].mxu0 %vm384_vm1, %v11614_v4 }
 0x1ed   : > { %9822 = vmatprep.mubr.msk.f32.mxu0 %vm384_vm1, %v11813_v2 }
 0x1f0   : > { %9823 = vmatmul.mubr.msk.f32.gmra.mrb[28].mxu0 %vm384_vm1, %v11819_v5 }
 0x1f1   : > { %9825 = vmatprep.mubr.msk.f32.mxu0 %vm384_vm1, %v2869_v9 }
 0x1f4   : > { %9826 = vmatmul.mubr.msk.f32.gmra.mrb[30].mxu0 %vm384_vm1, %v2870_v10 }
 0x1f5   : > { %9830 = vmatprep.mubr.msk.f32.mxu0 %vm384_vm1, %v3229_v11 }
 0x1f8   : > { %9831 = vmatmul.mubr.msk.f32.vlgmr.msra.gmra.mrb[0].mxu0 %vm384_vm1, %v3230_v6 }
 0x1f9   : > { %9879 = vmatpush3.msk.msra.mxu0 %vm725_vm0, %v11974_v41  ;;  %9833 = vmatprep.mubr.msk.f32.mxu0 %vm384_vm1, %v3231_v13 }
 0x1fa   : > { %10378 = vmatprep.subr.mxu0 %v13498_v12  ;;  %v12606_v12 = vld [vmem:[%s13309_s3 + $0x20] sm:$0xff] }
 0x1fc   : > { %9834 = vmatmul.mubr.msk.f32.gmra.mrb[2].mxu0 %vm384_vm1, %v3232_v14 }
 0x1fd   : > { %9836 = vmatprep.mubr.msk.f32.mxu0 %vm384_vm1, %v11373_v36  ;;  %v13499_v36 = vld [vmem:[#allocation7_spill] sm:$0xff] }
 0x200   : > { %9837 = vmatmul.mubr.msk.f32.gmra.mrb[4].mxu0 %vm384_vm1, %v11389_v43  ;;  %v13500_v43 = vld [vmem:[#allocation8_spill] sm:$0xff] }
 0x201   : > { %9839 = vmatprep.mubr.msk.f32.mxu0 %vm384_vm1, %v11393_v44  ;;  %v13501_v44 = vld [vmem:[#allocation9_spill] sm:$0xff] }
 0x204   : > { %9840 = vmatmul.mubr.msk.f32.gmra.mrb[6].mxu0 %vm384_vm1, %v11399_v45  ;;  %v13502_v45 = vld [vmem:[#allocation10_spill] sm:$0xff] }
 0x205   : > { %9842 = vmatprep.mubr.msk.f32.mxu0 %vm384_vm1, %v11401_v46  ;;  %v13503_v46 = vld [vmem:[#allocation37_spill] sm:$0xff] }
 0x208   : > { %9843 = vmatmul.mubr.msk.f32.gmra.mrb[8].mxu0 %vm384_vm1, %v11407_v47  ;;  %v3259_v47 = vld [vmem:[#allocation2 + $0x199] sm:$0xff] }
 0x209   : > { %9845 = vmatprep.mubr.msk.f32.mxu0 %vm384_vm1, %v11409_v48  ;;  %v13504_v48 = vld [vmem:[#allocation38_spill] sm:$0xff] }
 0x20c   : > { %9846 = vmatmul.mubr.msk.f32.gmra.mrb[10].mxu0 %vm384_vm1, %v11415_v49  ;;  %v3260_v49 = vld [vmem:[#allocation2 + $0x1a1] sm:$0xff] }
 0x20d   : > { %9848 = vmatprep.mubr.msk.f32.mxu0 %vm384_vm1, %v11417_v50  ;;  %v13505_v50 = vld [vmem:[#allocation13_spill] sm:$0xff] }
 0x210   : > { %9849 = vmatmul.mubr.msk.f32.gmra.mrb[12].mxu0 %vm384_vm1, %v11423_v51  ;;  %v13506_v51 = vld [vmem:[#allocation14_spill] sm:$0xff] }
 0x211   : > { %9851 = vmatprep.mubr.msk.f32.mxu0 %vm384_vm1, %v11425_v52  ;;  %v13507_v52 = vld [vmem:[#allocation15_spill] sm:$0xff] }
 0x214   : > { %9852 = vmatmul.mubr.msk.f32.gmra.mrb[14].mxu0 %vm384_vm1, %v11431_v53  ;;  %v13508_v53 = vld [vmem:[#allocation16_spill] sm:$0xff] }
 0x215   : > { %9854 = vmatprep.mubr.msk.f32.mxu0 %vm384_vm1, %v11433_v54  ;;  %v13509_v54 = vld [vmem:[#allocation17_spill] sm:$0xff] }
 0x218   : > { %9855 = vmatmul.mubr.msk.f32.gmra.mrb[16].mxu0 %vm384_vm1, %v11439_v55  ;;  %v13510_v55 = vld [vmem:[#allocation18_spill] sm:$0xff] }
 0x219   : > { %9857 = vmatprep.mubr.msk.f32.mxu0 %vm384_vm1, %v11441_v56  ;;  %v13511_v56 = vld [vmem:[#allocation19_spill] sm:$0xff] }
 0x21c   : > { %9858 = vmatmul.mubr.msk.f32.gmra.mrb[18].mxu0 %vm384_vm1, %v11447_v57  ;;  %v13512_v57 = vld [vmem:[#allocation20_spill] sm:$0xff] }
 0x21d   : > { %9860 = vmatprep.mubr.msk.f32.mxu0 %vm384_vm1, %v11449_v58  ;;  %v13513_v58 = vld [vmem:[#allocation21_spill] sm:$0xff] }
 0x220   : > { %9861 = vmatmul.mubr.msk.f32.gmra.mrb[20].mxu0 %vm384_vm1, %v11455_v59  ;;  %v13514_v59 = vld [vmem:[#allocation22_spill] sm:$0xff] }
 0x221   : > { %9863 = vmatprep.mubr.msk.f32.mxu0 %vm384_vm1, %v11457_v60  ;;  %v13515_v60 = vld [vmem:[#allocation23_spill] sm:$0xff] }
 0x224   : > { %9864 = vmatmul.mubr.msk.f32.gmra.mrb[22].mxu0 %vm384_vm1, %v11463_v61  ;;  %v13516_v61 = vld [vmem:[#allocation24_spill] sm:$0xff] }
 0x225   : > { %9866 = vmatprep.mubr.msk.f32.mxu0 %vm384_vm1, %v13499_v36 }
 0x228   : > { %9867 = vmatmul.mubr.msk.f32.gmra.mrb[24].mxu0 %vm384_vm1, %v13500_v43 }
 0x229   : > { %9869 = vmatprep.mubr.msk.f32.mxu0 %vm384_vm1, %v13501_v44 }
 0x22c   : > { %9870 = vmatmul.mubr.msk.f32.gmra.mrb[26].mxu0 %vm384_vm1, %v13502_v45 }
 0x22d   : > { %9872 = vmatprep.mubr.msk.f32.mxu0 %vm384_vm1, %v13503_v46 }
 0x230   : > { %9873 = vmatmul.mubr.msk.f32.gmra.mrb[28].mxu0 %vm384_vm1, %v13504_v48 }
 0x231   : > { %9875 = vmatprep.mubr.msk.f32.mxu0 %vm384_vm1, %v3259_v47 }
 0x234   : > { %9876 = vmatmul.mubr.msk.f32.gmra.mrb[30].mxu0 %vm384_vm1, %v3260_v49 }
 0x235   : > { %9880 = vmatprep.mubr.msk.f32.mxu0 %vm384_vm1, %v13505_v50 }
 0x238   : > { %9881 = vmatmul.mubr.msk.f32.vlgmr.msra.gmra.mrb[0].mxu0 %vm384_vm1, %v13506_v51 }
 0x239   : > { %9883 = vmatprep.mubr.msk.f32.mxu0 %vm384_vm1, %v13507_v52 }
 0x23c   : > { %9884 = vmatmul.mubr.msk.f32.gmra.mrb[2].mxu0 %vm384_vm1, %v13508_v53 }
 0x23d   : > { %9886 = vmatprep.mubr.msk.f32.mxu0 %vm384_vm1, %v13509_v54 }
 0x240   : > { %9887 = vmatmul.mubr.msk.f32.gmra.mrb[4].mxu0 %vm384_vm1, %v13510_v55 }
 0x241   : > { %9889 = vmatprep.mubr.msk.f32.mxu0 %vm384_vm1, %v13511_v56 }
 0x244   : > { %9890 = vmatmul.mubr.msk.f32.gmra.mrb[6].mxu0 %vm384_vm1, %v13512_v57 }
 0x245   : > { %9892 = vmatprep.mubr.msk.f32.mxu0 %vm384_vm1, %v13513_v58 }
 0x248   : > { %9893 = vmatmul.mubr.msk.f32.gmra.mrb[8].mxu0 %vm384_vm1, %v13514_v59 }
 0x249   : > { %9895 = vmatprep.mubr.msk.f32.mxu0 %vm384_vm1, %v13515_v60 }
 0x24c   : > { %9896 = vmatmul.mubr.msk.f32.gmra.mrb[10].mxu0 %vm384_vm1, %v13516_v61 }
 0x24d   : > { %9898 = vmatprep.mubr.msk.f32.mxu0 %vm384_vm1, %v13517_v15 }
 0x250   : > { %9899 = vmatmul.mubr.msk.f32.gmra.mrb[12].mxu0 %vm384_vm1, %v13488_v29 }
 0x251   : > { %9901 = vmatprep.mubr.msk.f32.mxu0 %vm384_vm1, %v13518_v16 }
 0x254   : > { %9902 = vmatmul.mubr.msk.f32.gmra.mrb[14].mxu0 %vm384_vm1, %v13490_v33 }
 0x255   : > { %9904 = vmatprep.mubr.msk.f32.mxu0 %vm384_vm1, %v13519_v17 }
 0x258   : > { %9905 = vmatmul.mubr.msk.f32.gmra.mrb[16].mxu0 %vm384_vm1, %v13492_v30 }
 0x259   : > { %9907 = vmatprep.mubr.msk.f32.mxu0 %vm384_vm1, %v13493_v34 }
 0x25c   : > { %9908 = vmatmul.mubr.msk.f32.gmra.mrb[18].mxu0 %vm384_vm1, %v13520_v18 }
 0x25d   : > { %9910 = vmatprep.mubr.msk.f32.mxu0 %vm384_vm1, %v13495_v28 }
 0x260   : > { %9911 = vmatmul.mubr.msk.f32.gmra.mrb[20].mxu0 %vm384_vm1, %v11721_v1  ;;  %v3649_v1 = vld [vmem:[#allocation2 + $0x19a] sm:$0xff] }
 0x261   : > { %9913 = vmatprep.mubr.msk.f32.mxu0 %vm384_vm1, %v13521_v19 }
 0x264   : > { %9914 = vmatmul.mubr.msk.f32.gmra.mrb[22].mxu0 %vm384_vm1, %v11729_v0  ;;  %v3650_v0 = vld [vmem:[#allocation2 + $0x1a2] sm:$0xff] }
 0x265   : > { %9916 = vmatprep.mubr.msk.f32.mxu0 %vm384_vm1, %v13497_v62  ;;  %v8559_v62 = vld [vmem:[%s13309_s3 + $0x8] sm:$0xff] }
 0x266   : > { %9928 = vmatprep.subr.mxu1 %v8559_v62 }
 0x267   : > { %9929 = vmatpush3.msra.mxu1 %v8559_v62 }
 0x268   : > { %9917 = vmatmul.mubr.msk.f32.gmra.mrb[24].mxu0 %vm384_vm1, %v11737_v40  ;;  %9931 = vmatmul.mubr.msk.f32.vlgmr.msra.gmra.mrb[0].mxu1 %vm440_vm3, %v4211_v22 }
 0x269   : > { %9919 = vmatprep.mubr.msk.f32.mxu0 %vm384_vm1, %v13522_v20  ;;  %9978 = vmatprep.subr.mxu1 %v4209_v23 }
 0x26a   : > { %9979 = vmatpush3.msra.mxu1 %v4209_v23 }
 0x26b   : > { %10028 = vmatprep.subr.mxu1 %v12281_v24 }
 0x26c   : > { %9920 = vmatmul.mubr.msk.f32.gmra.mrb[26].mxu0 %vm384_vm1, %v11745_v7 }
 0x26d   : > { %9922 = vmatprep.mubr.msk.f32.mxu0 %vm384_vm1, %v11959_v35 }
 0x270   : > { %9923 = vmatmul.mubr.msk.f32.gmra.mrb[28].mxu0 %vm384_vm1, %v11965_v8 }
 0x271   : > { %9925 = vmatprep.mubr.msk.f32.mxu0 %vm384_vm1, %v3649_v1 }
 0x274   : > { %9926 = vmatmul.mubr.msk.f32.gmra.mrb[30].mxu0 %vm384_vm1, %v3650_v0 }
 0x30b   : > { %v9882_v26 = vpop.f32.mrb[0].mxu0 }
 0x30c   : > { %v4017_v27 = vadd.f32 %v9882_v26, %v12287_v25  ;;  %v3818_v31 = vpop.f32.mrb[1].mxu0 }
 0x30d   : > { %v4016_v32 = vadd.f32 %v12287_v25, %v3818_v31 }
 0x30e   : > { %vm4049_vm5 = vcmp.ge.f32.partialorder %v4017_v27, 0.0  ;;  %v4081_v37 = vmul.f32 0.01, %v4017_v27 }
 0x30f   : > { %vm4048_vm6 = vcmp.ge.f32.partialorder %v4016_v32, 0.0  ;;  %v4080_v38 = vmul.f32 0.01, %v4016_v32  ;;  %v9885_v39 = vpop.f32.mrb[2].mxu0 }
 0x310   : > { %v4113_v42 = vsel %vm4049_vm5, %v4017_v27, %v4081_v37  ;;  %v4019_v3 = vadd.f32 %v9885_v39, %v12287_v25  ;;  %v3828_v4 = vpop.f32.mrb[3].mxu0 }
 0x311   : > { %4146 = vst.msk [vmem:[#allocation3 + $0x21] sm:$0xff] %vm440_vm3, %v4113_v42  ;;  %v4112_v40 = vsel %vm4048_vm6, %v4016_v32, %v4080_v38  ;;  %v4018_v41 = vadd.f32 %v12287_v25, %v3828_v4 }
 0x312   : > { %4145 = vst.msk [vmem:[#allocation3 + $0x19] sm:$0xff] %vm440_vm3, %v4112_v40  ;;  %vm4051_vm7 = vcmp.ge.f32.partialorder %v4019_v3, 0.0  ;;  %v4083_v7 = vmul.f32 0.01, %v4019_v3 }
 0x313   : > { %vm4050_vm8 = vcmp.ge.f32.partialorder %v4018_v41, 0.0  ;;  %v4082_v2 = vmul.f32 0.01, %v4018_v41  ;;  %v9888_v5 = vpop.f32.mrb[4].mxu0 }
 0x314   : > { %v4115_v28 = vsel %vm4051_vm7, %v4019_v3, %v4083_v7  ;;  %v4021_v30 = vadd.f32 %v9888_v5, %v12287_v25  ;;  %v3838_v33 = vpop.f32.mrb[5].mxu0 }
 0x315   : > { %4148 = vst.msk [vmem:[#allocation3 + $0x39] sm:$0xff] %vm440_vm3, %v4115_v28  ;;  %v4114_v34 = vsel %vm4050_vm8, %v4018_v41, %v4082_v2  ;;  %v4020_v63 = vadd.f32 %v12287_v25, %v3838_v33 }
 0x316   : > { %4147 = vst.msk [vmem:[#allocation3 + $0x31] sm:$0xff] %vm440_vm3, %v4114_v34  ;;  %vm4053_vm9 = vcmp.ge.f32.partialorder %v4021_v30, 0.0  ;;  %v4085_v35 = vmul.f32 0.01, %v4021_v30 }
 0x317   : > { %vm4052_vm10 = vcmp.ge.f32.partialorder %v4020_v63, 0.0  ;;  %v4084_v29 = vmul.f32 0.01, %v4020_v63  ;;  %v9891_v8 = vpop.f32.mrb[6].mxu0 }
 0x318   : > { %v4117_v9 = vsel %vm4053_vm9, %v4021_v30, %v4085_v35  ;;  %v4023_v10 = vadd.f32 %v9891_v8, %v12287_v25  ;;  %v3848_v11 = vpop.f32.mrb[7].mxu0  ;;  %v12307_v43 = vld [vmem:[#allocation3 + $0x21] sm:$0xff] }
 0x319   : > { %4150 = vst.msk [vmem:[#allocation3 + $0x51] sm:$0xff] %vm440_vm3, %v4117_v9  ;;  %v4116_v6 = vsel %vm4052_vm10, %v4020_v63, %v4084_v29  ;;  %v4022_v13 = vadd.f32 %v12287_v25, %v3848_v11  ;;  %v12302_v14 = vld [vmem:[#allocation3 + $0x19] sm:$0xff] }
 0x31a   : > { %4149 = vst.msk [vmem:[#allocation3 + $0x49] sm:$0xff] %vm440_vm3, %v4116_v6  ;;  %vm4055_vm11 = vcmp.ge.f32.partialorder %v4023_v10, 0.0  ;;  %v4087_v36 = vmul.f32 0.01, %v4023_v10  ;;  %9933 = vmatprep.mubr.msk.f32.mxu1 %vm440_vm3, %v12302_v14 }
 0x31b   : > { %vm4054_vm12 = vcmp.ge.f32.partialorder %v4022_v13, 0.0  ;;  %v4086_v44 = vmul.f32 0.01, %v4022_v13  ;;  %v9894_v45 = vpop.f32.mrb[8].mxu0  ;;  %9934 = vmatmul.mubr.msk.f32.gmra.mrb[2].mxu1 %vm440_vm3, %v12307_v43 }
 0x31c   : > { %v4119_v46 = vsel %vm4055_vm11, %v4023_v10, %v4087_v36  ;;  %v4025_v47 = vadd.f32 %v9894_v45, %v12287_v25  ;;  %v3858_v48 = vpop.f32.mrb[9].mxu0  ;;  %v12319_v53 = vld [vmem:[#allocation3 + $0x39] sm:$0xff] }
 0x31d   : > { %4152 = vst.msk [vmem:[#allocation3 + $0x69] sm:$0xff] %vm440_vm3, %v4119_v46  ;;  %v4118_v49 = vsel %vm4054_vm12, %v4022_v13, %v4086_v44  ;;  %v4024_v50 = vadd.f32 %v12287_v25, %v3858_v48  ;;  %v12314_v51 = vld [vmem:[#allocation3 + $0x31] sm:$0xff] }
 0x31e   : > { %4151 = vst.msk [vmem:[#allocation3 + $0x61] sm:$0xff] %vm440_vm3, %v4118_v49  ;;  %vm4057_vm13 = vcmp.ge.f32.partialorder %v4025_v47, 0.0  ;;  %v4089_v52 = vmul.f32 0.01, %v4025_v47  ;;  %9936 = vmatprep.mubr.msk.f32.mxu1 %vm440_vm3, %v12314_v51 }
 0x31f   : > { %vm4056_vm14 = vcmp.ge.f32.partialorder %v4024_v50, 0.0  ;;  %v4088_v54 = vmul.f32 0.01, %v4024_v50  ;;  %v9897_v55 = vpop.f32.mrb[10].mxu0  ;;  %9937 = vmatmul.mubr.msk.f32.gmra.mrb[4].mxu1 %vm440_vm3, %v12319_v53 }
 0x320   : > { %v4121_v56 = vsel %vm4057_vm13, %v4025_v47, %v4089_v52  ;;  %v4027_v57 = vadd.f32 %v9897_v55, %v12287_v25  ;;  %v3868_v58 = vpop.f32.mrb[11].mxu0  ;;  %v12331_v16 = vld [vmem:[#allocation3 + $0x51] sm:$0xff] }
 0x321   : > { %4154 = vst.msk [vmem:[#allocation3 + $0x81] sm:$0xff] %vm440_vm3, %v4121_v56  ;;  %v4120_v59 = vsel %vm4056_vm14, %v4024_v50, %v4088_v54  ;;  %v4026_v60 = vadd.f32 %v12287_v25, %v3868_v58  ;;  %v12326_v61 = vld [vmem:[#allocation3 + $0x49] sm:$0xff] }
 0x322   : > { %4153 = vst.msk [vmem:[#allocation3 + $0x79] sm:$0xff] %vm440_vm3, %v4120_v59  ;;  %vm4059_vm15 = vcmp.ge.f32.partialorder %v4027_v57, 0.0  ;;  %v4091_v15 = vmul.f32 0.01, %v4027_v57  ;;  %9939 = vmatprep.mubr.msk.f32.mxu1 %vm440_vm3, %v12326_v61 }
 0x323   : > { %vm4058_vm0 = vcmp.ge.f32.partialorder %v4026_v60, 0.0  ;;  %v4090_v17 = vmul.f32 0.01, %v4026_v60  ;;  %v9900_v18 = vpop.f32.mrb[12].mxu0  ;;  %9940 = vmatmul.mubr.msk.f32.gmra.mrb[6].mxu1 %vm440_vm3, %v12331_v16 }
 0x324   : > { %v4123_v19 = vsel %vm4059_vm15, %v4027_v57, %v4091_v15  ;;  %v4029_v20 = vadd.f32 %v9900_v18, %v12287_v25  ;;  %v3878_v1 = vpop.f32.mrb[13].mxu0  ;;  %v12343_v23 = vld [vmem:[#allocation3 + $0x69] sm:$0xff] }
 0x325   : > { %4156 = vst.msk [vmem:[#allocation3 + $0x99] sm:$0xff] %vm440_vm3, %v4123_v19  ;;  %v4122_v0 = vsel %vm4058_vm0, %v4026_v60, %v4090_v17  ;;  %v4028_v62 = vadd.f32 %v12287_v25, %v3878_v1  ;;  %v12338_v21 = vld [vmem:[#allocation3 + $0x61] sm:$0xff] }
 0x326   : > { %4155 = vst.msk [vmem:[#allocation3 + $0x91] sm:$0xff] %vm440_vm3, %v4122_v0  ;;  %vm4061_vm1 = vcmp.ge.f32.partialorder %v4029_v20, 0.0  ;;  %v4093_v22 = vmul.f32 0.01, %v4029_v20  ;;  %9942 = vmatprep.mubr.msk.f32.mxu1 %vm440_vm3, %v12338_v21 }
 0x327   : > { %vm4060_vm2 = vcmp.ge.f32.partialorder %v4028_v62, 0.0  ;;  %v4092_v26 = vmul.f32 0.01, %v4028_v62  ;;  %v9903_v27 = vpop.f32.mrb[14].mxu0  ;;  %9943 = vmatmul.mubr.msk.f32.gmra.mrb[8].mxu1 %vm440_vm3, %v12343_v23 }
 0x328   : > { %v4125_v31 = vsel %vm4061_vm1, %v4029_v20, %v4093_v22  ;;  %v4031_v32 = vadd.f32 %v9903_v27, %v12287_v25  ;;  %v3888_v37 = vpop.f32.mrb[15].mxu0  ;;  %v12355_v4 = vld [vmem:[#allocation3 + $0x81] sm:$0xff] }
 0x329   : > { %4158 = vst.msk [vmem:[#allocation3 + $0xb1] sm:$0xff] %vm440_vm3, %v4125_v31  ;;  %v4124_v38 = vsel %vm4060_vm2, %v4028_v62, %v4092_v26  ;;  %v4030_v39 = vadd.f32 %v12287_v25, %v3888_v37  ;;  %v12350_v42 = vld [vmem:[#allocation3 + $0x79] sm:$0xff] }
 0x32a   : > { %4157 = vst.msk [vmem:[#allocation3 + $0xa9] sm:$0xff] %vm440_vm3, %v4124_v38  ;;  %vm4063_vm4 = vcmp.ge.f32.partialorder %v4031_v32, 0.0  ;;  %v4095_v3 = vmul.f32 0.01, %v4031_v32  ;;  %9945 = vmatprep.mubr.msk.f32.mxu1 %vm440_vm3, %v12350_v42 }
 0x32b   : > { %vm4062_vm5 = vcmp.ge.f32.partialorder %v4030_v39, 0.0  ;;  %v4094_v40 = vmul.f32 0.01, %v4030_v39  ;;  %v9906_v41 = vpop.f32.mrb[16].mxu0  ;;  %9946 = vmatmul.mubr.msk.f32.gmra.mrb[10].mxu1 %vm440_vm3, %v12355_v4 }
 0x32c   : > { %v4127_v7 = vsel %vm4063_vm4, %v4031_v32, %v4095_v3  ;;  %v4033_v2 = vadd.f32 %v9906_v41, %v12287_v25  ;;  %v3898_v5 = vpop.f32.mrb[17].mxu0  ;;  %v12367_v63 = vld [vmem:[#allocation3 + $0x99] sm:$0xff] }
 0x32d   : > { %4160 = vst.msk [vmem:[#allocation3 + $0xc9] sm:$0xff] %vm440_vm3, %v4127_v7  ;;  %v4126_v28 = vsel %vm4062_vm5, %v4030_v39, %v4094_v40  ;;  %v4032_v30 = vadd.f32 %v12287_v25, %v3898_v5  ;;  %v12362_v33 = vld [vmem:[#allocation3 + $0x91] sm:$0xff] }
 0x32e   : > { %4159 = vst.msk [vmem:[#allocation3 + $0xc1] sm:$0xff] %vm440_vm3, %v4126_v28  ;;  %vm4065_vm6 = vcmp.ge.f32.partialorder %v4033_v2, 0.0  ;;  %v4097_v34 = vmul.f32 0.01, %v4033_v2  ;;  %9948 = vmatprep.mubr.msk.f32.mxu1 %vm440_vm3, %v12362_v33 }
 0x32f   : > { %vm4064_vm7 = vcmp.ge.f32.partialorder %v4032_v30, 0.0  ;;  %v4096_v35 = vmul.f32 0.01, %v4032_v30  ;;  %v9909_v29 = vpop.f32.mrb[18].mxu0  ;;  %9949 = vmatmul.mubr.msk.f32.gmra.mrb[12].mxu1 %vm440_vm3, %v12367_v63 }
 0x330   : > { %v4129_v8 = vsel %vm4065_vm6, %v4033_v2, %v4097_v34  ;;  %v4035_v9 = vadd.f32 %v9909_v29, %v12287_v25  ;;  %v3908_v10 = vpop.f32.mrb[19].mxu0  ;;  %v12379_v44 = vld [vmem:[#allocation3 + $0xb1] sm:$0xff] }
 0x331   : > { %4162 = vst.msk [vmem:[#allocation3 + $0xe1] sm:$0xff] %vm440_vm3, %v4129_v8  ;;  %v4128_v11 = vsel %vm4064_vm7, %v4032_v30, %v4096_v35  ;;  %v4034_v6 = vadd.f32 %v12287_v25, %v3908_v10  ;;  %v12374_v13 = vld [vmem:[#allocation3 + $0xa9] sm:$0xff]  ;;  %vm11058_vm7 = vmmov 0  }
 0x332   : > { %4161 = vst.msk [vmem:[#allocation3 + $0xd9] sm:$0xff] %vm440_vm3, %v4128_v11  ;;  %vm4067_vm8 = vcmp.ge.f32.partialorder %v4035_v9, 0.0  ;;  %v4099_v36 = vmul.f32 0.01, %v4035_v9  ;;  %9951 = vmatprep.mubr.msk.f32.mxu1 %vm440_vm3, %v12374_v13 }
 0x333   : > { %vm4066_vm9 = vcmp.ge.f32.partialorder %v4034_v6, 0.0  ;;  %v4098_v45 = vmul.f32 0.01, %v4034_v6  ;;  %v9912_v46 = vpop.f32.mrb[20].mxu0  ;;  %9952 = vmatmul.mubr.msk.f32.gmra.mrb[14].mxu1 %vm440_vm3, %v12379_v44 }
 0x334   : > { %v4131_v47 = vsel %vm4067_vm8, %v4035_v9, %v4099_v36  ;;  %v4037_v48 = vadd.f32 %v9912_v46, %v12287_v25  ;;  %v3918_v49 = vpop.f32.mrb[21].mxu0  ;;  %v12391_v56 = vld [vmem:[#allocation3 + $0xc9] sm:$0xff]  ;;  %vm8024_vm8 = vcmask 261120  }
 0x335   : > { %4164 = vst.msk [vmem:[#allocation3 + $0xf9] sm:$0xff] %vm440_vm3, %v4131_v47  ;;  %v4130_v50 = vsel %vm4066_vm9, %v4034_v6, %v4098_v45  ;;  %v4036_v52 = vadd.f32 %v12287_v25, %v3918_v49  ;;  %v12386_v54 = vld [vmem:[#allocation3 + $0xc1] sm:$0xff] }
 0x336   : > { %4163 = vst.msk [vmem:[#allocation3 + $0xf1] sm:$0xff] %vm440_vm3, %v4130_v50  ;;  %vm4069_vm10 = vcmp.ge.f32.partialorder %v4037_v48, 0.0  ;;  %v4101_v55 = vmul.f32 0.01, %v4037_v48  ;;  %9954 = vmatprep.mubr.msk.f32.mxu1 %vm440_vm3, %v12386_v54 }
 0x337   : > { %vm4068_vm11 = vcmp.ge.f32.partialorder %v4036_v52, 0.0  ;;  %v4100_v57 = vmul.f32 0.01, %v4036_v52  ;;  %v9915_v58 = vpop.f32.mrb[22].mxu0  ;;  %9955 = vmatmul.mubr.msk.f32.gmra.mrb[16].mxu1 %vm440_vm3, %v12391_v56 }
 0x338   : > { %v4133_v59 = vsel %vm4069_vm10, %v4037_v48, %v4101_v55  ;;  %v4039_v60 = vadd.f32 %v9915_v58, %v12287_v25  ;;  %v3928_v15 = vpop.f32.mrb[23].mxu0  ;;  %v12403_v1 = vld [vmem:[#allocation3 + $0xe1] sm:$0xff] }
 0x339   : > { %4166 = vst.msk [vmem:[#allocation3 + $0x111] sm:$0xff] %vm440_vm3, %v4133_v59  ;;  %v4132_v17 = vsel %vm4068_vm11, %v4036_v52, %v4100_v57  ;;  %v4038_v18 = vadd.f32 %v12287_v25, %v3928_v15  ;;  %v12398_v19 = vld [vmem:[#allocation3 + $0xd9] sm:$0xff] }
 0x33a   : > { %4165 = vst.msk [vmem:[#allocation3 + $0x109] sm:$0xff] %vm440_vm3, %v4132_v17  ;;  %vm4071_vm12 = vcmp.ge.f32.partialorder %v4039_v60, 0.0  ;;  %v4103_v20 = vmul.f32 0.01, %v4039_v60  ;;  %9957 = vmatprep.mubr.msk.f32.mxu1 %vm440_vm3, %v12398_v19 }
 0x33b   : > { %vm4070_vm13 = vcmp.ge.f32.partialorder %v4038_v18, 0.0  ;;  %v4102_v0 = vmul.f32 0.01, %v4038_v18  ;;  %v9918_v62 = vpop.f32.mrb[24].mxu0  ;;  %9958 = vmatmul.mubr.msk.f32.gmra.mrb[18].mxu1 %vm440_vm3, %v12403_v1 }
 0x33c   : > { %v4135_v22 = vsel %vm4071_vm12, %v4039_v60, %v4103_v20  ;;  %v4041_v26 = vadd.f32 %v9918_v62, %v12287_v25  ;;  %v3938_v27 = vpop.f32.mrb[25].mxu0  ;;  %v12415_v39 = vld [vmem:[#allocation3 + $0xf9] sm:$0xff] }
 0x33d   : > { %4168 = vst.msk [vmem:[#allocation3 + $0x129] sm:$0xff] %vm440_vm3, %v4135_v22  ;;  %v4134_v31 = vsel %vm4070_vm13, %v4038_v18, %v4102_v0  ;;  %v4040_v32 = vadd.f32 %v12287_v25, %v3938_v27  ;;  %v12410_v37 = vld [vmem:[#allocation3 + $0xf1] sm:$0xff]  ;;  %v4177_v22 = vld [vmem:[#allocation3] sm:$0xff]  ;;  %v4178_v27 = vld [vmem:[#allocation3 + $0x8] sm:$0xff] }
 0x33e   : > { %4167 = vst.msk [vmem:[#allocation3 + $0x121] sm:$0xff] %vm440_vm3, %v4134_v31  ;;  %vm4073_vm14 = vcmp.ge.f32.partialorder %v4041_v26, 0.0  ;;  %v4105_v38 = vmul.f32 0.01, %v4041_v26  ;;  %9960 = vmatprep.mubr.msk.f32.mxu1 %vm440_vm3, %v12410_v37  ;;  %v12477_v31 = vld [vmem:[%s13309_s3 + $0x18] sm:$0xff] }
 0x33f   : > { %vm4072_vm15 = vcmp.ge.f32.partialorder %v4040_v32, 0.0  ;;  %v4104_v3 = vmul.f32 0.01, %v4040_v32  ;;  %v9921_v40 = vpop.f32.mrb[26].mxu0  ;;  %9961 = vmatmul.mubr.msk.f32.gmra.mrb[20].mxu1 %vm440_vm3, %v12415_v39 }
 0x340   : > { %v4137_v41 = vsel %vm4073_vm14, %v4041_v26, %v4105_v38  ;;  %v4043_v7 = vadd.f32 %v9921_v40, %v12287_v25  ;;  %v3948_v2 = vpop.f32.mrb[27].mxu0  ;;  %v12427_v35 = vld [vmem:[#allocation3 + $0x111] sm:$0xff]  ;;  %v12486_v38 = vld [vmem:[#allocation3 + $0x20] sm:$0xff] }
 0x341   : > { %4170 = vst.msk [vmem:[#allocation3 + $0x141] sm:$0xff] %vm440_vm3, %v4137_v41  ;;  %v4136_v5 = vsel %vm4072_vm15, %v4040_v32, %v4104_v3  ;;  %v4042_v28 = vadd.f32 %v12287_v25, %v3948_v2  ;;  %v12422_v30 = vld [vmem:[#allocation3 + $0x109] sm:$0xff]  ;;  %v12480_v32 = vld [vmem:[#allocation3 + $0x18] sm:$0xff] }
 0x342   : > { %4169 = vst.msk [vmem:[#allocation3 + $0x139] sm:$0xff] %vm440_vm3, %v4136_v5  ;;  %vm4075_vm0 = vcmp.ge.f32.partialorder %v4043_v7, 0.0  ;;  %v4107_v34 = vmul.f32 0.01, %v4043_v7  ;;  %9963 = vmatprep.mubr.msk.f32.mxu1 %vm440_vm3, %v12422_v30  ;;  %v12490_v3 = vld [vmem:[#allocation3 + $0x30] sm:$0xff]  ;;  %v12494_v40 = vld [vmem:[#allocation3 + $0x38] sm:$0xff] }
 0x343   : > { %vm4074_vm1 = vcmp.ge.f32.partialorder %v4042_v28, 0.0  ;;  %v4106_v29 = vmul.f32 0.01, %v4042_v28  ;;  %v9924_v8 = vpop.f32.mrb[28].mxu0  ;;  %9964 = vmatmul.mubr.msk.f32.gmra.mrb[22].mxu1 %vm440_vm3, %v12427_v35  ;;  %v12502_v41 = vld [vmem:[#allocation3 + $0x50] sm:$0xff]  ;;  %v12510_v2 = vld [vmem:[#allocation3 + $0x68] sm:$0xff] }
 0x344   : > { %v4139_v9 = vsel %vm4075_vm0, %v4043_v7, %v4107_v34  ;;  %v4045_v10 = vadd.f32 %v9924_v8, %v12287_v25  ;;  %v3958_v11 = vpop.f32.mrb[29].mxu0  ;;  %v12439_v47 = vld [vmem:[#allocation3 + $0x129] sm:$0xff]  ;;  %v12506_v7 = vld [vmem:[#allocation3 + $0x60] sm:$0xff]  ;;  %v12514_v5 = vld [vmem:[#allocation3 + $0x78] sm:$0xff] }
 0x345   : > { %4172 = vst.msk [vmem:[#allocation3 + $0x159] sm:$0xff] %vm440_vm3, %v4139_v9  ;;  %v4138_v6 = vsel %vm4074_vm1, %v4042_v28, %v4106_v29  ;;  %v4044_v36 = vadd.f32 %v12287_v25, %v3958_v11  ;;  %v12434_v45 = vld [vmem:[#allocation3 + $0x121] sm:$0xff]  ;;  %v12522_v34 = vld [vmem:[#allocation3 + $0x90] sm:$0xff]  ;;  %v12526_v29 = vld [vmem:[#allocation3 + $0x98] sm:$0xff] }
 0x346   : > { %4171 = vst.msk [vmem:[#allocation3 + $0x151] sm:$0xff] %vm440_vm3, %v4138_v6  ;;  %vm4077_vm2 = vcmp.ge.f32.partialorder %v4045_v10, 0.0  ;;  %v4109_v46 = vmul.f32 0.01, %v4045_v10  ;;  %9966 = vmatprep.mubr.msk.f32.mxu1 %vm440_vm3, %v12434_v45  ;;  %v12518_v28 = vld [vmem:[#allocation3 + $0x80] sm:$0xff]  ;;  %v12530_v8 = vld [vmem:[#allocation3 + $0xa8] sm:$0xff] }
 0x347   : > { %vm4076_vm4 = vcmp.ge.f32.partialorder %v4044_v36, 0.0  ;;  %v4108_v48 = vmul.f32 0.01, %v4044_v36  ;;  %v9927_v49 = vpop.f32.mrb[30].mxu0  ;;  %9967 = vmatmul.mubr.msk.f32.gmra.mrb[24].mxu1 %vm440_vm3, %v12439_v47  ;;  %v12534_v9 = vld [vmem:[#allocation3 + $0xb0] sm:$0xff]  ;;  %v12542_v11 = vld [vmem:[#allocation3 + $0xc8] sm:$0xff] }
 0x348   : > { %v4141_v50 = vsel %vm4077_vm2, %v4045_v10, %v4109_v46  ;;  %v4047_v52 = vadd.f32 %v9927_v49, %v12287_v25  ;;  %v3968_v55 = vpop.f32.mrb[31].mxu0  ;;  %v12451_v15 = vld [vmem:[#allocation3 + $0x141] sm:$0xff]  ;;  %v12546_v6 = vld [vmem:[#allocation3 + $0xd8] sm:$0xff]  ;;  %v12554_v46 = vld [vmem:[#allocation3 + $0xf0] sm:$0xff] }
 0x349   : > { %4174 = vst.msk [vmem:[#allocation3 + $0x171] sm:$0xff] %vm440_vm3, %v4141_v50  ;;  %v4140_v57 = vsel %vm4076_vm4, %v4044_v36, %v4108_v48  ;;  %v4046_v58 = vadd.f32 %v12287_v25, %v3968_v55  ;;  %v12446_v59 = vld [vmem:[#allocation3 + $0x139] sm:$0xff]  ;;  %v12562_v49 = vld [vmem:[#allocation3 + $0x108] sm:$0xff]  ;;  %v12566_v50 = vld [vmem:[#allocation3 + $0x110] sm:$0xff] }
 0x34a   : > { %4173 = vst.msk [vmem:[#allocation3 + $0x169] sm:$0xff] %vm440_vm3, %v4140_v57  ;;  %vm4079_vm5 = vcmp.ge.f32.partialorder %v4047_v52, 0.0  ;;  %v4111_v60 = vmul.f32 0.01, %v4047_v52  ;;  %9969 = vmatprep.mubr.msk.f32.mxu1 %vm440_vm3, %v12446_v59  ;;  %v12538_v10 = vld [vmem:[#allocation3 + $0xc0] sm:$0xff]  ;;  %v12558_v48 = vld [vmem:[#allocation3 + $0xf8] sm:$0xff] }
 0x34b   : > { %vm4078_vm6 = vcmp.ge.f32.partialorder %v4046_v58, 0.0  ;;  %v4110_v17 = vmul.f32 0.01, %v4046_v58  ;;  %9970 = vmatmul.mubr.msk.f32.gmra.mrb[26].mxu1 %vm440_vm3, %v12451_v15  ;;  %v12550_v36 = vld [vmem:[#allocation3 + $0xe0] sm:$0xff]  ;;  %v12574_v55 = vld [vmem:[#allocation3 + $0x128] sm:$0xff]  ;;  %v12578_v57 = vld [vmem:[#allocation3 + $0x138] sm:$0xff] }
 0x34c   : > { %v4143_v18 = vsel %vm4079_vm5, %v4047_v52, %v4111_v60  ;;  %v12461_v0 = vld [vmem:[#allocation3 + $0x159] sm:$0xff] }
 0x34d   : > { %4176 = vst.msk [vmem:[#allocation3 + $0x189] sm:$0xff] %vm440_vm3, %v4143_v18  ;;  %v4142_v25 = vsel %vm4078_vm6, %v4046_v58, %v4110_v17  ;;  %v12456_v20 = vld [vmem:[#allocation3 + $0x151] sm:$0xff]  ;;  %v12570_v52 = vld [vmem:[#allocation3 + $0x120] sm:$0xff] }
 0x34e   : > { %4175 = vst.msk [vmem:[#allocation3 + $0x181] sm:$0xff] %vm440_vm3, %v4142_v25  ;;  %9972 = vmatprep.mubr.msk.f32.mxu1 %vm440_vm3, %v12456_v20  ;;  %v12582_v58 = vld [vmem:[#allocation3 + $0x140] sm:$0xff]  ;;  %v12586_v60 = vld [vmem:[#allocation3 + $0x150] sm:$0xff]  ;;  %v12590_v17 = vld [vmem:[#allocation3 + $0x158] sm:$0xff] }
 0x34f   : > { %9973 = vmatmul.mubr.msk.f32.gmra.mrb[28].mxu1 %vm440_vm3, %v12461_v0  ;;  %v4886_v25 = vld [vmem:[#allocation3 + $0x2] sm:$0xff] }
 0x350   : > { %v12469_v26 = vld [vmem:[#allocation3 + $0x171] sm:$0xff] }
 0x351   : > { %v12465_v62 = vld [vmem:[#allocation3 + $0x169] sm:$0xff]  ;;  %13524 = vst [vmem:[#allocation12_spill] sm:$0xff] %v12469_v26 }
 0x352   : > { %13523 = vst [vmem:[#allocation11_spill] sm:$0xff] %v12465_v62  ;;  %9975 = vmatprep.mubr.msk.f32.mxu1 %vm440_vm3, %v12465_v62  ;;  %v12594_v18 = vld [vmem:[#allocation3 + $0x168] sm:$0xff] }
 0x353   : > { %9976 = vmatmul.mubr.msk.f32.gmra.mrb[30].mxu1 %vm440_vm3, %v12469_v26  ;;  %v12609_v26 = vld [vmem:[#allocation3 + $0x1a] sm:$0xff]  ;;  %v12615_v62 = vld [vmem:[#allocation3 + $0x22] sm:$0xff] }
 0x354   : > { %9980 = vmatprep.mubr.msk.f32.mxu1 %vm440_vm3, %v4177_v22  ;;  %v12598_v22 = vld [vmem:[#allocation3 + $0x170] sm:$0xff]  ;;  %13525 = vst [vmem:[#allocation26_spill] sm:$0xff] %v12609_v26  ;;  %13526 = vst [vmem:[#allocation28_spill] sm:$0xff] %v12615_v62 }
 0x357   : > { %9981 = vmatmul.mubr.msk.f32.vlgmr.msra.gmra.mrb[0].mxu1 %vm440_vm3, %v4178_v27  ;;  %v4887_v27 = vld [vmem:[#allocation3 + $0xa] sm:$0xff] }
 0x358   : > { %10029 = vmatpush3.msra.mxu1 %v12281_v24  ;;  %9983 = vmatprep.mubr.msk.f32.mxu1 %vm440_vm3, %v12480_v32  ;;  %v12498_v24 = vld [vmem:[#allocation3 + $0x48] sm:$0xff] }
 0x359   : > { %10078 = vmatprep.subr.mxu1 %v12477_v31 }
 0x35b   : > { %9984 = vmatmul.mubr.msk.f32.gmra.mrb[2].mxu1 %vm440_vm3, %v12486_v38 }
 0x35c   : > { %9986 = vmatprep.mubr.msk.f32.mxu1 %vm440_vm3, %v12490_v3 }
 0x35f   : > { %9987 = vmatmul.mubr.msk.f32.gmra.mrb[4].mxu1 %vm440_vm3, %v12494_v40 }
 0x360   : > { %9989 = vmatprep.mubr.msk.f32.mxu1 %vm440_vm3, %v12498_v24 }
 0x363   : > { %9990 = vmatmul.mubr.msk.f32.gmra.mrb[6].mxu1 %vm440_vm3, %v12502_v41 }
 0x364   : > { %9992 = vmatprep.mubr.msk.f32.mxu1 %vm440_vm3, %v12506_v7 }
 0x367   : > { %9993 = vmatmul.mubr.msk.f32.gmra.mrb[8].mxu1 %vm440_vm3, %v12510_v2 }
 0x368   : > { %9995 = vmatprep.mubr.msk.f32.mxu1 %vm440_vm3, %v12514_v5 }
 0x36b   : > { %9996 = vmatmul.mubr.msk.f32.gmra.mrb[10].mxu1 %vm440_vm3, %v12518_v28 }
 0x36c   : > { %9998 = vmatprep.mubr.msk.f32.mxu1 %vm440_vm3, %v12522_v34 }
 0x36f   : > { %9999 = vmatmul.mubr.msk.f32.gmra.mrb[12].mxu1 %vm440_vm3, %v12526_v29 }
 0x370   : > { %10001 = vmatprep.mubr.msk.f32.mxu1 %vm440_vm3, %v12530_v8 }
 0x373   : > { %10002 = vmatmul.mubr.msk.f32.gmra.mrb[14].mxu1 %vm440_vm3, %v12534_v9 }
 0x374   : > { %10004 = vmatprep.mubr.msk.f32.mxu1 %vm440_vm3, %v12538_v10 }
 0x377   : > { %10005 = vmatmul.mubr.msk.f32.gmra.mrb[16].mxu1 %vm440_vm3, %v12542_v11 }
 0x378   : > { %10007 = vmatprep.mubr.msk.f32.mxu1 %vm440_vm3, %v12546_v6 }
 0x37b   : > { %10008 = vmatmul.mubr.msk.f32.gmra.mrb[18].mxu1 %vm440_vm3, %v12550_v36 }
 0x37c   : > { %10010 = vmatprep.mubr.msk.f32.mxu1 %vm440_vm3, %v12554_v46 }
 0x37f   : > { %10011 = vmatmul.mubr.msk.f32.gmra.mrb[20].mxu1 %vm440_vm3, %v12558_v48 }
 0x380   : > { %10013 = vmatprep.mubr.msk.f32.mxu1 %vm440_vm3, %v12562_v49 }
 0x383   : > { %10014 = vmatmul.mubr.msk.f32.gmra.mrb[22].mxu1 %vm440_vm3, %v12566_v50 }
 0x384   : > { %10016 = vmatprep.mubr.msk.f32.mxu1 %vm440_vm3, %v12570_v52 }
 0x387   : > { %10017 = vmatmul.mubr.msk.f32.gmra.mrb[24].mxu1 %vm440_vm3, %v12574_v55 }
 0x388   : > { %10019 = vmatprep.mubr.msk.f32.mxu1 %vm440_vm3, %v12578_v57 }
 0x38b   : > { %10020 = vmatmul.mubr.msk.f32.gmra.mrb[26].mxu1 %vm440_vm3, %v12582_v58 }
 0x38c   : > { %10022 = vmatprep.mubr.msk.f32.mxu1 %vm440_vm3, %v12586_v60 }
 0x38f   : > { %10023 = vmatmul.mubr.msk.f32.gmra.mrb[28].mxu1 %vm440_vm3, %v12590_v17 }
 0x390   : > { %10025 = vmatprep.mubr.msk.f32.mxu1 %vm440_vm3, %v12594_v18 }
 0x393   : > { %10026 = vmatmul.mubr.msk.f32.gmra.mrb[30].mxu1 %vm440_vm3, %v12598_v22 }
 0x394   : > { %10030 = vmatprep.mubr.msk.f32.mxu1 %vm440_vm3, %v4886_v25  ;;  %v12619_v25 = vld [vmem:[#allocation3 + $0x32] sm:$0xff] }
 0x395   : > { %13527 = vst [vmem:[#allocation30_spill] sm:$0xff] %v12619_v25 }
 0x397   : > { %10031 = vmatmul.mubr.msk.f32.vlgmr.msra.gmra.mrb[0].mxu1 %vm440_vm3, %v4887_v27  ;;  %v12623_v27 = vld [vmem:[#allocation3 + $0x3a] sm:$0xff] }
 0x398   : > { %10079 = vmatpush3.msra.mxu1 %v12477_v31  ;;  %10033 = vmatprep.mubr.msk.f32.mxu1 %vm440_vm3, %v12609_v26  ;;  %13528 = vst [vmem:[#allocation31_spill] sm:$0xff] %v12623_v27  ;;  %v12627_v31 = vld [vmem:[#allocation3 + $0x4a] sm:$0xff]  ;;  %v12631_v26 = vld [vmem:[#allocation3 + $0x52] sm:$0xff] }
 0x399   : > { %10128 = vmatprep.subr.mxu1 %v12606_v12  ;;  %13529 = vst [vmem:[#allocation33_spill] sm:$0xff] %v12627_v31  ;;  %13530 = vst [vmem:[#allocation35_spill] sm:$0xff] %v12631_v26 }
 0x39b   : > { %10034 = vmatmul.mubr.msk.f32.gmra.mrb[2].mxu1 %vm440_vm3, %v12615_v62  ;;  %v12635_v62 = vld [vmem:[#allocation3 + $0x62] sm:$0xff] }
 0x39c   : > { %10036 = vmatprep.mubr.msk.f32.mxu1 %vm440_vm3, %v12619_v25  ;;  %13531 = vst [vmem:[#allocation7_spill] sm:$0xff] %v12635_v62  ;;  %v12639_v25 = vld [vmem:[#allocation3 + $0x6a] sm:$0xff] }
 0x39d   : > { %13532 = vst [vmem:[#allocation8_spill] sm:$0xff] %v12639_v25 }
 0x39f   : > { %10037 = vmatmul.mubr.msk.f32.gmra.mrb[4].mxu1 %vm440_vm3, %v12623_v27  ;;  %v12643_v27 = vld [vmem:[#allocation3 + $0x7a] sm:$0xff] }
 0x3a0   : > { %10039 = vmatprep.mubr.msk.f32.mxu1 %vm440_vm3, %v12627_v31  ;;  %13533 = vst [vmem:[#allocation9_spill] sm:$0xff] %v12643_v27  ;;  %v12647_v31 = vld [vmem:[#allocation3 + $0x82] sm:$0xff] }
 0x3a1   : > { %13534 = vst [vmem:[#allocation10_spill] sm:$0xff] %v12647_v31 }
 0x3a3   : > { %10040 = vmatmul.mubr.msk.f32.gmra.mrb[6].mxu1 %vm440_vm3, %v12631_v26  ;;  %v12651_v26 = vld [vmem:[#allocation3 + $0x92] sm:$0xff] }
 0x3a4   : > { %10042 = vmatprep.mubr.msk.f32.mxu1 %vm440_vm3, %v12635_v62  ;;  %13535 = vst [vmem:[#allocation37_spill] sm:$0xff] %v12651_v26  ;;  %v12655_v62 = vld [vmem:[#allocation3 + $0x9a] sm:$0xff] }
 0x3a5   : > { %13536 = vst [vmem:[#allocation38_spill] sm:$0xff] %v12655_v62 }
 0x3a7   : > { %10043 = vmatmul.mubr.msk.f32.gmra.mrb[8].mxu1 %vm440_vm3, %v12639_v25  ;;  %v12659_v25 = vld [vmem:[#allocation3 + $0xaa] sm:$0xff] }
 0x3a8   : > { %10045 = vmatprep.mubr.msk.f32.mxu1 %vm440_vm3, %v12643_v27  ;;  %13537 = vst [vmem:[#allocation13_spill] sm:$0xff] %v12659_v25  ;;  %v12663_v27 = vld [vmem:[#allocation3 + $0xb2] sm:$0xff] }
 0x3a9   : > { %13538 = vst [vmem:[#allocation14_spill] sm:$0xff] %v12663_v27 }
 0x3ab   : > { %10046 = vmatmul.mubr.msk.f32.gmra.mrb[10].mxu1 %vm440_vm3, %v12647_v31  ;;  %v12667_v31 = vld [vmem:[#allocation3 + $0xc2] sm:$0xff] }
 0x3ac   : > { %10048 = vmatprep.mubr.msk.f32.mxu1 %vm440_vm3, %v12651_v26  ;;  %13539 = vst [vmem:[#allocation15_spill] sm:$0xff] %v12667_v31  ;;  %v12671_v26 = vld [vmem:[#allocation3 + $0xca] sm:$0xff] }
 0x3ad   : > { %13540 = vst [vmem:[#allocation16_spill] sm:$0xff] %v12671_v26 }
 0x3af   : > { %10049 = vmatmul.mubr.msk.f32.gmra.mrb[12].mxu1 %vm440_vm3, %v12655_v62  ;;  %v12675_v62 = vld [vmem:[#allocation3 + $0xda] sm:$0xff] }
 0x3b0   : > { %10051 = vmatprep.mubr.msk.f32.mxu1 %vm440_vm3, %v12659_v25  ;;  %13541 = vst [vmem:[#allocation17_spill] sm:$0xff] %v12675_v62  ;;  %v12679_v25 = vld [vmem:[#allocation3 + $0xe2] sm:$0xff] }
 0x3b1   : > { %13542 = vst [vmem:[#allocation18_spill] sm:$0xff] %v12679_v25 }
 0x3b3   : > { %10052 = vmatmul.mubr.msk.f32.gmra.mrb[14].mxu1 %vm440_vm3, %v12663_v27  ;;  %v12683_v27 = vld [vmem:[#allocation3 + $0xf2] sm:$0xff] }
 0x3b4   : > { %10054 = vmatprep.mubr.msk.f32.mxu1 %vm440_vm3, %v12667_v31  ;;  %13543 = vst [vmem:[#allocation19_spill] sm:$0xff] %v12683_v27  ;;  %v12687_v31 = vld [vmem:[#allocation3 + $0xfa] sm:$0xff] }
 0x3b5   : > { %13544 = vst [vmem:[#allocation20_spill] sm:$0xff] %v12687_v31 }
 0x3b7   : > { %10055 = vmatmul.mubr.msk.f32.gmra.mrb[16].mxu1 %vm440_vm3, %v12671_v26  ;;  %v12691_v26 = vld [vmem:[#allocation3 + $0x10a] sm:$0xff] }
 0x3b8   : > { %10057 = vmatprep.mubr.msk.f32.mxu1 %vm440_vm3, %v12675_v62  ;;  %13545 = vst [vmem:[#allocation21_spill] sm:$0xff] %v12691_v26  ;;  %v12695_v62 = vld [vmem:[#allocation3 + $0x112] sm:$0xff] }
 0x3b9   : > { %13546 = vst [vmem:[#allocation22_spill] sm:$0xff] %v12695_v62 }
 0x3bb   : > { %10058 = vmatmul.mubr.msk.f32.gmra.mrb[18].mxu1 %vm440_vm3, %v12679_v25  ;;  %v12699_v25 = vld [vmem:[#allocation3 + $0x122] sm:$0xff] }
 0x3bc   : > { %10060 = vmatprep.mubr.msk.f32.mxu1 %vm440_vm3, %v12683_v27  ;;  %13547 = vst [vmem:[#allocation23_spill] sm:$0xff] %v12699_v25  ;;  %v12703_v27 = vld [vmem:[#allocation3 + $0x12a] sm:$0xff] }
 0x3bd   : > { %13548 = vst [vmem:[#allocation24_spill] sm:$0xff] %v12703_v27 }
 0x3bf   : > { %10061 = vmatmul.mubr.msk.f32.gmra.mrb[20].mxu1 %vm440_vm3, %v12687_v31  ;;  %v12707_v31 = vld [vmem:[#allocation3 + $0x13a] sm:$0xff] }
 0x3c0   : > { %10063 = vmatprep.mubr.msk.f32.mxu1 %vm440_vm3, %v12691_v26  ;;  %13549 = vst [vmem:[#allocation25_spill] sm:$0xff] %v12707_v31  ;;  %v12711_v26 = vld [vmem:[#allocation3 + $0x142] sm:$0xff] }
 0x3c3   : > { %10064 = vmatmul.mubr.msk.f32.gmra.mrb[22].mxu1 %vm440_vm3, %v12695_v62  ;;  %v12715_v62 = vld [vmem:[#allocation3 + $0x152] sm:$0xff] }
 0x3c4   : > { %10066 = vmatprep.mubr.msk.f32.mxu1 %vm440_vm3, %v12699_v25  ;;  %13550 = vst [vmem:[#allocation27_spill] sm:$0xff] %v12715_v62  ;;  %v12719_v25 = vld [vmem:[#allocation3 + $0x15a] sm:$0xff] }
 0x3c7   : > { %10067 = vmatmul.mubr.msk.f32.gmra.mrb[24].mxu1 %vm440_vm3, %v12703_v27  ;;  %v12723_v27 = vld [vmem:[#allocation3 + $0x16a] sm:$0xff] }
 0x3c8   : > { %10069 = vmatprep.mubr.msk.f32.mxu1 %vm440_vm3, %v12707_v31  ;;  %13551 = vst [vmem:[#allocation29_spill] sm:$0xff] %v12723_v27  ;;  %v12727_v31 = vld [vmem:[#allocation3 + $0x172] sm:$0xff] }
 0x3cb   : > { %10070 = vmatmul.mubr.msk.f32.gmra.mrb[26].mxu1 %vm440_vm3, %v12711_v26 }
 0x3cc   : > { %10072 = vmatprep.mubr.msk.f32.mxu1 %vm440_vm3, %v12715_v62  ;;  %v8723_v62 = vld [vmem:[%s13309_s3 + $0x28] sm:$0xff] }
 0x3cf   : > { %10073 = vmatmul.mubr.msk.f32.gmra.mrb[28].mxu1 %vm440_vm3, %v12719_v25 }
 0x3d0   : > { %10075 = vmatprep.mubr.msk.f32.mxu1 %vm440_vm3, %v12723_v27 }
 0x3d3   : > { %10076 = vmatmul.mubr.msk.f32.gmra.mrb[30].mxu1 %vm440_vm3, %v12727_v31 }
 0x3d4   : > { %10080 = vmatprep.mubr.msk.f32.mxu1 %vm440_vm3, %v12480_v32  ;;  %v12799_v32 = vld [vmem:[#allocation3 + $0x188] sm:$0xff] }
 0x3d7   : > { %10081 = vmatmul.mubr.msk.f32.vlgmr.msra.gmra.mrb[0].mxu1 %vm440_vm3, %v12486_v38  ;;  %v8756_v38 = vld [vmem:[%s13309_s3 + $0x30] sm:$0xff] }
 0x3d8   : > { %10129 = vmatpush3.msra.mxu1 %v12606_v12  ;;  %10083 = vmatprep.mubr.msk.f32.mxu1 %vm440_vm3, %v12490_v3  ;;  %v12795_v12 = vld [vmem:[#allocation3 + $0x180] sm:$0xff] }
 0x3d9   : > { %10178 = vmatprep.subr.mxu1 %v8723_v62 }
 0x3db   : > { %10084 = vmatmul.mubr.msk.f32.gmra.mrb[2].mxu1 %vm440_vm3, %v12494_v40 }
 0x3dc   : > { %10086 = vmatprep.mubr.msk.f32.mxu1 %vm440_vm3, %v12498_v24 }
 0x3df   : > { %10087 = vmatmul.mubr.msk.f32.gmra.mrb[4].mxu1 %vm440_vm3, %v12502_v41 }
 0x3e0   : > { %10089 = vmatprep.mubr.msk.f32.mxu1 %vm440_vm3, %v12506_v7 }
 0x3e3   : > { %10090 = vmatmul.mubr.msk.f32.gmra.mrb[6].mxu1 %vm440_vm3, %v12510_v2 }
 0x3e4   : > { %10092 = vmatprep.mubr.msk.f32.mxu1 %vm440_vm3, %v12514_v5 }
 0x3e7   : > { %10093 = vmatmul.mubr.msk.f32.gmra.mrb[8].mxu1 %vm440_vm3, %v12518_v28 }
 0x3e8   : > { %10095 = vmatprep.mubr.msk.f32.mxu1 %vm440_vm3, %v12522_v34 }
 0x3eb   : > { %10096 = vmatmul.mubr.msk.f32.gmra.mrb[10].mxu1 %vm440_vm3, %v12526_v29 }
 0x3ec   : > { %10098 = vmatprep.mubr.msk.f32.mxu1 %vm440_vm3, %v12530_v8 }
 0x3ef   : > { %10099 = vmatmul.mubr.msk.f32.gmra.mrb[12].mxu1 %vm440_vm3, %v12534_v9 }
 0x3f0   : > { %10101 = vmatprep.mubr.msk.f32.mxu1 %vm440_vm3, %v12538_v10 }
 0x3f3   : > { %10102 = vmatmul.mubr.msk.f32.gmra.mrb[14].mxu1 %vm440_vm3, %v12542_v11 }
 0x3f4   : > { %10104 = vmatprep.mubr.msk.f32.mxu1 %vm440_vm3, %v12546_v6 }
 0x3f7   : > { %10105 = vmatmul.mubr.msk.f32.gmra.mrb[16].mxu1 %vm440_vm3, %v12550_v36 }
 0x3f8   : > { %10107 = vmatprep.mubr.msk.f32.mxu1 %vm440_vm3, %v12554_v46 }
 0x3fb   : > { %10108 = vmatmul.mubr.msk.f32.gmra.mrb[18].mxu1 %vm440_vm3, %v12558_v48 }
 0x3fc   : > { %10110 = vmatprep.mubr.msk.f32.mxu1 %vm440_vm3, %v12562_v49 }
 0x3ff   : > { %10111 = vmatmul.mubr.msk.f32.gmra.mrb[20].mxu1 %vm440_vm3, %v12566_v50 }
 0x400   : > { %10113 = vmatprep.mubr.msk.f32.mxu1 %vm440_vm3, %v12570_v52 }
 0x403   : > { %10114 = vmatmul.mubr.msk.f32.gmra.mrb[22].mxu1 %vm440_vm3, %v12574_v55 }
 0x404   : > { %10116 = vmatprep.mubr.msk.f32.mxu1 %vm440_vm3, %v12578_v57 }
 0x407   : > { %10117 = vmatmul.mubr.msk.f32.gmra.mrb[24].mxu1 %vm440_vm3, %v12582_v58 }
 0x408   : > { %10119 = vmatprep.mubr.msk.f32.mxu1 %vm440_vm3, %v12586_v60 }
 0x40b   : > { %10120 = vmatmul.mubr.msk.f32.gmra.mrb[26].mxu1 %vm440_vm3, %v12590_v17 }
 0x40c   : > { %10122 = vmatprep.mubr.msk.f32.mxu1 %vm440_vm3, %v12594_v18 }
 0x40f   : > { %10123 = vmatmul.mubr.msk.f32.gmra.mrb[28].mxu1 %vm440_vm3, %v12598_v22 }
 0x410   : > { %10125 = vmatprep.mubr.msk.f32.mxu1 %vm440_vm3, %v12795_v12 }
 0x413   : > { %10126 = vmatmul.mubr.msk.f32.gmra.mrb[30].mxu1 %vm440_vm3, %v12799_v32 }
 0x414   : > { %10130 = vmatprep.mubr.msk.f32.mxu1 %vm440_vm3, %v12302_v14  ;;  %v13552_v14 = vld [vmem:[#allocation11_spill] sm:$0xff] }
 0x417   : > { %10131 = vmatmul.mubr.msk.f32.vlgmr.msra.gmra.mrb[0].mxu1 %vm440_vm3, %v12307_v43  ;;  %v13553_v43 = vld [vmem:[#allocation12_spill] sm:$0xff] }
 0x418   : > { %10179 = vmatpush3.msra.mxu1 %v8723_v62  ;;  %10133 = vmatprep.mubr.msk.f32.mxu1 %vm440_vm3, %v12314_v51  ;;  %v12866_v51 = vld [vmem:[#allocation3 + $0x181] sm:$0xff]  ;;  %v13565_v62 = vld [vmem:[#allocation38_spill] sm:$0xff] }
 0x419   : > { %10228 = vmatprep.subr.mxu1 %v8756_v38 }
 0x41b   : > { %10134 = vmatmul.mubr.msk.f32.gmra.mrb[2].mxu1 %vm440_vm3, %v12319_v53  ;;  %v12870_v53 = vld [vmem:[#allocation3 + $0x189] sm:$0xff] }
 0x41c   : > { %10136 = vmatprep.mubr.msk.f32.mxu1 %vm440_vm3, %v12326_v61  ;;  %v13554_v61 = vld [vmem:[#allocation26_spill] sm:$0xff] }
 0x41f   : > { %10137 = vmatmul.mubr.msk.f32.gmra.mrb[4].mxu1 %vm440_vm3, %v12331_v16  ;;  %v8789_v16 = vld [vmem:[%s13309_s3 + $0x38] sm:$0xff] }
 0x420   : > { %10139 = vmatprep.mubr.msk.f32.mxu1 %vm440_vm3, %v12338_v21  ;;  %v13555_v21 = vld [vmem:[#allocation28_spill] sm:$0xff] }
 0x423   : > { %10140 = vmatmul.mubr.msk.f32.gmra.mrb[6].mxu1 %vm440_vm3, %v12343_v23  ;;  %v13556_v23 = vld [vmem:[#allocation30_spill] sm:$0xff] }
 0x424   : > { %10142 = vmatprep.mubr.msk.f32.mxu1 %vm440_vm3, %v12350_v42  ;;  %v13557_v42 = vld [vmem:[#allocation31_spill] sm:$0xff] }
 0x427   : > { %10143 = vmatmul.mubr.msk.f32.gmra.mrb[8].mxu1 %vm440_vm3, %v12355_v4  ;;  %v13558_v4 = vld [vmem:[#allocation33_spill] sm:$0xff] }
 0x428   : > { %10145 = vmatprep.mubr.msk.f32.mxu1 %vm440_vm3, %v12362_v33  ;;  %v13559_v33 = vld [vmem:[#allocation35_spill] sm:$0xff] }
 0x42b   : > { %10146 = vmatmul.mubr.msk.f32.gmra.mrb[10].mxu1 %vm440_vm3, %v12367_v63  ;;  %v13560_v63 = vld [vmem:[#allocation7_spill] sm:$0xff] }
 0x42c   : > { %10148 = vmatprep.mubr.msk.f32.mxu1 %vm440_vm3, %v12374_v13  ;;  %v13561_v13 = vld [vmem:[#allocation8_spill] sm:$0xff] }
 0x42f   : > { %10149 = vmatmul.mubr.msk.f32.gmra.mrb[12].mxu1 %vm440_vm3, %v12379_v44  ;;  %v13562_v44 = vld [vmem:[#allocation9_spill] sm:$0xff] }
 0x430   : > { %10151 = vmatprep.mubr.msk.f32.mxu1 %vm440_vm3, %v12386_v54  ;;  %v13563_v54 = vld [vmem:[#allocation10_spill] sm:$0xff] }
 0x433   : > { %10152 = vmatmul.mubr.msk.f32.gmra.mrb[14].mxu1 %vm440_vm3, %v12391_v56  ;;  %v13564_v56 = vld [vmem:[#allocation37_spill] sm:$0xff] }
 0x434   : > { %10154 = vmatprep.mubr.msk.f32.mxu1 %vm440_vm3, %v12398_v19 }
 0x437   : > { %10155 = vmatmul.mubr.msk.f32.gmra.mrb[16].mxu1 %vm440_vm3, %v12403_v1 }
 0x438   : > { %10157 = vmatprep.mubr.msk.f32.mxu1 %vm440_vm3, %v12410_v37 }
 0x43b   : > { %10158 = vmatmul.mubr.msk.f32.gmra.mrb[18].mxu1 %vm440_vm3, %v12415_v39 }
 0x43c   : > { %10160 = vmatprep.mubr.msk.f32.mxu1 %vm440_vm3, %v12422_v30 }
 0x43f   : > { %10161 = vmatmul.mubr.msk.f32.gmra.mrb[20].mxu1 %vm440_vm3, %v12427_v35 }
 0x440   : > { %10163 = vmatprep.mubr.msk.f32.mxu1 %vm440_vm3, %v12434_v45 }
 0x443   : > { %10164 = vmatmul.mubr.msk.f32.gmra.mrb[22].mxu1 %vm440_vm3, %v12439_v47 }
 0x444   : > { %10166 = vmatprep.mubr.msk.f32.mxu1 %vm440_vm3, %v12446_v59 }
 0x447   : > { %10167 = vmatmul.mubr.msk.f32.gmra.mrb[24].mxu1 %vm440_vm3, %v12451_v15 }
 0x448   : > { %10169 = vmatprep.mubr.msk.f32.mxu1 %vm440_vm3, %v12456_v20 }
 0x44b   : > { %10170 = vmatmul.mubr.msk.f32.gmra.mrb[26].mxu1 %vm440_vm3, %v12461_v0 }
 0x44c   : > { %10172 = vmatprep.mubr.msk.f32.mxu1 %vm440_vm3, %v13552_v14 }
 0x44f   : > { %10173 = vmatmul.mubr.msk.f32.gmra.mrb[28].mxu1 %vm440_vm3, %v13553_v43 }
 0x450   : > { %10175 = vmatprep.mubr.msk.f32.mxu1 %vm440_vm3, %v12866_v51 }
 0x453   : > { %10176 = vmatmul.mubr.msk.f32.gmra.mrb[30].mxu1 %vm440_vm3, %v12870_v53 }
 0x454   : > { %10180 = vmatprep.mubr.msk.f32.mxu1 %vm440_vm3, %v13554_v61  ;;  %v13567_v61 = vld [vmem:[#allocation14_spill] sm:$0xff] }
 0x457   : > { %10181 = vmatmul.mubr.msk.f32.vlgmr.msra.gmra.mrb[0].mxu1 %vm440_vm3, %v13555_v21  ;;  %v13568_v21 = vld [vmem:[#allocation15_spill] sm:$0xff] }
 0x458   : > { %10229 = vmatpush3.msra.mxu1 %v8756_v38  ;;  %10183 = vmatprep.mubr.msk.f32.mxu1 %vm440_vm3, %v13556_v23  ;;  %v13566_v38 = vld [vmem:[#allocation13_spill] sm:$0xff] }
 0x459   : > { %10278 = vmatprep.subr.mxu1 %v8789_v16 }
 0x45b   : > { %10184 = vmatmul.mubr.msk.f32.gmra.mrb[2].mxu1 %vm440_vm3, %v13557_v42 }
 0x45c   : > { %10186 = vmatprep.mubr.msk.f32.mxu1 %vm440_vm3, %v13558_v4 }
 0x45f   : > { %10187 = vmatmul.mubr.msk.f32.gmra.mrb[4].mxu1 %vm440_vm3, %v13559_v33 }
 0x460   : > { %10189 = vmatprep.mubr.msk.f32.mxu1 %vm440_vm3, %v13560_v63 }
 0x463   : > { %10190 = vmatmul.mubr.msk.f32.gmra.mrb[6].mxu1 %vm440_vm3, %v13561_v13  ;;  %v13569_v13 = vld [vmem:[#allocation16_spill] sm:$0xff] }
 0x464   : > { %10192 = vmatprep.mubr.msk.f32.mxu1 %vm440_vm3, %v13562_v44  ;;  %v13570_v44 = vld [vmem:[#allocation17_spill] sm:$0xff] }
 0x467   : > { %10193 = vmatmul.mubr.msk.f32.gmra.mrb[8].mxu1 %vm440_vm3, %v13563_v54  ;;  %v13571_v54 = vld [vmem:[#allocation18_spill] sm:$0xff] }
 0x468   : > { %10195 = vmatprep.mubr.msk.f32.mxu1 %vm440_vm3, %v13564_v56  ;;  %v13572_v56 = vld [vmem:[#allocation19_spill] sm:$0xff] }
 0x46b   : > { %10196 = vmatmul.mubr.msk.f32.gmra.mrb[10].mxu1 %vm440_vm3, %v13565_v62  ;;  %v13573_v62 = vld [vmem:[#allocation20_spill] sm:$0xff] }
 0x46c   : > { %10198 = vmatprep.mubr.msk.f32.mxu1 %vm440_vm3, %v13566_v38  ;;  %v13574_v38 = vld [vmem:[#allocation21_spill] sm:$0xff] }
 0x46f   : > { %10199 = vmatmul.mubr.msk.f32.gmra.mrb[12].mxu1 %vm440_vm3, %v13567_v61  ;;  %v13575_v61 = vld [vmem:[#allocation22_spill] sm:$0xff] }
 0x470   : > { %10201 = vmatprep.mubr.msk.f32.mxu1 %vm440_vm3, %v13568_v21  ;;  %v13576_v21 = vld [vmem:[#allocation23_spill] sm:$0xff] }
 0x473   : > { %10202 = vmatmul.mubr.msk.f32.gmra.mrb[14].mxu1 %vm440_vm3, %v13569_v13  ;;  %v13577_v13 = vld [vmem:[#allocation24_spill] sm:$0xff] }
 0x474   : > { %10204 = vmatprep.mubr.msk.f32.mxu1 %vm440_vm3, %v13570_v44  ;;  %v13578_v44 = vld [vmem:[#allocation25_spill] sm:$0xff] }
 0x477   : > { %10205 = vmatmul.mubr.msk.f32.gmra.mrb[16].mxu1 %vm440_vm3, %v13571_v54 }
 0x478   : > { %10207 = vmatprep.mubr.msk.f32.mxu1 %vm440_vm3, %v13572_v56  ;;  %v13579_v56 = vld [vmem:[#allocation27_spill] sm:$0xff] }
 0x47b   : > { %10208 = vmatmul.mubr.msk.f32.gmra.mrb[18].mxu1 %vm440_vm3, %v13573_v62 }
 0x47c   : > { %10210 = vmatprep.mubr.msk.f32.mxu1 %vm440_vm3, %v13574_v38 }
 0x47f   : > { %10211 = vmatmul.mubr.msk.f32.gmra.mrb[20].mxu1 %vm440_vm3, %v13575_v61 }
 0x480   : > { %10213 = vmatprep.mubr.msk.f32.mxu1 %vm440_vm3, %v13576_v21  ;;  %v12937_v21 = vld [vmem:[#allocation3 + $0x182] sm:$0xff] }
 0x483   : > { %10214 = vmatmul.mubr.msk.f32.gmra.mrb[22].mxu1 %vm440_vm3, %v13577_v13 }
 0x484   : > { %10216 = vmatprep.mubr.msk.f32.mxu1 %vm440_vm3, %v13578_v44  ;;  %v12941_v44 = vld [vmem:[#allocation3 + $0x18a] sm:$0xff] }
 0x487   : > { %10217 = vmatmul.mubr.msk.f32.gmra.mrb[24].mxu1 %vm440_vm3, %v12711_v26 }
 0x488   : > { %10219 = vmatprep.mubr.msk.f32.mxu1 %vm440_vm3, %v13579_v56 }
 0x48b   : > { %10220 = vmatmul.mubr.msk.f32.gmra.mrb[26].mxu1 %vm440_vm3, %v12719_v25 }
 0x48c   : > { %10222 = vmatprep.mubr.msk.f32.mxu1 %vm440_vm3, %v12723_v27  ;;  %v8822_v27 = vld [vmem:[%s13309_s3 + $0x40] sm:$0xff] }
 0x48f   : > { %10223 = vmatmul.mubr.msk.f32.gmra.mrb[28].mxu1 %vm440_vm3, %v12727_v31 }
 0x490   : > { %10225 = vmatprep.mubr.msk.f32.mxu1 %vm440_vm3, %v12937_v21 }
 0x493   : > { %10226 = vmatmul.mubr.msk.f32.gmra.mrb[30].mxu1 %vm440_vm3, %v12941_v44 }
 0x494   : > { %10230 = vmatprep.mubr.msk.f32.mxu1 %vm440_vm3, %v12490_v3  ;;  %v6465_v3 = vld [vmem:[#allocation3 + $0x198] sm:$0xff] }
 0x497   : > { %10231 = vmatmul.mubr.msk.f32.vlgmr.msra.gmra.mrb[0].mxu1 %vm440_vm3, %v12494_v40  ;;  %v6466_v40 = vld [vmem:[#allocation3 + $0x1a0] sm:$0xff] }
 0x498   : > { %10279 = vmatpush3.msra.mxu1 %v8789_v16  ;;  %10233 = vmatprep.mubr.msk.f32.mxu1 %vm440_vm3, %v12498_v24  ;;  %v6822_v24 = vld [vmem:[#allocation3 + $0x31] sm:$0xff] }
 0x499   : > { %10328 = vmatprep.subr.mxu1 %v8822_v27 }
 0x49b   : > { %10234 = vmatmul.mubr.msk.f32.gmra.mrb[2].mxu1 %vm440_vm3, %v12502_v41  ;;  %v6823_v41 = vld [vmem:[#allocation3 + $0x39] sm:$0xff] }
 0x49c   : > { %10236 = vmatprep.mubr.msk.f32.mxu1 %vm440_vm3, %v12506_v7  ;;  %v6824_v7 = vld [vmem:[#allocation3 + $0x49] sm:$0xff] }
 0x49f   : > { %10237 = vmatmul.mubr.msk.f32.gmra.mrb[4].mxu1 %vm440_vm3, %v12510_v2  ;;  %v6825_v2 = vld [vmem:[#allocation3 + $0x51] sm:$0xff] }
 0x4a0   : > { %10239 = vmatprep.mubr.msk.f32.mxu1 %vm440_vm3, %v12514_v5  ;;  %v6826_v5 = vld [vmem:[#allocation3 + $0x61] sm:$0xff] }
 0x4a3   : > { %10240 = vmatmul.mubr.msk.f32.gmra.mrb[6].mxu1 %vm440_vm3, %v12518_v28  ;;  %v6827_v28 = vld [vmem:[#allocation3 + $0x69] sm:$0xff] }
 0x4a4   : > { %10242 = vmatprep.mubr.msk.f32.mxu1 %vm440_vm3, %v12522_v34  ;;  %v6828_v34 = vld [vmem:[#allocation3 + $0x79] sm:$0xff] }
 0x4a7   : > { %10243 = vmatmul.mubr.msk.f32.gmra.mrb[8].mxu1 %vm440_vm3, %v12526_v29  ;;  %v6829_v29 = vld [vmem:[#allocation3 + $0x81] sm:$0xff] }
 0x4a8   : > { %10245 = vmatprep.mubr.msk.f32.mxu1 %vm440_vm3, %v12530_v8  ;;  %v6830_v8 = vld [vmem:[#allocation3 + $0x91] sm:$0xff] }
 0x4ab   : > { %10246 = vmatmul.mubr.msk.f32.gmra.mrb[10].mxu1 %vm440_vm3, %v12534_v9  ;;  %v6831_v9 = vld [vmem:[#allocation3 + $0x99] sm:$0xff] }
 0x4ac   : > { %10248 = vmatprep.mubr.msk.f32.mxu1 %vm440_vm3, %v12538_v10  ;;  %v6832_v10 = vld [vmem:[#allocation3 + $0xa9] sm:$0xff] }
 0x4af   : > { %10249 = vmatmul.mubr.msk.f32.gmra.mrb[12].mxu1 %vm440_vm3, %v12542_v11  ;;  %v6833_v11 = vld [vmem:[#allocation3 + $0xb1] sm:$0xff] }
 0x4b0   : > { %10251 = vmatprep.mubr.msk.f32.mxu1 %vm440_vm3, %v12546_v6  ;;  %v6834_v6 = vld [vmem:[#allocation3 + $0xc1] sm:$0xff] }
 0x4b3   : > { %10252 = vmatmul.mubr.msk.f32.gmra.mrb[14].mxu1 %vm440_vm3, %v12550_v36  ;;  %v6835_v36 = vld [vmem:[#allocation3 + $0xc9] sm:$0xff] }
 0x4b4   : > { %10254 = vmatprep.mubr.msk.f32.mxu1 %vm440_vm3, %v12554_v46  ;;  %v13590_v46 = vld [vmem:[#allocation19_spill] sm:$0xff] }
 0x4b7   : > { %10255 = vmatmul.mubr.msk.f32.gmra.mrb[16].mxu1 %vm440_vm3, %v12558_v48  ;;  %v13591_v48 = vld [vmem:[#allocation23_spill] sm:$0xff] }
 0x4b8   : > { %10257 = vmatprep.mubr.msk.f32.mxu1 %vm440_vm3, %v12562_v49  ;;  %v13592_v49 = vld [vmem:[#allocation25_spill] sm:$0xff] }
 0x4bb   : > { %10258 = vmatmul.mubr.msk.f32.gmra.mrb[18].mxu1 %vm440_vm3, %v12566_v50  ;;  %v13593_v50 = vld [vmem:[#allocation29_spill] sm:$0xff] }
 0x4bc   : > { %10260 = vmatprep.mubr.msk.f32.mxu1 %vm440_vm3, %v12570_v52  ;;  %v7239_v52 = vld [vmem:[#allocation3 + $0x19a] sm:$0xff] }
 0x4bf   : > { %10261 = vmatmul.mubr.msk.f32.gmra.mrb[20].mxu1 %vm440_vm3, %v12574_v55  ;;  %v7656_v55 = vld [vmem:[%s13311_s5] sm:$0xff] }
 0x4c0   : > { %10263 = vmatprep.mubr.msk.f32.mxu1 %vm440_vm3, %v12578_v57  ;;  %10379 = vmatpush3.msra.mxu0 %v7656_v55  ;;  %v13594_v57 = vmov 0.0  }
 0x4c1   : > { %10383 = vmatprep.subr.mxu0 %v13594_v57  ;;  %10380 = vmatprep.mubr.msk.f32.mxu0 %vm11058_vm7, %v13594_v57 }
 0x4c3   : > { %10264 = vmatmul.mubr.msk.f32.gmra.mrb[22].mxu1 %vm440_vm3, %v12582_v58  ;;  %v8019_v58 = vld [vmem:[%s13313_s7] sm:$0xff] }
 0x4c4   : > { %10266 = vmatprep.mubr.msk.f32.mxu1 %vm440_vm3, %v12586_v60  ;;  %v8020_v60 = vld [vmem:[%s13313_s7 + $0x8] sm:$0xff] }
 0x4c7   : > { %10267 = vmatmul.mubr.msk.f32.gmra.mrb[24].mxu1 %vm440_vm3, %v12590_v17  ;;  %v8021_v17 = vld [vmem:[%s13313_s7 + $0x10] sm:$0xff] }
 0x4c8   : > { %10269 = vmatprep.mubr.msk.f32.mxu1 %vm440_vm3, %v12594_v18  ;;  %v11059_v18 = vmov 0.0|0.0  }
 0x4cb   : > { %10270 = vmatmul.mubr.msk.f32.gmra.mrb[26].mxu1 %vm440_vm3, %v12598_v22  ;;  %v10421_v22 = vpack.c.bf16 %v8020_v60, %v8019_v58 }
 0x4cc   : > { %10272 = vmatprep.mubr.msk.f32.mxu1 %vm440_vm3, %v12795_v12 }
 0x4cf   : > { %10273 = vmatmul.mubr.msk.f32.gmra.mrb[28].mxu1 %vm440_vm3, %v12799_v32 }
 0x4d0   : > { %10275 = vmatprep.mubr.msk.f32.mxu1 %vm440_vm3, %v6465_v3 }
 0x4d3   : > { %10276 = vmatmul.mubr.msk.f32.gmra.mrb[30].mxu1 %vm440_vm3, %v6466_v40 }
 0x4d4   : > { %10280 = vmatprep.mubr.msk.f32.mxu1 %vm440_vm3, %v6822_v24 }
 0x4d7   : > { %10281 = vmatmul.mubr.msk.f32.vlgmr.msra.gmra.mrb[0].mxu1 %vm440_vm3, %v6823_v41 }
 0x4d8   : > { %10329 = vmatpush3.msra.mxu1 %v8822_v27  ;;  %10283 = vmatprep.mubr.msk.f32.mxu1 %vm440_vm3, %v6824_v7 }
 0x4d9   : > { %10420 = vmatprep.subr.bf16.mxu1 %v11059_v18 }
 0x4db   : > { %10284 = vmatmul.mubr.msk.f32.gmra.mrb[2].mxu1 %vm440_vm3, %v6825_v2 }
 0x4dc   : > { %10286 = vmatprep.mubr.msk.f32.mxu1 %vm440_vm3, %v6826_v5 }
 0x4df   : > { %10287 = vmatmul.mubr.msk.f32.gmra.mrb[4].mxu1 %vm440_vm3, %v6827_v28 }
 0x4e0   : > { %10289 = vmatprep.mubr.msk.f32.mxu1 %vm440_vm3, %v6828_v34 }
 0x4e3   : > { %10290 = vmatmul.mubr.msk.f32.gmra.mrb[6].mxu1 %vm440_vm3, %v6829_v29 }
 0x4e4   : > { %10292 = vmatprep.mubr.msk.f32.mxu1 %vm440_vm3, %v6830_v8 }
 0x4e7   : > { %10293 = vmatmul.mubr.msk.f32.gmra.mrb[8].mxu1 %vm440_vm3, %v6831_v9 }
 0x4e8   : > { %10295 = vmatprep.mubr.msk.f32.mxu1 %vm440_vm3, %v6832_v10 }
 0x4eb   : > { %10296 = vmatmul.mubr.msk.f32.gmra.mrb[10].mxu1 %vm440_vm3, %v6833_v11 }
 0x4ec   : > { %10298 = vmatprep.mubr.msk.f32.mxu1 %vm440_vm3, %v6834_v6 }
 0x4ef   : > { %10299 = vmatmul.mubr.msk.f32.gmra.mrb[12].mxu1 %vm440_vm3, %v6835_v36 }
 0x4f0   : > { %10301 = vmatprep.mubr.msk.f32.mxu1 %vm440_vm3, %v12398_v19  ;;  %v6852_v19 = vld [vmem:[#allocation3 + $0x199] sm:$0xff] }
 0x4f3   : > { %10302 = vmatmul.mubr.msk.f32.gmra.mrb[14].mxu1 %vm440_vm3, %v12403_v1  ;;  %v6853_v1 = vld [vmem:[#allocation3 + $0x1a1] sm:$0xff] }
 0x4f4   : > { %10304 = vmatprep.mubr.msk.f32.mxu1 %vm440_vm3, %v12410_v37  ;;  %v13580_v37 = vld [vmem:[#allocation8_spill] sm:$0xff] }
 0x4f7   : > { %10305 = vmatmul.mubr.msk.f32.gmra.mrb[16].mxu1 %vm440_vm3, %v12415_v39  ;;  %v13581_v39 = vld [vmem:[#allocation9_spill] sm:$0xff] }
 0x4f8   : > { %10307 = vmatprep.mubr.msk.f32.mxu1 %vm440_vm3, %v12422_v30  ;;  %v13582_v30 = vld [vmem:[#allocation10_spill] sm:$0xff] }
 0x4fb   : > { %10308 = vmatmul.mubr.msk.f32.gmra.mrb[18].mxu1 %vm440_vm3, %v12427_v35  ;;  %v13583_v35 = vld [vmem:[#allocation37_spill] sm:$0xff] }
 0x4fc   : > { %10310 = vmatprep.mubr.msk.f32.mxu1 %vm440_vm3, %v12434_v45  ;;  %v13584_v45 = vld [vmem:[#allocation38_spill] sm:$0xff] }
 0x4ff   : > { %10311 = vmatmul.mubr.msk.f32.gmra.mrb[20].mxu1 %vm440_vm3, %v12439_v47  ;;  %v13585_v47 = vld [vmem:[#allocation13_spill] sm:$0xff] }
 0x500   : > { %10313 = vmatprep.mubr.msk.f32.mxu1 %vm440_vm3, %v12446_v59  ;;  %v13586_v59 = vld [vmem:[#allocation14_spill] sm:$0xff] }
 0x503   : > { %10314 = vmatmul.mubr.msk.f32.gmra.mrb[22].mxu1 %vm440_vm3, %v12451_v15  ;;  %v13587_v15 = vld [vmem:[#allocation15_spill] sm:$0xff] }
 0x504   : > { %10316 = vmatprep.mubr.msk.f32.mxu1 %vm440_vm3, %v12456_v20  ;;  %v13588_v20 = vld [vmem:[#allocation16_spill] sm:$0xff] }
 0x507   : > { %10317 = vmatmul.mubr.msk.f32.gmra.mrb[24].mxu1 %vm440_vm3, %v12461_v0  ;;  %v13589_v0 = vld [vmem:[#allocation17_spill] sm:$0xff] }
 0x508   : > { %10319 = vmatprep.mubr.msk.f32.mxu1 %vm440_vm3, %v13552_v14 }
 0x50b   : > { %10320 = vmatmul.mubr.msk.f32.gmra.mrb[26].mxu1 %vm440_vm3, %v13553_v43 }
 0x50c   : > { %10322 = vmatprep.mubr.msk.f32.mxu1 %vm440_vm3, %v12866_v51 }
 0x50f   : > { %10323 = vmatmul.mubr.msk.f32.gmra.mrb[28].mxu1 %vm440_vm3, %v12870_v53  ;;  %v13146_v53 = vld [vmem:[%s13310_s4] ss:$0 sm:$0xff] }
 0x510   : > { %10325 = vmatprep.mubr.msk.f32.mxu1 %vm440_vm3, %v6852_v19 }
 0x513   : > { %10326 = vmatmul.mubr.msk.f32.gmra.mrb[30].mxu1 %vm440_vm3, %v6853_v1 }
 0x514   : > { %10330 = vmatprep.mubr.msk.f32.mxu1 %vm440_vm3, %v13556_v23 }
 0x517   : > { %10331 = vmatmul.mubr.msk.f32.vlgmr.msra.gmra.mrb[0].mxu1 %vm440_vm3, %v13557_v42 }
 0x518   : > { %10333 = vmatprep.mubr.msk.f32.mxu1 %vm440_vm3, %v13558_v4  ;;  %10422 = vmatpush3.bf16.msra.mxu1 %v10421_v22 }
 0x519   : > { %10423 = vmatprep.subr.bf16.mxu1 %v11059_v18 }
 0x51b   : > { %10334 = vmatmul.mubr.msk.f32.gmra.mrb[2].mxu1 %vm440_vm3, %v13559_v33 }
 0x51c   : > { %10336 = vmatprep.mubr.msk.f32.mxu1 %vm440_vm3, %v13560_v63 }
 0x51f   : > { %10337 = vmatmul.mubr.msk.f32.gmra.mrb[4].mxu1 %vm440_vm3, %v13580_v37 }
 0x520   : > { %10339 = vmatprep.mubr.msk.f32.mxu1 %vm440_vm3, %v13581_v39 }
 0x523   : > { %10340 = vmatmul.mubr.msk.f32.gmra.mrb[6].mxu1 %vm440_vm3, %v13582_v30 }
 0x524   : > { %10342 = vmatprep.mubr.msk.f32.mxu1 %vm440_vm3, %v13583_v35 }
 0x527   : > { %10343 = vmatmul.mubr.msk.f32.gmra.mrb[8].mxu1 %vm440_vm3, %v13584_v45 }
 0x528   : > { %10345 = vmatprep.mubr.msk.f32.mxu1 %vm440_vm3, %v13585_v47 }
 0x52b   : > { %10346 = vmatmul.mubr.msk.f32.gmra.mrb[10].mxu1 %vm440_vm3, %v13586_v59 }
 0x52c   : > { %10348 = vmatprep.mubr.msk.f32.mxu1 %vm440_vm3, %v13587_v15 }
 0x52f   : > { %10349 = vmatmul.mubr.msk.f32.gmra.mrb[12].mxu1 %vm440_vm3, %v13588_v20 }
 0x530   : > { %10351 = vmatprep.mubr.msk.f32.mxu1 %vm440_vm3, %v13589_v0 }
 0x533   : > { %10352 = vmatmul.mubr.msk.f32.gmra.mrb[14].mxu1 %vm440_vm3, %v13571_v54 }
 0x534   : > { %10354 = vmatprep.mubr.msk.f32.mxu1 %vm440_vm3, %v13590_v46 }
 0x537   : > { %10355 = vmatmul.mubr.msk.f32.gmra.mrb[16].mxu1 %vm440_vm3, %v13573_v62 }
 0x538   : > { %10357 = vmatprep.mubr.msk.f32.mxu1 %vm440_vm3, %v13574_v38 }
 0x53b   : > { %10358 = vmatmul.mubr.msk.f32.gmra.mrb[18].mxu1 %vm440_vm3, %v13575_v61 }
 0x53c   : > { %10360 = vmatprep.mubr.msk.f32.mxu1 %vm440_vm3, %v13591_v48 }
 0x53f   : > { %10361 = vmatmul.mubr.msk.f32.gmra.mrb[20].mxu1 %vm440_vm3, %v13577_v13 }
 0x540   : > { %10363 = vmatprep.mubr.msk.f32.mxu1 %vm440_vm3, %v13592_v49 }
 0x543   : > { %10364 = vmatmul.mubr.msk.f32.gmra.mrb[22].mxu1 %vm440_vm3, %v12711_v26  ;;  %v7240_v26 = vld [vmem:[#allocation3 + $0x1a2] sm:$0xff] }
 0x544   : > { %10366 = vmatprep.mubr.msk.f32.mxu1 %vm440_vm3, %v13579_v56 }
 0x547   : > { %10367 = vmatmul.mubr.msk.f32.gmra.mrb[24].mxu1 %vm440_vm3, %v12719_v25  ;;  %v8022_v25 = vld [vmem:[%s13313_s7 + $0x18] sm:$0xff] }
 0x548   : > { %10369 = vmatprep.mubr.msk.f32.mxu1 %vm440_vm3, %v13593_v50  ;;  %v10424_v27 = vpack.c.bf16 %v8022_v25, %v8021_v17 }
 0x54a   : > { %10425 = vmatpush3.bf16.msra.mxu1 %v10424_v27 }
 0x54b   : > { %10370 = vmatmul.mubr.msk.f32.gmra.mrb[26].mxu1 %vm440_vm3, %v12727_v31  ;;  %10426 = vmatprep.subr.bf16.mxu1 %v11059_v18 }
 0x54c   : > { %10372 = vmatprep.mubr.msk.f32.mxu1 %vm440_vm3, %v12937_v21 }
 0x54f   : > { %10373 = vmatmul.mubr.msk.f32.gmra.mrb[28].mxu1 %vm440_vm3, %v12941_v44 }
 0x550   : > { %10375 = vmatprep.mubr.msk.f32.mxu1 %vm440_vm3, %v7239_v52 }
 0x553   : > { %10376 = vmatmul.mubr.msk.f32.gmra.mrb[30].mxu1 %vm440_vm3, %v7240_v26 }
 0x554   : > { %10406 = vmatprep.mubr.msk.f32.mxu1 %vm11058_vm7, %v13594_v57 }
 0x5ea   : > { %v10332_v31 = vpop.f32.mrb[0].mxu1 }
 0x5eb   : > { %v7405_v12 = vpop.f32.mrb[1].mxu1  ;;  %v7604_v42 = vadd.f32 %v10332_v31, %v13146_v53 }
 0x5ec   : > { %v7603_v4 = vadd.f32 %v13146_v53, %v7405_v12 }
 0x5ed   : > { %v7731_v54 = vsel %vm440_vm3, %v7604_v42, -inf }
 0x5ee   : > { %v10335_v32 = vpop.f32.mrb[2].mxu1  ;;  %v7635_v38 = vsel %vm440_vm3, %v7603_v4, -inf }
 0x5ef   : > { %v7415_v14 = vpop.f32.mrb[3].mxu1  ;;  %v7606_v56 = vadd.f32 %v10335_v32, %v13146_v53 }
 0x5f0   : > { %v7605_v61 = vadd.f32 %v13146_v53, %v7415_v14 }
 0x5f1   : > { %v7732_v5 = vsel %vm440_vm3, %v7606_v56, -inf }
 0x5f2   : > { %v10338_v43 = vpop.f32.mrb[4].mxu1  ;;  %v7636_v29 = vsel %vm440_vm3, %v7605_v61, -inf }
 0x5f3   : > { %v7425_v51 = vpop.f32.mrb[5].mxu1  ;;  %v7608_v28 = vadd.f32 %v10338_v43, %v13146_v53 }
 0x5f4   : > { %v7607_v8 = vadd.f32 %v13146_v53, %v7425_v51 }
 0x5f5   : > { %v7733_v39 = vsel %vm440_vm3, %v7608_v28, -inf }
 0x5f6   : > { %v10341_v16 = vpop.f32.mrb[6].mxu1  ;;  %v7637_v47 = vsel %vm440_vm3, %v7607_v8, -inf }
 0x5f7   : > { %v7435_v23 = vpop.f32.mrb[7].mxu1  ;;  %v7610_v30 = vadd.f32 %v10341_v16, %v13146_v53 }
 0x5f8   : > { %v7609_v59 = vadd.f32 %v13146_v53, %v7435_v23 }
 0x5f9   : > { %v7734_v52 = vsel %vm440_vm3, %v7610_v30, -inf }
 0x5fa   : > { %v10344_v33 = vpop.f32.mrb[8].mxu1  ;;  %v7638_v55 = vsel %vm440_vm3, %v7609_v59, -inf }
 0x5fb   : > { %v7612_v63 = vadd.f32 %v10344_v33, %v13146_v53  ;;  %v7445_v13 = vpop.f32.mrb[9].mxu1 }
 0x5fc   : > { %v7611_v44 = vadd.f32 %v13146_v53, %v7445_v13 }
 0x5fd   : > { %v7735_v62 = vsel %vm440_vm3, %v7612_v63, -inf }
 0x5fe   : > { %v7736_v21 = vmax.f32 %v7731_v54, %v7735_v62  ;;  %v7639_v3 = vsel %vm440_vm3, %v7611_v44, -inf  ;;  %v10347_v40 = vpop.f32.mrb[10].mxu1 }
 0x5ff   : > { %v7640_v24 = vmax.f32 %v7635_v38, %v7639_v3  ;;  %v7614_v41 = vadd.f32 %v10347_v40, %v13146_v53  ;;  %v7455_v7 = vpop.f32.mrb[11].mxu1 }
 0x600   : > { %v7613_v2 = vadd.f32 %v13146_v53, %v7455_v7  ;;  %v7752_v7 = vld [vmem:[%s13311_s5 + $0x8] sm:$0xff] }
 0x601   : > { %v7737_v34 = vsel %vm440_vm3, %v7614_v41, -inf }
 0x602   : > { %v7738_v9 = vmax.f32 %v7732_v5, %v7737_v34  ;;  %v7641_v10 = vsel %vm440_vm3, %v7613_v2, -inf  ;;  %v10350_v11 = vpop.f32.mrb[12].mxu1 }
 0x603   : > { %v7642_v6 = vmax.f32 %v7636_v29, %v7641_v10  ;;  %v7616_v36 = vadd.f32 %v10350_v11, %v13146_v53  ;;  %v7465_v19 = vpop.f32.mrb[13].mxu1 }
 0x604   : > { %v7743_v1 = vmax.f32 %v7736_v21, %v7738_v9  ;;  %v7615_v37 = vadd.f32 %v13146_v53, %v7465_v19 }
 0x605   : > { %v7647_v35 = vmax.f32 %v7640_v24, %v7642_v6  ;;  %v7739_v45 = vsel %vm440_vm3, %v7616_v36, -inf }
 0x606   : > { %v7740_v15 = vmax.f32 %v7733_v39, %v7739_v45  ;;  %v7643_v20 = vsel %vm440_vm3, %v7615_v37, -inf  ;;  %v10353_v0 = vpop.f32.mrb[14].mxu1 }
 0x607   : > { %v7644_v46 = vmax.f32 %v7637_v47, %v7643_v20  ;;  %v7618_v48 = vadd.f32 %v10353_v0, %v13146_v53  ;;  %v7475_v49 = vpop.f32.mrb[15].mxu1 }
 0x608   : > { %v7617_v50 = vadd.f32 %v13146_v53, %v7475_v49 }
 0x609   : > { %v7741_v26 = vsel %vm440_vm3, %v7618_v48, -inf }
 0x60a   : > { %v7742_v58 = vmax.f32 %v7734_v52, %v7741_v26  ;;  %v7645_v60 = vsel %vm440_vm3, %v7617_v50, -inf  ;;  %v10356_v17 = vpop.f32.mrb[16].mxu1  ;;  %v7848_v50 = vld [vmem:[%s13311_s5 + $0x10] sm:$0xff] }
 0x60b   : > { %v7646_v22 = vmax.f32 %v7638_v55, %v7645_v60  ;;  %v7485_v25 = vpop.f32.mrb[17].mxu1  ;;  %v7620_v38 = vadd.f32 %v10356_v17, %v13146_v53 }
 0x60c   : > { %v7744_v27 = vmax.f32 %v7740_v15, %v7742_v58  ;;  %v7619_v61 = vadd.f32 %v13146_v53, %v7485_v25 }
 0x60d   : > { %v7648_v31 = vmax.f32 %v7644_v46, %v7646_v22  ;;  %v7923_v5 = vsel %vm440_vm3, %v7620_v38, -inf }
 0x60e   : > { %v7745_v12 = vmax.f32 %v7743_v1, %v7744_v27  ;;  %v10359_v32 = vpop.f32.mrb[18].mxu1  ;;  %v7827_v29 = vsel %vm440_vm3, %v7619_v61, -inf }
 0x60f   : > { %v7649_v14 = vmax.f32 %v7647_v35, %v7648_v31  ;;  %v7495_v43 = vpop.f32.mrb[19].mxu1  ;;  %v7622_v28 = vadd.f32 %v10359_v32, %v13146_v53 }
 0x610   : > { %v7746_v51 = vrot.slane %v7745_v12, 4  ;;  %v7621_v8 = vadd.f32 %v13146_v53, %v7495_v43 }
 0x611   : > { %v7650_v16 = vrot.slane %v7649_v14, 4  ;;  %v7924_v39 = vsel %vm440_vm3, %v7622_v28, -inf }
 0x612   : > { %v10362_v23 = vpop.f32.mrb[20].mxu1  ;;  %v7747_v42 = vmax.f32 %v7745_v12, %v7746_v51  ;;  %v7828_v45 = vsel %vm440_vm3, %v7621_v8, -inf  ;;  %v496_v8 = vld [vmem:[%s13312_s6] sm:$0x1] }
 0x613   : > { %v7651_v4 = vmax.f32 %v7649_v14, %v7650_v16  ;;  %v7505_v33 = vpop.f32.mrb[21].mxu1  ;;  %v7624_v30 = vadd.f32 %v10362_v23, %v13146_v53 }
 0x614   : > { %v7748_v44 = vrot.slane %v7747_v42, 2  ;;  %v7623_v47 = vadd.f32 %v13146_v53, %v7505_v33 }
 0x615   : > { %v7652_v63 = vrot.slane %v7651_v4, 2  ;;  %v7925_v55 = vsel %vm440_vm3, %v7624_v30, -inf }
 0x616   : > { %v10365_v13 = vpop.f32.mrb[22].mxu1  ;;  %v7749_v3 = vmax.f32 %v7747_v42, %v7748_v44  ;;  %v7829_v22 = vsel %vm440_vm3, %v7623_v47, -inf }
 0x617   : > { %v7653_v54 = vmax.f32 %v7651_v4, %v7652_v63  ;;  %v7515_v56 = vpop.f32.mrb[23].mxu1  ;;  %v7626_v58 = vadd.f32 %v10365_v13, %v13146_v53 }
 0x618   : > { %v7750_v6 = vrot.slane %v7749_v3, 1  ;;  %v7625_v25 = vadd.f32 %v13146_v53, %v7515_v56 }
 0x619   : > { %v7654_v62 = vrot.slane %v7653_v54, 1  ;;  %v7926_v16 = vsel %vm440_vm3, %v7626_v58, -inf }
 0x61a   : > { %v10368_v21 = vpop.f32.mrb[24].mxu1  ;;  %v7751_v49 = vmax.f32 %v7749_v3, %v7750_v6  ;;  %v7830_v42 = vsel %vm440_vm3, %v7625_v25, -inf }
 0x61b   : > { %v7655_v40 = vmax.f32 %v7653_v54, %v7654_v62  ;;  %v7628_v24 = vadd.f32 %v10368_v21, %v13146_v53  ;;  %v7525_v41 = vpop.f32.mrb[25].mxu1 }
 0x61c   : > { %v7627_v2 = vadd.f32 %v13146_v53, %v7525_v41 }
 0x61d   : > { %v7927_v34 = vsel %vm440_vm3, %v7628_v24, -inf  ;;  %10381 = vmatmul.mubr.msk.f32.vlgmr.msra.gmra.mrb[32].mxu0 %vm440_vm3, %v7655_v40 }
 0x61e   : > { %v7928_v9 = vmax.f32 %v7923_v5, %v7927_v34  ;;  %v7831_v10 = vsel %vm440_vm3, %v7627_v2, -inf  ;;  %v10371_v11 = vpop.f32.mrb[26].mxu1  ;;  %10384 = vmatpush3.msra.mxu0 %v7752_v7  ;;  %10385 = vmatprep.mubr.msk.f32.mxu0 %vm11058_vm7, %v13594_v57  ;;  %v7944_v2 = vld [vmem:[%s13311_s5 + $0x18] sm:$0xff]  ;;  %v8099_v34 = vld [vmem:[%s13315_s9] sm:$0xff] }
 0x61f   : > { %v7832_v36 = vmax.f32 %v7827_v29, %v7831_v10  ;;  %v7630_v19 = vadd.f32 %v10371_v11, %v13146_v53  ;;  %v7535_v1 = vpop.f32.mrb[27].mxu1  ;;  %10388 = vmatprep.subr.mxu0 %v13594_v57  ;;  %v8100_v29 = vld [vmem:[%s13315_s9 + $0x8] sm:$0xff] }
 0x620   : > { %v7629_v37 = vadd.f32 %v13146_v53, %v7535_v1  ;;  %v10427_v10 = vpack.c.bf16 %v8100_v29, %v8099_v34 }
 0x621   : > { %v7929_v35 = vsel %vm440_vm3, %v7630_v19, -inf  ;;  %v8102_v19 = vld [vmem:[%s13315_s9 + $0x18] sm:$0xff] }
 0x622   : > { %v7930_v59 = vmax.f32 %v7924_v39, %v7929_v35  ;;  %v7833_v15 = vsel %vm440_vm3, %v7629_v37, -inf  ;;  %v10374_v20 = vpop.f32.mrb[28].mxu1  ;;  %v8023_v37 = vld [vmem:[%s13314_s8] sm:$0x1] }
 0x623   : > { %v7834_v0 = vmax.f32 %v7828_v45, %v7833_v15  ;;  %v7632_v46 = vadd.f32 %v10374_v20, %v13146_v53  ;;  %v7545_v48 = vpop.f32.mrb[29].mxu1 }
 0x624   : > { %v7935_v52 = vmax.f32 %v7928_v9, %v7930_v59  ;;  %v7631_v26 = vadd.f32 %v13146_v53, %v7545_v48 }
 0x625   : > { %v7839_v60 = vmax.f32 %v7832_v36, %v7834_v0  ;;  %v7931_v17 = vsel %vm440_vm3, %v7632_v46, -inf  ;;  %10386 = vmatmul.mubr.msk.f32.vlgmr.msra.gmra.mrb[32].mxu0 %vm440_vm3, %v7751_v49  ;;  %v8101_v36 = vld [vmem:[%s13315_s9 + $0x10] sm:$0xff] }
 0x626   : > { %v7932_v27 = vmax.f32 %v7925_v55, %v7931_v17  ;;  %v7835_v31 = vsel %vm440_vm3, %v7631_v26, -inf  ;;  %v10377_v12 = vpop.f32.mrb[30].mxu1  ;;  %10389 = vmatpush3.msra.mxu0 %v7848_v50  ;;  %10390 = vmatprep.mubr.msk.f32.mxu0 %vm11058_vm7, %v13594_v57  ;;  %v10430_v1 = vpack.c.bf16 %v8102_v19, %v8101_v36 }
 0x627   : > { %v7836_v32 = vmax.f32 %v7829_v22, %v7835_v31  ;;  %v7634_v14 = vadd.f32 %v10377_v12, %v13146_v53  ;;  %v7555_v43 = vpop.f32.mrb[31].mxu1  ;;  %10393 = vmatprep.subr.mxu0 %v13594_v57 }
 0x628   : > { %v7633_v51 = vadd.f32 %v13146_v53, %v7555_v43 }
 0x629   : > { %v7933_v23 = vsel %vm440_vm3, %v7634_v14, -inf }
 0x62a   : > { %v7934_v4 = vmax.f32 %v7926_v16, %v7933_v23  ;;  %v7837_v33 = vsel %vm440_vm3, %v7633_v51, -inf }
 0x62b   : > { %v7838_v63 = vmax.f32 %v7830_v42, %v7837_v33 }
 0x62c   : > { %v7936_v13 = vmax.f32 %v7932_v27, %v7934_v4 }
 0x62d   : > { %v7840_v44 = vmax.f32 %v7836_v32, %v7838_v63 }
 0x62e   : > { %v7937_v54 = vmax.f32 %v7935_v52, %v7936_v13 }
 0x62f   : > { %v7841_v56 = vmax.f32 %v7839_v60, %v7840_v44 }
 0x630   : > { %v7938_v62 = vrot.slane %v7937_v54, 4 }
 0x631   : > { %v7842_v38 = vrot.slane %v7841_v56, 4 }
 0x632   : > { %v7939_v61 = vmax.f32 %v7937_v54, %v7938_v62 }
 0x633   : > { %v7843_v21 = vmax.f32 %v7841_v56, %v7842_v38 }
 0x634   : > { %v7940_v53 = vrot.slane %v7939_v61, 2 }
 0x635   : > { %v7844_v3 = vrot.slane %v7843_v21, 2 }
 0x636   : > { %v7941_v41 = vmax.f32 %v7939_v61, %v7940_v53 }
 0x637   : > { %v7845_v40 = vmax.f32 %v7843_v21, %v7844_v3 }
 0x638   : > { %v7942_v5 = vrot.slane %v7941_v41, 1 }
 0x639   : > { %v7846_v24 = vrot.slane %v7845_v40, 1 }
 0x63a   : > { %v7943_v28 = vmax.f32 %v7941_v41, %v7942_v5 }
 0x63b   : > { %v7847_v7 = vmax.f32 %v7845_v40, %v7846_v24 }
 0x63d   : > { %10391 = vmatmul.mubr.msk.f32.vlgmr.msra.gmra.mrb[32].mxu0 %vm440_vm3, %v7847_v7 }
 0x63e   : > { %10394 = vmatpush3.msra.mxu0 %v7944_v2  ;;  %10395 = vmatprep.mubr.msk.f32.mxu0 %vm11058_vm7, %v13594_v57 }
 0x645   : > { %10396 = vmatmul.mubr.msk.f32.vlgmr.msra.gmra.mrb[32].mxu0 %vm440_vm3, %v7943_v28  ;;  %vm8177_vm3 = vcmask 32768  }
 0x718   : > { %v8014_v9 = vpop.f32.mrb[32].mxu0 }
 0x719   : > { %v10432_v11 = vadd.f32 %v8014_v9, %v496_v8  ;;  %v10397_v6 = vpop.f32.mrb[33].mxu0 }
 0x71b   : > { %10407 = vmatmul.mubr.msk.f32.vlgmr.msra.gmra.mrb[32].mxu1 %vm8024_vm8, %v10432_v11 }
 0x71c   : > { %10428 = vmatpush3.bf16.msra.mxu1 %v10427_v10  ;;  %10417 = vmatprep.mubr.msk.f32.mxu1 %vm11058_vm7, %v13594_v57 }
 0x71d   : > { %10429 = vmatprep.subr.bf16.mxu1 %v11059_v18  ;;  %v8103_v18 = vld [vmem:[%s13316_s10] sm:$0x1] }
 0x720   : > { %10431 = vmatpush3.bf16.msra.mxu1 %v10430_v1 }
 0x7ee   : > { %v8094_v39 = vpop.f32.mrb[32].mxu1 }
 0x7ef   : > { %v8095_v30 = vadd.f32 %v8094_v39, %v8023_v37  ;;  %v10408_v35 = vpop.f32.mrb[33].mxu1 }
 0x7f1   : > { %v8098_v57 = vmax.f32 %v8095_v30, 0.0 }
 0x7f3   : > { %10418 = vmatmul.mubr.msk.f32.vlgmr.msra.gmra.mrb[34].mxu1 %vm8024_vm8, %v8098_v57 }
 0x8c6   : > { %v8173_v45 = vpop.f32.mrb[34].mxu1 }
 0x8c7   : > { %v8174_v47 = vadd.f32 %v8173_v45, %v8103_v18  ;;  %v10419_v59 = vpop.f32.mrb[35].mxu1 }
 0x8c9   : > { %8178 = vst.msk [vmem:[%s378_s22] sm:$0x1] %vm8177_vm3, %v8174_v47 }
 0x8ca   : > { %11006 = shalt.err (!%p11003_p3)
}
 0x8cb   : > { %s11007_s13 = scalar_lea.hbm %s13264_s30, 16  ;;  %s11011_s25 = scalar_lea.hbm %s13317_s11, 32 }
 0x8cc   : > { %p11008_p4 = scmp.ne.s32.totalorder %s13264_s30, %s11007_s13  ;;  %p11012_p9 = scmp.lt.u32.totalorder %s13264_s30, %s13317_s11 }
 0x8cd   : > { %p11013_p10 = scmp.lt.u32.totalorder %s11011_s25, %s11007_s13  ;;  %p11015_p12 = scmp.lt.u32.totalorder %s11007_s13, %s13264_s30 }
 0x8ce   : > { %p11009_p7 = pnand %p11008_p4, %p11159_p5 }
 0x8cf   : > { %p11014_p11 = por %p11013_p10, %p11012_p9 }
 0x8d0   : > { %p11010_p8 = pneg %p11009_p7 }
 0x8d1   : > { %p11016_p13 = por %p11015_p12, %p11014_p11 }
 0x8d3   : > { %p11017_p0 = pnand %p11016_p13, %p11010_p8 }
 0x8d5   : > { %11020 = shalt.err (!%p11017_p0)
}
 0x8d6   : > { %10951 = dma.vmem_to_hbm [thread:$0]  (%p11159_p5), %s13266_s24, 16, %s13264_s30, %s8180_s12  }
 0x8d7 PF: > { %p10957_p1 = scmp.ge.s32.totalorder %s11055_s20, 2  ;;  %s8204_s0 = sand.u32 1, %s11043_s17  }
 0x8d8   : > { %s8205_s14 = scalar_lea.sflag [#allocation5], %s8204_s0 }
 0x8d9   : > { %p10954_p2 = pnand %p10957_p1, %p11163_p6 }
 0x8db   : > { %11038 = dma.done.wait (!%p10954_p2), %s8205_s14, 16  }
 0x8dc   : > { %11040 = vsyncadd (!%p10954_p2), %s8205_s14, 4294967280  ;;  %p21_p3 = scmp.ge.s32.totalorder %s11146_s23, 4   ;;  %s13595_s17 = smov %s11047_s18 }
 0x8dd   : > { %s13596_s18 = smov %s11051_s19  ;;  %s13597_s19 = smov %s11157_s26 }
 0x8de   : > { %s13598_s20 = smov %s11146_s23  ;;  %23 = sbr.rel (!%p21_p3) target bundleno = 5 (0x5), region = 119 }
 0x8e5   :  { %8209 = vsyncpa [#allocation5], 1 }
 0x8e6   :  { %8211 = vsyncpa [#allocation5 + $0x1], 1 }

</bundles_post_ra>
